<compile_context>
chip_gen: v7x
topology: tpu7x:2x2x1
jax: 0.10.0
libtpu: 0.0.40
codegen_flags: <defaults>
</compile_context>

<pallas_src>
import numpy as np

import jax
import jax.numpy as jnp
from jax import lax
from jax.experimental import pallas as pl
from jax.experimental.pallas import tpu as pltpu

BN_EPS = 1e-5


def _make_kernel(num_topics, beta_temp, weight_infonce, full_batch, batch_tile,
                 exp_dtype):
    inv_bn = 1.0 / (1.0 + BN_EPS) ** 0.5      # eval BatchNorm1d, default stats
    inv_temp = 1.0 / beta_temp
    inv_b = 1.0 / float(full_batch)
    K = num_topics
    tb = batch_tile
    B = full_batch

    def kernel(x_ref, bertn_ref,
               w11_ref, b11_ref, w12_ref, b12_ref, w2_ref, b2_ref,
               mu2_ref, ivar2_ref, lvar2_ref,
               topic_ref, wordT_ref, wprj_ref, bprj_ref,
               out_ref,
               beta_sc, kl_acc, rec_acc, info_acc):
        f32 = jnp.float32
        bf16 = jnp.bfloat16
        p = pl.program_id(0)          # batch slice (parallel / megacore axis)
        i = pl.program_id(1)          # batch tile within slice (accumulation)
        nb = pl.num_programs(1)

        # ---- one-time (per slice / per core) work -----------------------------
        @pl.when(i == 0)
        def _init():
            kl_acc[...] = jnp.zeros_like(kl_acc)
            rec_acc[...] = jnp.zeros_like(rec_acc)
            info_acc[...] = jnp.zeros_like(info_acc)

            # beta = softmax(-pairwise_sq_dist(topic, word) / temp, dim=0).
            # The per-word ||w||^2 term is constant along the softmax axis and
            # cancels, so only the topic-norm and cross terms are kept.
            t16 = topic_ref[...]                                     # [K, E] bf16
            t = t16.astype(f32)
            tt = jnp.sum(t * t, axis=1, keepdims=True)               # [K, 1]
            tw = jnp.dot(t16, wordT_ref[...],
                         preferred_element_type=f32)                 # [K, V]
            bl = (2.0 * tw - tt) * inv_temp
            bl = bl - jnp.max(bl, axis=0, keepdims=True)
            eb = jnp.exp(bl)
            # exact divide: beta feeds the recon log-softmax.
            beta = eb / jnp.sum(eb, axis=0, keepdims=True)
            beta_sc[...] = beta.astype(bf16)

        # ---------------- encoder ----------------------------------------------
        x16 = x_ref[...]                                             # [TB, V] bf16
        h = jax.nn.softplus(
            jnp.dot(x16, w11_ref[...], preferred_element_type=f32) + b11_ref[...])
        h = jax.nn.softplus(
            jnp.dot(h.astype(bf16), w12_ref[...], preferred_element_type=f32)
            + b12_ref[...])
        h16 = h.astype(bf16)
        # fused fc21/fc22 -> [TB, 2K]; mean_bn / logvar_bn (eval) share the scale.
        mlv = (jnp.dot(h16, w2_ref[...], preferred_element_type=f32)
               + b2_ref[...]) * inv_bn
        mu = mlv[:, :K]
        logvar = mlv[:, K:]
        z = mu - jnp.max(mu, axis=1, keepdims=True)                  # eval: z = mu
        ez = jnp.exp(z)
        theta = ez * pl.reciprocal(jnp.sum(ez, axis=1, keepdims=True),
                                   approx=True)                      # [TB, K]
        theta16 = theta.astype(bf16)

        # ---------------- KL(q || prior) ----------------------------------------
        var = jnp.exp(logvar)
        diff = mu - mu2_ref[...]
        term = (var + diff * diff) * ivar2_ref[...] + lvar2_ref[...] - logvar
        kld = 0.5 * (jnp.sum(term, axis=1, keepdims=True) - float(K))
        kl_acc[...] += jnp.sum(kld, axis=0, keepdims=True)

        # -------- reconstruction, fused as a log-softmax NLL ---------------------
        dec = jnp.dot(theta16, beta_sc[...],
                      preferred_element_type=f32) * inv_bn           # decoder_bn(eval)
        m = jnp.max(dec, axis=1, keepdims=True)
        e = jnp.exp((dec - m).astype(exp_dtype))                     # EUP in bf16
        lse = m + jnp.log(jnp.sum(e.astype(f32), axis=1, keepdims=True))
        xf = x16.astype(f32)                                         # short live range
        xs = jnp.sum(xf, axis=1, keepdims=True)
        xd = jnp.sum(xf * dec, axis=1, keepdims=True)
        rec_acc[...] += jnp.sum(xs * lse - xd, axis=0, keepdims=True)

        # ---------------- InfoNCE ------------------------------------------------
        pbow = (jnp.dot(theta16, wprj_ref[...], preferred_element_type=f32)
                + bprj_ref[...])                                     # [TB, C]
        pbow_n = pbow * lax.rsqrt(jnp.sum(pbow * pbow, axis=1, keepdims=True))
        sim = jnp.dot(pbow_n.astype(bf16), bertn_ref[...],
                      preferred_element_type=f32)                    # [TB, B]
        # diagonal (cos(i, i)) pulled straight out of sim with a lane mask.
        row = lax.broadcasted_iota(jnp.int32, (tb, B), 0)
        col = lax.broadcasted_iota(jnp.int32, (tb, B), 1)
        base = (p * nb + i) * tb
        diag = jnp.sum(jnp.where(col == base + row, sim, 0.0),
                       axis=1, keepdims=True)
        sm = jnp.max(sim, axis=1, keepdims=True)
        es = jnp.exp((sim - sm).astype(exp_dtype))
        lse_s = sm + jnp.log(jnp.sum(es.astype(f32), axis=1, keepdims=True))
        info_acc[...] += jnp.sum(lse_s - diag, axis=0, keepdims=True)

        # ---------------- finalize (per slice -> own output row) -----------------
        @pl.when(i == nb - 1)
        def _finish():
            loss_kl = kl_acc[...] * inv_b                            # (1, 1)
            recon = rec_acc[...] * inv_b
            info = info_acc[...] * (inv_b * weight_infonce)
            loss_tm = recon + loss_kl
            loss = loss_tm + info          # + ECR/DCR/TCR (external, 0 here)
            lane = lax.broadcasted_iota(jnp.int32, (1, 8, 128), 2)
            out = (jnp.where(lane == 0, loss, 0.0)
                   + jnp.where(lane == 1, loss_tm, 0.0)
                   + jnp.where(lane == 2, loss_kl, 0.0)
                   + jnp.where(lane == 3, recon, 0.0)
                   + jnp.where(lane == 4, info, 0.0))
            out_ref[...] = out

    return kernel


def _device_kind():
    try:
        return jax.devices()[0].device_kind.lower()
    except Exception:
        return ""


def _vmem_capacity_bytes(kind):
    try:
        return int(pltpu.get_tpu_info().vmem_capacity_bytes)
    except Exception:
        pass
    return (64 if "v7" in kind else 128) * (2 ** 20)


def topicot_forward(x, bert_emb, params, *, num_topics, beta_temp=0.2,
                    weight_infonce=10.0, batch_tile=None, num_slices=None):
    f32, bf16 = jnp.float32, jnp.bfloat16
    (w11t, b11, w12t, b12, w21t, b21, w22t, b22,
     mu2, var2, topic, word_t, wprjt, bprj) = params

    B, V = x.shape
    C = bert_emb.shape[1]
    K = num_topics

    kind = _device_kind()
    is_v5 = "v5" in kind
    is_v7 = "v7" in kind
    vmem_cap = _vmem_capacity_bytes(kind)
    usable = int(vmem_cap * 0.85)          # 100-110 MiB on v5e/v6e, ~54 MiB on v7x

    # bf16 operands for all big MXU matmuls (f32 accumulation in-kernel).
    x16 = x.astype(bf16)
    w11_16, w12_16 = w11t.astype(bf16), w12t.astype(bf16)
    # fc21/fc22 fused into one [U, 2K] weight.
    w2_16 = jnp.concatenate([w21t, w22t], axis=1).astype(bf16)
    b2 = jnp.concatenate([b21, b22], axis=1).astype(f32)
    topic16, word16 = topic.astype(bf16), word_t.astype(bf16)
    wprj16 = wprjt.astype(bf16)
    # Contextual embeddings: L2-normalize + transpose once in plain XLA; the
    # kernel only sees a single resident [C, B] bf16 operand.
    bert = bert_emb.astype(f32)
    bertn16 = (bert * lax.rsqrt(jnp.sum(bert * bert, axis=1,
                                        keepdims=True))).T.astype(bf16)
    inv_var2 = (1.0 / var2).astype(f32)
    log_var2 = jnp.log(var2).astype(f32)

    inputs = (x16, bertn16,
              w11_16, b11.astype(f32), w12_16, b12.astype(f32), w2_16, b2,
              mu2.astype(f32), inv_var2, log_var2,
              topic16, word16, wprj16, bprj.astype(f32))

    def _nbytes(a):
        return int(np.prod(a.shape)) * jnp.dtype(a.dtype).itemsize

    resident_bytes = sum(_nbytes(a) for a in inputs[1:])

    def estimate(tb):
        tile = 2 * tb * V * 2                         # double-buffered x tile (bf16)
        temps = 3 * tb * V * 4 + 3 * tb * B * 4       # dec/exp/x_f32 + sim temporaries
        scratch = K * V * 2 + 3 * 4096
        return 2 * resident_bytes + tile + temps + scratch

    if batch_tile is None:
        cands = (128, 64, 32, 16, 8) if is_v7 else (256, 128, 64, 32, 16, 8)
        batch_tile = None
        for t in cands:
            if B % t == 0 and estimate(t) <= usable:
                batch_tile = t
                break
        if batch_tile is None:
            batch_tile = B            # full-batch block (exempt from 8-divisibility)
    tb = batch_tile
    assert B % tb == 0, "batch must be divisible by batch_tile"
    n_blocks = B // tb

    if num_slices is None:
        num_slices = 2 if (is_v7 and n_blocks % 2 == 0) else 1
    if n_blocks % num_slices != 0:
        num_slices = 1
    nb = n_blocks // num_slices

    # v5e's EUP/VPU have no bf16; keep the big exps in f32 there.
    exp_dtype = jnp.float32 if is_v5 else jnp.bfloat16

    vmem_limit = int(min(max(2 * estimate(tb), 32 * 2 ** 20), usable))

    kernel = _make_kernel(num_topics, beta_temp, weight_infonce, B, tb, exp_dtype)

    def tiled_spec():
        return pl.BlockSpec((tb, V), lambda p, i: (p * nb + i, 0))

    def resident_spec(shape, single_buffer):
        idx = lambda p, i: (0, 0)
        if single_buffer:
            try:
                # Constant index_map -> one VMEM copy is enough.
                return pl.BlockSpec(shape, idx, pipeline_mode=pl.Buffered(1))
            except (TypeError, AttributeError):
                pass
        return pl.BlockSpec(shape, idx)

    def build(single_buffer_residents):
        in_specs = [tiled_spec()] + [
            resident_spec(a.shape, single_buffer_residents) for a in inputs[1:]]
        return pl.pallas_call(
            kernel,
            out_shape=jax.ShapeDtypeStruct((num_slices, 8, 128), jnp.float32),
            grid_spec=pltpu.PrefetchScalarGridSpec(
                num_scalar_prefetch=0,
                grid=(num_slices, nb),
                in_specs=in_specs,
                out_specs=pl.BlockSpec((1, 8, 128), lambda p, i: (p, 0, 0)),
                scratch_shapes=[
                    pltpu.VMEM((K, V), bf16),     # beta, computed once per slice
                    pltpu.VMEM((1, 1), f32),      # KL sum
                    pltpu.VMEM((1, 1), f32),      # recon NLL sum
                    pltpu.VMEM((1, 1), f32),      # InfoNCE sum
                ]),
            compiler_params=pltpu.CompilerParams(
                # slice axis -> parallel (2 TCs on v7x); batch axis carries the
                # loss accumulators -> arbitrary.
                dimension_semantics=("parallel", "arbitrary"),
                vmem_limit_bytes=vmem_limit),
        )

    try:
        out = build(True)(*inputs)
    except Exception:
        # Installed JAX may not honor pipeline_mode on pallas_call; retry with
        # default (double-buffered) resident specs.
        out = build(False)(*inputs)

    tot = jnp.sum(out[:, 0, :5], axis=0)      # sum partial losses over slices
    loss, loss_tm, loss_kl, recon_loss, info = (
        tot[0], tot[1], tot[2], tot[3], tot[4])
    zero = jnp.float32(0.0)
    return {
        "loss": loss,
        "loss_TM": loss_tm,
        "loss_ECR": zero,
        "loss_DCR": zero,
        "loss_TCR": zero,
        "loss_InfoNCE": info,
        "loss_KL": loss_kl,
        "recon_loss": recon_loss,
    }


def init_params(key, vocab_size, en_units, num_topics, embed_size, prj_dim):
    ks = jax.random.split(key, 12)

    def linear(kw, kb, fan_in, fan_out):
        bound = 1.0 / (fan_in ** 0.5)
        w_t = jax.random.uniform(kw, (fan_in, fan_out), jnp.float32, -bound, bound)
        b = jax.random.uniform(kb, (1, fan_out), jnp.float32, -bound, bound)
        return w_t, b                       # weight pre-transposed to [in, out]

    w11t, b11 = linear(ks[0], ks[1], vocab_size, en_units)
    w12t, b12 = linear(ks[2], ks[3], en_units, en_units)
    w21t, b21 = linear(ks[4], ks[5], en_units, num_topics)
    w22t, b22 = linear(ks[6], ks[7], en_units, num_topics)

    # prior: a = ones((1, K)) -> mu2 = 0, var2 = 1 - 1/K
    mu2 = jnp.zeros((1, num_topics), jnp.float32)
    var2 = jnp.full((1, num_topics), 1.0 - 1.0 / num_topics, jnp.float32)

    we = jax.random.truncated_normal(ks[8], -2.0, 2.0,
                                     (vocab_size, embed_size), jnp.float32)
    we = we / jnp.linalg.norm(we, axis=1, keepdims=True)         # F.normalize
    word_t = we.T                                                # [E, V]

    te = 0.1 * jax.random.truncated_normal(ks[9], -2.0, 2.0,
                                           (num_topics, embed_size), jnp.float32)
    topic = te / jnp.linalg.norm(te, axis=1, keepdims=True)      # [K, E]

    wprjt, bprj = linear(ks[10], ks[11], num_topics, prj_dim)    # prj_rep
    return (w11t, b11, w12t, b12, w21t, b21, w22t, b22,
            mu2, var2, topic, word_t, wprjt, bprj)


if __name__ == "__main__":
    # small shapes consistent with the module's forward
    V, U, K, E, C, B = 256, 128, 32, 64, 384, 32
    key = jax.random.PRNGKey(0)
    kx, kb, kp = jax.random.split(key, 3)

    # synthetic bag-of-words counts and contextual (SBERT-like) embeddings
    x = jnp.floor(jax.random.uniform(kx, (B, V), jnp.float32) * 3.0)
    bert = jax.random.normal(kb, (B, C), jnp.float32)

    params = init_params(kp, V, U, K, E, C)
    # batch_tile=8, num_slices=2 -> grid (2, 2): exercises the parallel slice
    # axis plus per-slice init / accumulate / finalize.
    rst = topicot_forward(x, bert, params, num_topics=K,
                          beta_temp=0.2, weight_infonce=10.0,
                          batch_tile=8, num_slices=2)
    jax.block_until_ready(rst["loss"])
    print("KERNEL_OK")
</pallas_src>

<mosaic_0001>
module attributes {stable_mosaic.version = 11 : i64} {
  func.func @kernel(%arg0: i32, %arg1: i32, %arg2: memref<8x256xbf16, #tpu.memory_space<vmem>>, %arg3: memref<384x32xbf16, #tpu.memory_space<vmem>>, %arg4: memref<256x128xbf16, #tpu.memory_space<vmem>>, %arg5: memref<1x128xf32, #tpu.memory_space<vmem>>, %arg6: memref<128x128xbf16, #tpu.memory_space<vmem>>, %arg7: memref<1x128xf32, #tpu.memory_space<vmem>>, %arg8: memref<128x64xbf16, #tpu.memory_space<vmem>>, %arg9: memref<1x64xf32, #tpu.memory_space<vmem>>, %arg10: memref<1x32xf32, #tpu.memory_space<vmem>>, %arg11: memref<1x32xf32, #tpu.memory_space<vmem>>, %arg12: memref<1x32xf32, #tpu.memory_space<vmem>>, %arg13: memref<32x64xbf16, #tpu.memory_space<vmem>>, %arg14: memref<64x256xbf16, #tpu.memory_space<vmem>>, %arg15: memref<32x384xbf16, #tpu.memory_space<vmem>>, %arg16: memref<1x384xf32, #tpu.memory_space<vmem>>, %arg17: memref<1x8x128xf32, #tpu.memory_space<vmem>>, %arg18: memref<32x256xbf16, #tpu.memory_space<vmem>>, %arg19: memref<1x1xf32, #tpu.memory_space<vmem>>, %arg20: memref<1x1xf32, #tpu.memory_space<vmem>>, %arg21: memref<1x1xf32, #tpu.memory_space<vmem>>) attributes {dimension_semantics = [#tpu.dimension_semantics<parallel>, #tpu.dimension_semantics<arbitrary>], iteration_bounds = array<i64: 2, 2>, scalar_prefetch = 0 : i64, scratch_operands = 4 : i64, tpu.core_type = #tpu.core_type<tc>, window_params = [{transform_indices = @transform_0, window_bounds = array<i64: 8, 256>}, {pipeline_mode = #tpu.pipeline_mode<synchronous>, transform_indices = @transform_1, window_bounds = array<i64: 384, 32>}, {pipeline_mode = #tpu.pipeline_mode<synchronous>, transform_indices = @transform_2, window_bounds = array<i64: 256, 128>}, {pipeline_mode = #tpu.pipeline_mode<synchronous>, transform_indices = @transform_3, window_bounds = array<i64: 1, 128>}, {pipeline_mode = #tpu.pipeline_mode<synchronous>, transform_indices = @transform_4, window_bounds = array<i64: 128, 128>}, {pipeline_mode = #tpu.pipeline_mode<synchronous>, transform_indices = @transform_5, window_bounds = array<i64: 1, 128>}, {pipeline_mode = #tpu.pipeline_mode<synchronous>, transform_indices = @transform_6, window_bounds = array<i64: 128, 64>}, {pipeline_mode = #tpu.pipeline_mode<synchronous>, transform_indices = @transform_7, window_bounds = array<i64: 1, 64>}, {pipeline_mode = #tpu.pipeline_mode<synchronous>, transform_indices = @transform_8, window_bounds = array<i64: 1, 32>}, {pipeline_mode = #tpu.pipeline_mode<synchronous>, transform_indices = @transform_9, window_bounds = array<i64: 1, 32>}, {pipeline_mode = #tpu.pipeline_mode<synchronous>, transform_indices = @transform_10, window_bounds = array<i64: 1, 32>}, {pipeline_mode = #tpu.pipeline_mode<synchronous>, transform_indices = @transform_11, window_bounds = array<i64: 32, 64>}, {pipeline_mode = #tpu.pipeline_mode<synchronous>, transform_indices = @transform_12, window_bounds = array<i64: 64, 256>}, {pipeline_mode = #tpu.pipeline_mode<synchronous>, transform_indices = @transform_13, window_bounds = array<i64: 32, 384>}, {pipeline_mode = #tpu.pipeline_mode<synchronous>, transform_indices = @transform_14, window_bounds = array<i64: 1, 384>}, {transform_indices = @transform_15, window_bounds = array<i64: 1, 8, 128>}]} {
    %c0_i32 = arith.constant 0 : i32
    %0 = arith.cmpi eq, %arg1, %c0_i32 : i32
    %1 = arith.extui %0 : i1 to i32
    %c0_i32_0 = arith.constant 0 : i32
    %2 = arith.cmpi ne, %1, %c0_i32_0 : i32
    scf.if %2 {
      %cst_69 = arith.constant 0.000000e+00 : f32
      %162 = vector.broadcast %cst_69 : f32 to vector<1x1xf32>
      %c0_70 = arith.constant 0 : index
      %c0_71 = arith.constant 0 : index
      %163 = vector.load %arg19[%c0_70, %c0_71] : memref<1x1xf32, #tpu.memory_space<vmem>>, vector<1x1xf32>
      tpu.vector_store %arg19[%c0_70, %c0_71], %162 {strides = array<i32>} : memref<1x1xf32, #tpu.memory_space<vmem>>, vector<1x1xf32>,
      %cst_72 = arith.constant 0.000000e+00 : f32
      %164 = vector.broadcast %cst_72 : f32 to vector<1x1xf32>
      %c0_73 = arith.constant 0 : index
      %c0_74 = arith.constant 0 : index
      %165 = vector.load %arg20[%c0_73, %c0_74] : memref<1x1xf32, #tpu.memory_space<vmem>>, vector<1x1xf32>
      tpu.vector_store %arg20[%c0_73, %c0_74], %164 {strides = array<i32>} : memref<1x1xf32, #tpu.memory_space<vmem>>, vector<1x1xf32>,
      %cst_75 = arith.constant 0.000000e+00 : f32
      %166 = vector.broadcast %cst_75 : f32 to vector<1x1xf32>
      %c0_76 = arith.constant 0 : index
      %c0_77 = arith.constant 0 : index
      %167 = vector.load %arg21[%c0_76, %c0_77] : memref<1x1xf32, #tpu.memory_space<vmem>>, vector<1x1xf32>
      tpu.vector_store %arg21[%c0_76, %c0_77], %166 {strides = array<i32>} : memref<1x1xf32, #tpu.memory_space<vmem>>, vector<1x1xf32>,
      %c0_78 = arith.constant 0 : index
      %c0_79 = arith.constant 0 : index
      %168 = vector.load %arg13[%c0_78, %c0_79] : memref<32x64xbf16, #tpu.memory_space<vmem>>, vector<32x64xbf16>
      %169 = arith.extf %168 : vector<32x64xbf16> to vector<32x64xf32>
      %170 = arith.mulf %169, %169 : vector<32x64xf32>
      %cst_80 = arith.constant dense<0.000000e+00> : vector<32xf32>
      %171 = vector.multi_reduction <add>, %170, %cst_80 [1] : vector<32x64xf32> to vector<32xf32>
      %172 = vector.shape_cast %171 : vector<32xf32> to vector<32x1xf32>
      %c0_81 = arith.constant 0 : index
      %c0_82 = arith.constant 0 : index
      %173 = vector.load %arg14[%c0_81, %c0_82] : memref<64x256xbf16, #tpu.memory_space<vmem>>, vector<64x256xbf16>
      %cst_83 = arith.constant dense<0.000000e+00> : vector<32x256xf32>
      %174 = tpu.matmul %168, %173, %cst_83 {dimension_numbers = #tpu.dot_dimension_numbers<[1], [0], [0], [1], [0, 0, 1, 1], [], []>} : vector<32x64xbf16>, vector<64x256xbf16>, vector<32x256xf32> -> vector<32x256xf32>
      %cst_84 = arith.constant 2.000000e+00 : f32
      %175 = vector.broadcast %cst_84 : f32 to vector<32x256xf32>
      %176 = arith.mulf %175, %174 : vector<32x256xf32>
      %177 = vector.broadcast %172 : vector<32x1xf32> to vector<32x256xf32>
      %178 = arith.subf %176, %177 : vector<32x256xf32>
      %cst_85 = arith.constant 5.000000e+00 : f32
      %179 = vector.broadcast %cst_85 : f32 to vector<32x256xf32>
      %180 = arith.mulf %178, %179 : vector<32x256xf32>
      %cst_86 = arith.constant dense<0xFF800000> : vector<256xf32>
      %181 = vector.multi_reduction <maximumf>, %180, %cst_86 [0] : vector<32x256xf32> to vector<256xf32>
      %182 = vector.shape_cast %181 : vector<256xf32> to vector<1x256xf32>
      %183 = vector.broadcast %182 : vector<1x256xf32> to vector<32x256xf32>
      %184 = arith.subf %180, %183 : vector<32x256xf32>
      %185 = math.exp %184 : vector<32x256xf32>
      %cst_87 = arith.constant dense<0.000000e+00> : vector<256xf32>
      %186 = vector.multi_reduction <add>, %185, %cst_87 [0] : vector<32x256xf32> to vector<256xf32>
      %187 = vector.shape_cast %186 : vector<256xf32> to vector<1x256xf32>
      %188 = vector.broadcast %187 : vector<1x256xf32> to vector<32x256xf32>
      %189 = arith.divf %185, %188 : vector<32x256xf32>
      %190 = arith.truncf %189 : vector<32x256xf32> to vector<32x256xbf16>
      %c0_88 = arith.constant 0 : index
      %c0_89 = arith.constant 0 : index
      %191 = vector.load %arg18[%c0_88, %c0_89] : memref<32x256xbf16, #tpu.memory_space<vmem>>, vector<32x256xbf16>
      tpu.vector_store %arg18[%c0_88, %c0_89], %190 {strides = array<i32>} : memref<32x256xbf16, #tpu.memory_space<vmem>>, vector<32x256xbf16>,
    } else {
    }
    %c0 = arith.constant 0 : index
    %c0_1 = arith.constant 0 : index
    %3 = vector.load %arg2[%c0, %c0_1] : memref<8x256xbf16, #tpu.memory_space<vmem>>, vector<8x256xbf16>
    %c0_2 = arith.constant 0 : index
    %c0_3 = arith.constant 0 : index
    %4 = vector.load %arg4[%c0_2, %c0_3] : memref<256x128xbf16, #tpu.memory_space<vmem>>, vector<256x128xbf16>
    %cst = arith.constant dense<0.000000e+00> : vector<8x128xf32>
    %5 = tpu.matmul %3, %4, %cst {dimension_numbers = #tpu.dot_dimension_numbers<[1], [0], [0], [1], [0, 0, 1, 1], [], []>} : vector<8x256xbf16>, vector<256x128xbf16>, vector<8x128xf32> -> vector<8x128xf32>
    %c0_4 = arith.constant 0 : index
    %c0_5 = arith.constant 0 : index
    %6 = vector.load %arg5[%c0_4, %c0_5] : memref<1x128xf32, #tpu.memory_space<vmem>>, vector<1x128xf32>
    %7 = vector.broadcast %6 : vector<1x128xf32> to vector<8x128xf32>
    %8 = arith.addf %5, %7 : vector<8x128xf32>
    %cst_6 = arith.constant 0.000000e+00 : f32
    %9 = vector.broadcast %cst_6 : f32 to vector<8x128xf32>
    %10 = arith.maximumf %8, %9 : vector<8x128xf32>
    %11 = vector.broadcast %cst_6 : f32 to vector<8x128xf32>
    %12 = arith.subf %8, %11 : vector<8x128xf32>
    %13 = arith.cmpf one, %12, %12 : vector<8x128xf32>
    %14 = vector.broadcast %cst_6 : f32 to vector<8x128xf32>
    %15 = arith.addf %8, %14 : vector<8x128xf32>
    %16 = math.absf %12 : vector<8x128xf32>
    %cst_7 = arith.constant 0.000000e+00 : f32
    %17 = vector.broadcast %cst_7 : f32 to vector<8x128xf32>
    %18 = arith.subf %17, %16 : vector<8x128xf32>
    %19 = math.exp %18 : vector<8x128xf32>
    %20 = math.log1p %19 : vector<8x128xf32>
    %21 = arith.addf %10, %20 : vector<8x128xf32>
    %22 = arith.select %13, %15, %21 : vector<8x128xi1>, vector<8x128xf32>
    %23 = arith.truncf %22 : vector<8x128xf32> to vector<8x128xbf16>
    %c0_8 = arith.constant 0 : index
    %c0_9 = arith.constant 0 : index
    %24 = vector.load %arg6[%c0_8, %c0_9] : memref<128x128xbf16, #tpu.memory_space<vmem>>, vector<128x128xbf16>
    %cst_10 = arith.constant dense<0.000000e+00> : vector<8x128xf32>
    %25 = tpu.matmul %23, %24, %cst_10 {dimension_numbers = #tpu.dot_dimension_numbers<[1], [0], [0], [1], [0, 0, 1, 1], [], []>} : vector<8x128xbf16>, vector<128x128xbf16>, vector<8x128xf32> -> vector<8x128xf32>
    %c0_11 = arith.constant 0 : index
    %c0_12 = arith.constant 0 : index
    %26 = vector.load %arg7[%c0_11, %c0_12] : memref<1x128xf32, #tpu.memory_space<vmem>>, vector<1x128xf32>
    %27 = vector.broadcast %26 : vector<1x128xf32> to vector<8x128xf32>
    %28 = arith.addf %25, %27 : vector<8x128xf32>
    %cst_13 = arith.constant 0.000000e+00 : f32
    %29 = vector.broadcast %cst_13 : f32 to vector<8x128xf32>
    %30 = arith.maximumf %28, %29 : vector<8x128xf32>
    %31 = vector.broadcast %cst_13 : f32 to vector<8x128xf32>
    %32 = arith.subf %28, %31 : vector<8x128xf32>
    %33 = arith.cmpf one, %32, %32 : vector<8x128xf32>
    %34 = vector.broadcast %cst_13 : f32 to vector<8x128xf32>
    %35 = arith.addf %28, %34 : vector<8x128xf32>
    %36 = math.absf %32 : vector<8x128xf32>
    %cst_14 = arith.constant 0.000000e+00 : f32
    %37 = vector.broadcast %cst_14 : f32 to vector<8x128xf32>
    %38 = arith.subf %37, %36 : vector<8x128xf32>
    %39 = math.exp %38 : vector<8x128xf32>
    %40 = math.log1p %39 : vector<8x128xf32>
    %41 = arith.addf %30, %40 : vector<8x128xf32>
    %42 = arith.select %33, %35, %41 : vector<8x128xi1>, vector<8x128xf32>
    %43 = arith.truncf %42 : vector<8x128xf32> to vector<8x128xbf16>
    %c0_15 = arith.constant 0 : index
    %c0_16 = arith.constant 0 : index
    %44 = vector.load %arg8[%c0_15, %c0_16] : memref<128x64xbf16, #tpu.memory_space<vmem>>, vector<128x64xbf16>
    %cst_17 = arith.constant dense<0.000000e+00> : vector<8x64xf32>
    %45 = tpu.matmul %43, %44, %cst_17 {dimension_numbers = #tpu.dot_dimension_numbers<[1], [0], [0], [1], [0, 0, 1, 1], [], []>} : vector<8x128xbf16>, vector<128x64xbf16>, vector<8x64xf32> -> vector<8x64xf32>
    %c0_18 = arith.constant 0 : index
    %c0_19 = arith.constant 0 : index
    %46 = vector.load %arg9[%c0_18, %c0_19] : memref<1x64xf32, #tpu.memory_space<vmem>>, vector<1x64xf32>
    %47 = vector.broadcast %46 : vector<1x64xf32> to vector<8x64xf32>
    %48 = arith.addf %45, %47 : vector<8x64xf32>
    %cst_20 = arith.constant 0.999994993 : f32
    %49 = vector.broadcast %cst_20 : f32 to vector<8x64xf32>
    %50 = arith.mulf %48, %49 : vector<8x64xf32>
    %51 = vector.extract_strided_slice %50 {offsets = [0, 0], sizes = [8, 32], strides = [1, 1]} : vector<8x64xf32> to vector<8x32xf32>
    %52 = vector.extract_strided_slice %50 {offsets = [0, 32], sizes = [8, 32], strides = [1, 1]} : vector<8x64xf32> to vector<8x32xf32>
    %cst_21 = arith.constant dense<0xFF800000> : vector<8xf32>
    %53 = vector.multi_reduction <maximumf>, %51, %cst_21 [1] : vector<8x32xf32> to vector<8xf32>
    %54 = vector.shape_cast %53 : vector<8xf32> to vector<8x1xf32>
    %55 = vector.broadcast %54 : vector<8x1xf32> to vector<8x32xf32>
    %56 = arith.subf %51, %55 : vector<8x32xf32>
    %57 = math.exp %56 : vector<8x32xf32>
    %cst_22 = arith.constant dense<0.000000e+00> : vector<8xf32>
    %58 = vector.multi_reduction <add>, %57, %cst_22 [1] : vector<8x32xf32> to vector<8xf32>
    %59 = vector.shape_cast %58 : vector<8xf32> to vector<8x1xf32>
    %60 = tpu.reciprocal %59 {approx = true} : vector<8x1xf32> -> vector<8x1xf32>
    %61 = vector.broadcast %60 : vector<8x1xf32> to vector<8x32xf32>
    %62 = arith.mulf %57, %61 : vector<8x32xf32>
    %63 = arith.truncf %62 : vector<8x32xf32> to vector<8x32xbf16>
    %64 = math.exp %52 : vector<8x32xf32>
    %c0_23 = arith.constant 0 : index
    %c0_24 = arith.constant 0 : index
    %65 = vector.load %arg10[%c0_23, %c0_24] : memref<1x32xf32, #tpu.memory_space<vmem>>, vector<1x32xf32>
    %66 = vector.broadcast %65 : vector<1x32xf32> to vector<8x32xf32>
    %67 = arith.subf %51, %66 : vector<8x32xf32>
    %68 = arith.mulf %67, %67 : vector<8x32xf32>
    %69 = arith.addf %64, %68 : vector<8x32xf32>
    %c0_25 = arith.constant 0 : index
    %c0_26 = arith.constant 0 : index
    %70 = vector.load %arg11[%c0_25, %c0_26] : memref<1x32xf32, #tpu.memory_space<vmem>>, vector<1x32xf32>
    %71 = vector.broadcast %70 : vector<1x32xf32> to vector<8x32xf32>
    %72 = arith.mulf %69, %71 : vector<8x32xf32>
    %c0_27 = arith.constant 0 : index
    %c0_28 = arith.constant 0 : index
    %73 = vector.load %arg12[%c0_27, %c0_28] : memref<1x32xf32, #tpu.memory_space<vmem>>, vector<1x32xf32>
    %74 = vector.broadcast %73 : vector<1x32xf32> to vector<8x32xf32>
    %75 = arith.addf %72, %74 : vector<8x32xf32>
    %76 = arith.subf %75, %52 : vector<8x32xf32>
    %cst_29 = arith.constant dense<0.000000e+00> : vector<8xf32>
    %77 = vector.multi_reduction <add>, %76, %cst_29 [1] : vector<8x32xf32> to vector<8xf32>
    %78 = vector.shape_cast %77 : vector<8xf32> to vector<8x1xf32>
    %cst_30 = arith.constant 3.200000e+01 : f32
    %79 = vector.broadcast %cst_30 : f32 to vector<8x1xf32>
    %80 = arith.subf %78, %79 : vector<8x1xf32>
    %cst_31 = arith.constant 5.000000e-01 : f32
    %81 = vector.broadcast %cst_31 : f32 to vector<8x1xf32>
    %82 = arith.mulf %81, %80 : vector<8x1xf32>
    %c0_32 = arith.constant 0 : index
    %c0_33 = arith.constant 0 : index
    %83 = vector.load %arg19[%c0_32, %c0_33] : memref<1x1xf32, #tpu.memory_space<vmem>>, vector<1x1xf32>
    %cst_34 = arith.constant dense<0.000000e+00> : vector<1xf32>
    %84 = vector.multi_reduction <add>, %82, %cst_34 [0] : vector<8x1xf32> to vector<1xf32>
    %85 = vector.shape_cast %84 : vector<1xf32> to vector<1x1xf32>
    %86 = arith.addf %83, %85 : vector<1x1xf32>
    %c0_35 = arith.constant 0 : index
    %c0_36 = arith.constant 0 : index
    %87 = vector.load %arg19[%c0_35, %c0_36] : memref<1x1xf32, #tpu.memory_space<vmem>>, vector<1x1xf32>
    tpu.vector_store %arg19[%c0_35, %c0_36], %86 {strides = array<i32>} : memref<1x1xf32, #tpu.memory_space<vmem>>, vector<1x1xf32>,
    %c0_37 = arith.constant 0 : index
    %c0_38 = arith.constant 0 : index
    %88 = vector.load %arg18[%c0_37, %c0_38] : memref<32x256xbf16, #tpu.memory_space<vmem>>, vector<32x256xbf16>
    %cst_39 = arith.constant dense<0.000000e+00> : vector<8x256xf32>
    %89 = tpu.matmul %63, %88, %cst_39 {dimension_numbers = #tpu.dot_dimension_numbers<[1], [0], [0], [1], [0, 0, 1, 1], [], []>} : vector<8x32xbf16>, vector<32x256xbf16>, vector<8x256xf32> -> vector<8x256xf32>
    %cst_40 = arith.constant 0.999994993 : f32
    %90 = vector.broadcast %cst_40 : f32 to vector<8x256xf32>
    %91 = arith.mulf %89, %90 : vector<8x256xf32>
    %cst_41 = arith.constant dense<0xFF800000> : vector<8xf32>
    %92 = vector.multi_reduction <maximumf>, %91, %cst_41 [1] : vector<8x256xf32> to vector<8xf32>
    %93 = vector.shape_cast %92 : vector<8xf32> to vector<8x1xf32>
    %94 = vector.broadcast %93 : vector<8x1xf32> to vector<8x256xf32>
    %95 = arith.subf %91, %94 : vector<8x256xf32>
    %96 = arith.truncf %95 : vector<8x256xf32> to vector<8x256xbf16>
    %97 = math.exp %96 : vector<8x256xbf16>
    %98 = arith.extf %97 : vector<8x256xbf16> to vector<8x256xf32>
    %cst_42 = arith.constant dense<0.000000e+00> : vector<8xf32>
    %99 = vector.multi_reduction <add>, %98, %cst_42 [1] : vector<8x256xf32> to vector<8xf32>
    %100 = vector.shape_cast %99 : vector<8xf32> to vector<8x1xf32>
    %101 = math.log %100 : vector<8x1xf32>
    %102 = arith.addf %93, %101 : vector<8x1xf32>
    %103 = arith.extf %3 : vector<8x256xbf16> to vector<8x256xf32>
    %cst_43 = arith.constant dense<0.000000e+00> : vector<8xf32>
    %104 = vector.multi_reduction <add>, %103, %cst_43 [1] : vector<8x256xf32> to vector<8xf32>
    %105 = vector.shape_cast %104 : vector<8xf32> to vector<8x1xf32>
    %106 = arith.mulf %103, %91 : vector<8x256xf32>
    %cst_44 = arith.constant dense<0.000000e+00> : vector<8xf32>
    %107 = vector.multi_reduction <add>, %106, %cst_44 [1] : vector<8x256xf32> to vector<8xf32>
    %108 = vector.shape_cast %107 : vector<8xf32> to vector<8x1xf32>
    %c0_45 = arith.constant 0 : index
    %c0_46 = arith.constant 0 : index
    %109 = vector.load %arg20[%c0_45, %c0_46] : memref<1x1xf32, #tpu.memory_space<vmem>>, vector<1x1xf32>
    %110 = arith.mulf %105, %102 : vector<8x1xf32>
    %111 = arith.subf %110, %108 : vector<8x1xf32>
    %cst_47 = arith.constant dense<0.000000e+00> : vector<1xf32>
    %112 = vector.multi_reduction <add>, %111, %cst_47 [0] : vector<8x1xf32> to vector<1xf32>
    %113 = vector.shape_cast %112 : vector<1xf32> to vector<1x1xf32>
    %114 = arith.addf %109, %113 : vector<1x1xf32>
    %c0_48 = arith.constant 0 : index
    %c0_49 = arith.constant 0 : index
    %115 = vector.load %arg20[%c0_48, %c0_49] : memref<1x1xf32, #tpu.memory_space<vmem>>, vector<1x1xf32>
    tpu.vector_store %arg20[%c0_48, %c0_49], %114 {strides = array<i32>} : memref<1x1xf32, #tpu.memory_space<vmem>>, vector<1x1xf32>,
    %c0_50 = arith.constant 0 : index
    %c0_51 = arith.constant 0 : index
    %116 = vector.load %arg15[%c0_50, %c0_51] : memref<32x384xbf16, #tpu.memory_space<vmem>>, vector<32x384xbf16>
    %cst_52 = arith.constant dense<0.000000e+00> : vector<8x384xf32>
    %117 = tpu.matmul %63, %116, %cst_52 {dimension_numbers = #tpu.dot_dimension_numbers<[1], [0], [0], [1], [0, 0, 1, 1], [], []>} : vector<8x32xbf16>, vector<32x384xbf16>, vector<8x384xf32> -> vector<8x384xf32>
    %c0_53 = arith.constant 0 : index
    %c0_54 = arith.constant 0 : index
    %118 = vector.load %arg16[%c0_53, %c0_54] : memref<1x384xf32, #tpu.memory_space<vmem>>, vector<1x384xf32>
    %119 = vector.broadcast %118 : vector<1x384xf32> to vector<8x384xf32>
    %120 = arith.addf %117, %119 : vector<8x384xf32>
    %121 = arith.mulf %120, %120 : vector<8x384xf32>
    %cst_55 = arith.constant dense<0.000000e+00> : vector<8xf32>
    %122 = vector.multi_reduction <add>, %121, %cst_55 [1] : vector<8x384xf32> to vector<8xf32>
    %123 = vector.shape_cast %122 : vector<8xf32> to vector<8x1xf32>
    %124 = math.rsqrt %123 : vector<8x1xf32>
    %125 = vector.broadcast %124 : vector<8x1xf32> to vector<8x384xf32>
    %126 = arith.mulf %120, %125 : vector<8x384xf32>
    %127 = arith.truncf %126 : vector<8x384xf32> to vector<8x384xbf16>
    %c0_56 = arith.constant 0 : index
    %c0_57 = arith.constant 0 : index
    %128 = vector.load %arg3[%c0_56, %c0_57] : memref<384x32xbf16, #tpu.memory_space<vmem>>, vector<384x32xbf16>
    %cst_58 = arith.constant dense<0.000000e+00> : vector<8x32xf32>
    %129 = tpu.matmul %127, %128, %cst_58 {dimension_numbers = #tpu.dot_dimension_numbers<[1], [0], [0], [1], [0, 0, 1, 1], [], []>} : vector<8x384xbf16>, vector<384x32xbf16>, vector<8x32xf32> -> vector<8x32xf32>
    %130 = tpu.iota {dimensions = array<i32: 0>} : vector<8x32xi32>
    %131 = tpu.iota {dimensions = array<i32: 1>} : vector<8x32xi32>
    %c2_i32 = arith.constant 2 : i32
    %132 = arith.muli %arg0, %c2_i32 : i32
    %133 = arith.addi %132, %arg1 : i32
    %c8_i32 = arith.constant 8 : i32
    %134 = arith.muli %133, %c8_i32 : i32
    %135 = vector.broadcast %134 : i32 to vector<8x32xi32>
    %136 = arith.addi %135, %130 : vector<8x32xi32>
    %137 = arith.cmpi eq, %131, %136 : vector<8x32xi32>
    %cst_59 = arith.constant 0.000000e+00 : f32
    %138 = vector.broadcast %cst_59 : f32 to vector<8x32xf32>
    %139 = arith.select %137, %129, %138 : vector<8x32xi1>, vector<8x32xf32>
    %cst_60 = arith.constant dense<0.000000e+00> : vector<8xf32>
    %140 = vector.multi_reduction <add>, %139, %cst_60 [1] : vector<8x32xf32> to vector<8xf32>
    %141 = vector.shape_cast %140 : vector<8xf32> to vector<8x1xf32>
    %cst_61 = arith.constant dense<0xFF800000> : vector<8xf32>
    %142 = vector.multi_reduction <maximumf>, %129, %cst_61 [1] : vector<8x32xf32> to vector<8xf32>
    %143 = vector.shape_cast %142 : vector<8xf32> to vector<8x1xf32>
    %144 = vector.broadcast %143 : vector<8x1xf32> to vector<8x32xf32>
    %145 = arith.subf %129, %144 : vector<8x32xf32>
    %146 = arith.truncf %145 : vector<8x32xf32> to vector<8x32xbf16>
    %147 = math.exp %146 : vector<8x32xbf16>
    %148 = arith.extf %147 : vector<8x32xbf16> to vector<8x32xf32>
    %cst_62 = arith.constant dense<0.000000e+00> : vector<8xf32>
    %149 = vector.multi_reduction <add>, %148, %cst_62 [1] : vector<8x32xf32> to vector<8xf32>
    %150 = vector.shape_cast %149 : vector<8xf32> to vector<8x1xf32>
    %151 = math.log %150 : vector<8x1xf32>
    %152 = arith.addf %143, %151 : vector<8x1xf32>
    %c0_63 = arith.constant 0 : index
    %c0_64 = arith.constant 0 : index
    %153 = vector.load %arg21[%c0_63, %c0_64] : memref<1x1xf32, #tpu.memory_space<vmem>>, vector<1x1xf32>
    %154 = arith.subf %152, %141 : vector<8x1xf32>
    %cst_65 = arith.constant dense<0.000000e+00> : vector<1xf32>
    %155 = vector.multi_reduction <add>, %154, %cst_65 [0] : vector<8x1xf32> to vector<1xf32>
    %156 = vector.shape_cast %155 : vector<1xf32> to vector<1x1xf32>
    %157 = arith.addf %153, %156 : vector<1x1xf32>
    %c0_66 = arith.constant 0 : index
    %c0_67 = arith.constant 0 : index
    %158 = vector.load %arg21[%c0_66, %c0_67] : memref<1x1xf32, #tpu.memory_space<vmem>>, vector<1x1xf32>
    tpu.vector_store %arg21[%c0_66, %c0_67], %157 {strides = array<i32>} : memref<1x1xf32, #tpu.memory_space<vmem>>, vector<1x1xf32>,
    %c1_i32 = arith.constant 1 : i32
    %159 = arith.cmpi eq, %arg1, %c1_i32 : i32
    %160 = arith.extui %159 : i1 to i32
    %c0_i32_68 = arith.constant 0 : i32
    %161 = arith.cmpi ne, %160, %c0_i32_68 : i32
    scf.if %161 {
      %c0_69 = arith.constant 0 : index
      %c0_70 = arith.constant 0 : index
      %162 = vector.load %arg19[%c0_69, %c0_70] : memref<1x1xf32, #tpu.memory_space<vmem>>, vector<1x1xf32>
      %cst_71 = arith.constant 3.125000e-02 : f32
      %163 = vector.broadcast %cst_71 : f32 to vector<1x1xf32>
      %164 = arith.mulf %162, %163 : vector<1x1xf32>
      %c0_72 = arith.constant 0 : index
      %c0_73 = arith.constant 0 : index
      %165 = vector.load %arg20[%c0_72, %c0_73] : memref<1x1xf32, #tpu.memory_space<vmem>>, vector<1x1xf32>
      %cst_74 = arith.constant 3.125000e-02 : f32
      %166 = vector.broadcast %cst_74 : f32 to vector<1x1xf32>
      %167 = arith.mulf %165, %166 : vector<1x1xf32>
      %c0_75 = arith.constant 0 : index
      %c0_76 = arith.constant 0 : index
      %168 = vector.load %arg21[%c0_75, %c0_76] : memref<1x1xf32, #tpu.memory_space<vmem>>, vector<1x1xf32>
      %cst_77 = arith.constant 3.125000e-01 : f32
      %169 = vector.broadcast %cst_77 : f32 to vector<1x1xf32>
      %170 = arith.mulf %168, %169 : vector<1x1xf32>
      %171 = arith.addf %167, %164 : vector<1x1xf32>
      %172 = arith.addf %171, %170 : vector<1x1xf32>
      %173 = tpu.iota {dimensions = array<i32: 2>} : vector<1x8x128xi32>
      %c0_i32_78 = arith.constant 0 : i32
      %174 = vector.broadcast %c0_i32_78 : i32 to vector<1x8x128xi32>
      %175 = arith.cmpi eq, %173, %174 : vector<1x8x128xi32>
      %cst_79 = arith.constant 0.000000e+00 : f32
      %176 = vector.shape_cast %172 : vector<1x1xf32> to vector<1x1x1xf32>
      %177 = vector.broadcast %176 : vector<1x1x1xf32> to vector<1x8x128xf32>
      %178 = vector.broadcast %cst_79 : f32 to vector<1x8x128xf32>
      %179 = arith.select %175, %177, %178 : vector<1x8x128xi1>, vector<1x8x128xf32>
      %c1_i32_80 = arith.constant 1 : i32
      %180 = vector.broadcast %c1_i32_80 : i32 to vector<1x8x128xi32>
      %181 = arith.cmpi eq, %173, %180 : vector<1x8x128xi32>
      %cst_81 = arith.constant 0.000000e+00 : f32
      %182 = vector.shape_cast %171 : vector<1x1xf32> to vector<1x1x1xf32>
      %183 = vector.broadcast %182 : vector<1x1x1xf32> to vector<1x8x128xf32>
      %184 = vector.broadcast %cst_81 : f32 to vector<1x8x128xf32>
      %185 = arith.select %181, %183, %184 : vector<1x8x128xi1>, vector<1x8x128xf32>
      %186 = arith.addf %179, %185 : vector<1x8x128xf32>
      %c2_i32_82 = arith.constant 2 : i32
      %187 = vector.broadcast %c2_i32_82 : i32 to vector<1x8x128xi32>
      %188 = arith.cmpi eq, %173, %187 : vector<1x8x128xi32>
      %cst_83 = arith.constant 0.000000e+00 : f32
      %189 = vector.shape_cast %164 : vector<1x1xf32> to vector<1x1x1xf32>
      %190 = vector.broadcast %189 : vector<1x1x1xf32> to vector<1x8x128xf32>
      %191 = vector.broadcast %cst_83 : f32 to vector<1x8x128xf32>
      %192 = arith.select %188, %190, %191 : vector<1x8x128xi1>, vector<1x8x128xf32>
      %193 = arith.addf %186, %192 : vector<1x8x128xf32>
      %c3_i32 = arith.constant 3 : i32
      %194 = vector.broadcast %c3_i32 : i32 to vector<1x8x128xi32>
      %195 = arith.cmpi eq, %173, %194 : vector<1x8x128xi32>
      %cst_84 = arith.constant 0.000000e+00 : f32
      %196 = vector.shape_cast %167 : vector<1x1xf32> to vector<1x1x1xf32>
      %197 = vector.broadcast %196 : vector<1x1x1xf32> to vector<1x8x128xf32>
      %198 = vector.broadcast %cst_84 : f32 to vector<1x8x128xf32>
      %199 = arith.select %195, %197, %198 : vector<1x8x128xi1>, vector<1x8x128xf32>
      %200 = arith.addf %193, %199 : vector<1x8x128xf32>
      %c4_i32 = arith.constant 4 : i32
      %201 = vector.broadcast %c4_i32 : i32 to vector<1x8x128xi32>
      %202 = arith.cmpi eq, %173, %201 : vector<1x8x128xi32>
      %cst_85 = arith.constant 0.000000e+00 : f32
      %203 = vector.shape_cast %170 : vector<1x1xf32> to vector<1x1x1xf32>
      %204 = vector.broadcast %203 : vector<1x1x1xf32> to vector<1x8x128xf32>
      %205 = vector.broadcast %cst_85 : f32 to vector<1x8x128xf32>
      %206 = arith.select %202, %204, %205 : vector<1x8x128xi1>, vector<1x8x128xf32>
      %207 = arith.addf %200, %206 : vector<1x8x128xf32>
      %c0_86 = arith.constant 0 : index
      %c0_87 = arith.constant 0 : index
      %c0_88 = arith.constant 0 : index
      %208 = vector.load %arg17[%c0_86, %c0_87, %c0_88] : memref<1x8x128xf32, #tpu.memory_space<vmem>>, vector<1x8x128xf32>
      tpu.vector_store %arg17[%c0_86, %c0_87, %c0_88], %207 {strides = array<i32>} : memref<1x8x128xf32, #tpu.memory_space<vmem>>, vector<1x8x128xf32>,
    } else {
    }
    return
  }
  func.func @transform_0(%arg0: i32, %arg1: i32) -> (i32, i32) {
    %c2_i32 = arith.constant 2 : i32
    %0 = arith.muli %arg0, %c2_i32 : i32
    %1 = arith.addi %0, %arg1 : i32
    %c0_i32 = arith.constant 0 : i32
    %c0_i32_0 = arith.constant 0 : i32
    return %1, %c0_i32 : i32, i32
  }
  func.func @transform_1(%arg0: i32, %arg1: i32) -> (i32, i32) {
    %c0_i32 = arith.constant 0 : i32
    %c0_i32_0 = arith.constant 0 : i32
    %c0_i32_1 = arith.constant 0 : i32
    return %c0_i32, %c0_i32_0 : i32, i32
  }
  func.func @transform_2(%arg0: i32, %arg1: i32) -> (i32, i32) {
    %c0_i32 = arith.constant 0 : i32
    %c0_i32_0 = arith.constant 0 : i32
    %c0_i32_1 = arith.constant 0 : i32
    return %c0_i32, %c0_i32_0 : i32, i32
  }
  func.func @transform_3(%arg0: i32, %arg1: i32) -> (i32, i32) {
    %c0_i32 = arith.constant 0 : i32
    %c0_i32_0 = arith.constant 0 : i32
    %c0_i32_1 = arith.constant 0 : i32
    return %c0_i32, %c0_i32_0 : i32, i32
  }
  func.func @transform_4(%arg0: i32, %arg1: i32) -> (i32, i32) {
    %c0_i32 = arith.constant 0 : i32
    %c0_i32_0 = arith.constant 0 : i32
    %c0_i32_1 = arith.constant 0 : i32
    return %c0_i32, %c0_i32_0 : i32, i32
  }
  func.func @transform_5(%arg0: i32, %arg1: i32) -> (i32, i32) {
    %c0_i32 = arith.constant 0 : i32
    %c0_i32_0 = arith.constant 0 : i32
    %c0_i32_1 = arith.constant 0 : i32
    return %c0_i32, %c0_i32_0 : i32, i32
  }
  func.func @transform_6(%arg0: i32, %arg1: i32) -> (i32, i32) {
    %c0_i32 = arith.constant 0 : i32
    %c0_i32_0 = arith.constant 0 : i32
    %c0_i32_1 = arith.constant 0 : i32
    return %c0_i32, %c0_i32_0 : i32, i32
  }
  func.func @transform_7(%arg0: i32, %arg1: i32) -> (i32, i32) {
    %c0_i32 = arith.constant 0 : i32
    %c0_i32_0 = arith.constant 0 : i32
    %c0_i32_1 = arith.constant 0 : i32
    return %c0_i32, %c0_i32_0 : i32, i32
  }
  func.func @transform_8(%arg0: i32, %arg1: i32) -> (i32, i32) {
    %c0_i32 = arith.constant 0 : i32
    %c0_i32_0 = arith.constant 0 : i32
    %c0_i32_1 = arith.constant 0 : i32
    return %c0_i32, %c0_i32_0 : i32, i32
  }
  func.func @transform_9(%arg0: i32, %arg1: i32) -> (i32, i32) {
    %c0_i32 = arith.constant 0 : i32
    %c0_i32_0 = arith.constant 0 : i32
    %c0_i32_1 = arith.constant 0 : i32
    return %c0_i32, %c0_i32_0 : i32, i32
  }
  func.func @transform_10(%arg0: i32, %arg1: i32) -> (i32, i32) {
    %c0_i32 = arith.constant 0 : i32
    %c0_i32_0 = arith.constant 0 : i32
    %c0_i32_1 = arith.constant 0 : i32
    return %c0_i32, %c0_i32_0 : i32, i32
  }
  func.func @transform_11(%arg0: i32, %arg1: i32) -> (i32, i32) {
    %c0_i32 = arith.constant 0 : i32
    %c0_i32_0 = arith.constant 0 : i32
    %c0_i32_1 = arith.constant 0 : i32
    return %c0_i32, %c0_i32_0 : i32, i32
  }
  func.func @transform_12(%arg0: i32, %arg1: i32) -> (i32, i32) {
    %c0_i32 = arith.constant 0 : i32
    %c0_i32_0 = arith.constant 0 : i32
    %c0_i32_1 = arith.constant 0 : i32
    return %c0_i32, %c0_i32_0 : i32, i32
  }
  func.func @transform_13(%arg0: i32, %arg1: i32) -> (i32, i32) {
    %c0_i32 = arith.constant 0 : i32
    %c0_i32_0 = arith.constant 0 : i32
    %c0_i32_1 = arith.constant 0 : i32
    return %c0_i32, %c0_i32_0 : i32, i32
  }
  func.func @transform_14(%arg0: i32, %arg1: i32) -> (i32, i32) {
    %c0_i32 = arith.constant 0 : i32
    %c0_i32_0 = arith.constant 0 : i32
    %c0_i32_1 = arith.constant 0 : i32
    return %c0_i32, %c0_i32_0 : i32, i32
  }
  func.func @transform_15(%arg0: i32, %arg1: i32) -> (i32, i32, i32) {
    %c0_i32 = arith.constant 0 : i32
    %c0_i32_0 = arith.constant 0 : i32
    %c0_i32_1 = arith.constant 0 : i32
    return %arg0, %c0_i32, %c0_i32_0 : i32, i32, i32
  }
}

module attributes {stable_mosaic.version = 11 : i64} {
  func.func @kernel(%arg0: i32, %arg1: i32, %arg2: memref<8x256xbf16, #tpu.memory_space<vmem>>, %arg3: memref<384x32xbf16, #tpu.memory_space<vmem>>, %arg4: memref<256x128xbf16, #tpu.memory_space<vmem>>, %arg5: memref<1x128xf32, #tpu.memory_space<vmem>>, %arg6: memref<128x128xbf16, #tpu.memory_space<vmem>>, %arg7: memref<1x128xf32, #tpu.memory_space<vmem>>, %arg8: memref<128x64xbf16, #tpu.memory_space<vmem>>, %arg9: memref<1x64xf32, #tpu.memory_space<vmem>>, %arg10: memref<1x32xf32, #tpu.memory_space<vmem>>, %arg11: memref<1x32xf32, #tpu.memory_space<vmem>>, %arg12: memref<1x32xf32, #tpu.memory_space<vmem>>, %arg13: memref<32x64xbf16, #tpu.memory_space<vmem>>, %arg14: memref<64x256xbf16, #tpu.memory_space<vmem>>, %arg15: memref<32x384xbf16, #tpu.memory_space<vmem>>, %arg16: memref<1x384xf32, #tpu.memory_space<vmem>>, %arg17: memref<1x8x128xf32, #tpu.memory_space<vmem>>, %arg18: memref<32x256xbf16, #tpu.memory_space<vmem>>, %arg19: memref<1x1xf32, #tpu.memory_space<vmem>>, %arg20: memref<1x1xf32, #tpu.memory_space<vmem>>, %arg21: memref<1x1xf32, #tpu.memory_space<vmem>>) attributes {dimension_semantics = [#tpu.dimension_semantics<parallel>, #tpu.dimension_semantics<arbitrary>], iteration_bounds = array<i64: 2, 2>, scalar_prefetch = 0 : i64, scratch_operands = 4 : i64, tpu.core_type = #tpu.core_type<tc>, window_params = [{transform_indices = @transform_0, window_bounds = array<i64: 8, 256>}, {pipeline_mode = #tpu.pipeline_mode<synchronous>, transform_indices = @transform_1, window_bounds = array<i64: 384, 32>}, {pipeline_mode = #tpu.pipeline_mode<synchronous>, transform_indices = @transform_2, window_bounds = array<i64: 256, 128>}, {pipeline_mode = #tpu.pipeline_mode<synchronous>, transform_indices = @transform_3, window_bounds = array<i64: 1, 128>}, {pipeline_mode = #tpu.pipeline_mode<synchronous>, transform_indices = @transform_4, window_bounds = array<i64: 128, 128>}, {pipeline_mode = #tpu.pipeline_mode<synchronous>, transform_indices = @transform_5, window_bounds = array<i64: 1, 128>}, {pipeline_mode = #tpu.pipeline_mode<synchronous>, transform_indices = @transform_6, window_bounds = array<i64: 128, 64>}, {pipeline_mode = #tpu.pipeline_mode<synchronous>, transform_indices = @transform_7, window_bounds = array<i64: 1, 64>}, {pipeline_mode = #tpu.pipeline_mode<synchronous>, transform_indices = @transform_8, window_bounds = array<i64: 1, 32>}, {pipeline_mode = #tpu.pipeline_mode<synchronous>, transform_indices = @transform_9, window_bounds = array<i64: 1, 32>}, {pipeline_mode = #tpu.pipeline_mode<synchronous>, transform_indices = @transform_10, window_bounds = array<i64: 1, 32>}, {pipeline_mode = #tpu.pipeline_mode<synchronous>, transform_indices = @transform_11, window_bounds = array<i64: 32, 64>}, {pipeline_mode = #tpu.pipeline_mode<synchronous>, transform_indices = @transform_12, window_bounds = array<i64: 64, 256>}, {pipeline_mode = #tpu.pipeline_mode<synchronous>, transform_indices = @transform_13, window_bounds = array<i64: 32, 384>}, {pipeline_mode = #tpu.pipeline_mode<synchronous>, transform_indices = @transform_14, window_bounds = array<i64: 1, 384>}, {transform_indices = @transform_15, window_bounds = array<i64: 1, 8, 128>}]} {
    %c0_i32 = arith.constant 0 : i32
    %0 = arith.cmpi eq, %arg1, %c0_i32 : i32
    %1 = arith.extui %0 : i1 to i32
    %c0_i32_0 = arith.constant 0 : i32
    %2 = arith.cmpi ne, %1, %c0_i32_0 : i32
    scf.if %2 {
      %cst_69 = arith.constant 0.000000e+00 : f32
      %162 = vector.broadcast %cst_69 : f32 to vector<1x1xf32>
      %c0_70 = arith.constant 0 : index
      %c0_71 = arith.constant 0 : index
      %163 = vector.load %arg19[%c0_70, %c0_71] : memref<1x1xf32, #tpu.memory_space<vmem>>, vector<1x1xf32>
      tpu.vector_store %arg19[%c0_70, %c0_71], %162 {strides = array<i32>} : memref<1x1xf32, #tpu.memory_space<vmem>>, vector<1x1xf32>,
      %cst_72 = arith.constant 0.000000e+00 : f32
      %164 = vector.broadcast %cst_72 : f32 to vector<1x1xf32>
      %c0_73 = arith.constant 0 : index
      %c0_74 = arith.constant 0 : index
      %165 = vector.load %arg20[%c0_73, %c0_74] : memref<1x1xf32, #tpu.memory_space<vmem>>, vector<1x1xf32>
      tpu.vector_store %arg20[%c0_73, %c0_74], %164 {strides = array<i32>} : memref<1x1xf32, #tpu.memory_space<vmem>>, vector<1x1xf32>,
      %cst_75 = arith.constant 0.000000e+00 : f32
      %166 = vector.broadcast %cst_75 : f32 to vector<1x1xf32>
      %c0_76 = arith.constant 0 : index
      %c0_77 = arith.constant 0 : index
      %167 = vector.load %arg21[%c0_76, %c0_77] : memref<1x1xf32, #tpu.memory_space<vmem>>, vector<1x1xf32>
      tpu.vector_store %arg21[%c0_76, %c0_77], %166 {strides = array<i32>} : memref<1x1xf32, #tpu.memory_space<vmem>>, vector<1x1xf32>,
      %c0_78 = arith.constant 0 : index
      %c0_79 = arith.constant 0 : index
      %168 = vector.load %arg13[%c0_78, %c0_79] : memref<32x64xbf16, #tpu.memory_space<vmem>>, vector<32x64xbf16>
      %169 = arith.extf %168 : vector<32x64xbf16> to vector<32x64xf32>
      %170 = arith.mulf %169, %169 : vector<32x64xf32>
      %cst_80 = arith.constant dense<0.000000e+00> : vector<32xf32>
      %171 = vector.multi_reduction <add>, %170, %cst_80 [1] : vector<32x64xf32> to vector<32xf32>
      %172 = vector.shape_cast %171 : vector<32xf32> to vector<32x1xf32>
      %c0_81 = arith.constant 0 : index
      %c0_82 = arith.constant 0 : index
      %173 = vector.load %arg14[%c0_81, %c0_82] : memref<64x256xbf16, #tpu.memory_space<vmem>>, vector<64x256xbf16>
      %cst_83 = arith.constant dense<0.000000e+00> : vector<32x256xf32>
      %174 = tpu.matmul %168, %173, %cst_83 {dimension_numbers = #tpu.dot_dimension_numbers<[1], [0], [0], [1], [0, 0, 1, 1], [], []>} : vector<32x64xbf16>, vector<64x256xbf16>, vector<32x256xf32> -> vector<32x256xf32>
      %cst_84 = arith.constant 2.000000e+00 : f32
      %175 = vector.broadcast %cst_84 : f32 to vector<32x256xf32>
      %176 = arith.mulf %175, %174 : vector<32x256xf32>
      %177 = vector.broadcast %172 : vector<32x1xf32> to vector<32x256xf32>
      %178 = arith.subf %176, %177 : vector<32x256xf32>
      %cst_85 = arith.constant 5.000000e+00 : f32
      %179 = vector.broadcast %cst_85 : f32 to vector<32x256xf32>
      %180 = arith.mulf %178, %179 : vector<32x256xf32>
      %cst_86 = arith.constant dense<0xFF800000> : vector<256xf32>
      %181 = vector.multi_reduction <maximumf>, %180, %cst_86 [0] : vector<32x256xf32> to vector<256xf32>
      %182 = vector.shape_cast %181 : vector<256xf32> to vector<1x256xf32>
      %183 = vector.broadcast %182 : vector<1x256xf32> to vector<32x256xf32>
      %184 = arith.subf %180, %183 : vector<32x256xf32>
      %185 = math.exp %184 : vector<32x256xf32>
      %cst_87 = arith.constant dense<0.000000e+00> : vector<256xf32>
      %186 = vector.multi_reduction <add>, %185, %cst_87 [0] : vector<32x256xf32> to vector<256xf32>
      %187 = vector.shape_cast %186 : vector<256xf32> to vector<1x256xf32>
      %188 = vector.broadcast %187 : vector<1x256xf32> to vector<32x256xf32>
      %189 = arith.divf %185, %188 : vector<32x256xf32>
      %190 = arith.truncf %189 : vector<32x256xf32> to vector<32x256xbf16>
      %c0_88 = arith.constant 0 : index
      %c0_89 = arith.constant 0 : index
      %191 = vector.load %arg18[%c0_88, %c0_89] : memref<32x256xbf16, #tpu.memory_space<vmem>>, vector<32x256xbf16>
      tpu.vector_store %arg18[%c0_88, %c0_89], %190 {strides = array<i32>} : memref<32x256xbf16, #tpu.memory_space<vmem>>, vector<32x256xbf16>,
    } else {
    }
    %c0 = arith.constant 0 : index
    %c0_1 = arith.constant 0 : index
    %3 = vector.load %arg2[%c0, %c0_1] : memref<8x256xbf16, #tpu.memory_space<vmem>>, vector<8x256xbf16>
    %c0_2 = arith.constant 0 : index
    %c0_3 = arith.constant 0 : index
    %4 = vector.load %arg4[%c0_2, %c0_3] : memref<256x128xbf16, #tpu.memory_space<vmem>>, vector<256x128xbf16>
    %cst = arith.constant dense<0.000000e+00> : vector<8x128xf32>
    %5 = tpu.matmul %3, %4, %cst {dimension_numbers = #tpu.dot_dimension_numbers<[1], [0], [0], [1], [0, 0, 1, 1], [], []>} : vector<8x256xbf16>, vector<256x128xbf16>, vector<8x128xf32> -> vector<8x128xf32>
    %c0_4 = arith.constant 0 : index
    %c0_5 = arith.constant 0 : index
    %6 = vector.load %arg5[%c0_4, %c0_5] : memref<1x128xf32, #tpu.memory_space<vmem>>, vector<1x128xf32>
    %7 = vector.broadcast %6 : vector<1x128xf32> to vector<8x128xf32>
    %8 = arith.addf %5, %7 : vector<8x128xf32>
    %cst_6 = arith.constant 0.000000e+00 : f32
    %9 = vector.broadcast %cst_6 : f32 to vector<8x128xf32>
    %10 = arith.maximumf %8, %9 : vector<8x128xf32>
    %11 = vector.broadcast %cst_6 : f32 to vector<8x128xf32>
    %12 = arith.subf %8, %11 : vector<8x128xf32>
    %13 = arith.cmpf one, %12, %12 : vector<8x128xf32>
    %14 = vector.broadcast %cst_6 : f32 to vector<8x128xf32>
    %15 = arith.addf %8, %14 : vector<8x128xf32>
    %16 = math.absf %12 : vector<8x128xf32>
    %cst_7 = arith.constant 0.000000e+00 : f32
    %17 = vector.broadcast %cst_7 : f32 to vector<8x128xf32>
    %18 = arith.subf %17, %16 : vector<8x128xf32>
    %19 = math.exp %18 : vector<8x128xf32>
    %20 = math.log1p %19 : vector<8x128xf32>
    %21 = arith.addf %10, %20 : vector<8x128xf32>
    %22 = arith.select %13, %15, %21 : vector<8x128xi1>, vector<8x128xf32>
    %23 = arith.truncf %22 : vector<8x128xf32> to vector<8x128xbf16>
    %c0_8 = arith.constant 0 : index
    %c0_9 = arith.constant 0 : index
    %24 = vector.load %arg6[%c0_8, %c0_9] : memref<128x128xbf16, #tpu.memory_space<vmem>>, vector<128x128xbf16>
    %cst_10 = arith.constant dense<0.000000e+00> : vector<8x128xf32>
    %25 = tpu.matmul %23, %24, %cst_10 {dimension_numbers = #tpu.dot_dimension_numbers<[1], [0], [0], [1], [0, 0, 1, 1], [], []>} : vector<8x128xbf16>, vector<128x128xbf16>, vector<8x128xf32> -> vector<8x128xf32>
    %c0_11 = arith.constant 0 : index
    %c0_12 = arith.constant 0 : index
    %26 = vector.load %arg7[%c0_11, %c0_12] : memref<1x128xf32, #tpu.memory_space<vmem>>, vector<1x128xf32>
    %27 = vector.broadcast %26 : vector<1x128xf32> to vector<8x128xf32>
    %28 = arith.addf %25, %27 : vector<8x128xf32>
    %cst_13 = arith.constant 0.000000e+00 : f32
    %29 = vector.broadcast %cst_13 : f32 to vector<8x128xf32>
    %30 = arith.maximumf %28, %29 : vector<8x128xf32>
    %31 = vector.broadcast %cst_13 : f32 to vector<8x128xf32>
    %32 = arith.subf %28, %31 : vector<8x128xf32>
    %33 = arith.cmpf one, %32, %32 : vector<8x128xf32>
    %34 = vector.broadcast %cst_13 : f32 to vector<8x128xf32>
    %35 = arith.addf %28, %34 : vector<8x128xf32>
    %36 = math.absf %32 : vector<8x128xf32>
    %cst_14 = arith.constant 0.000000e+00 : f32
    %37 = vector.broadcast %cst_14 : f32 to vector<8x128xf32>
    %38 = arith.subf %37, %36 : vector<8x128xf32>
    %39 = math.exp %38 : vector<8x128xf32>
    %40 = math.log1p %39 : vector<8x128xf32>
    %41 = arith.addf %30, %40 : vector<8x128xf32>
    %42 = arith.select %33, %35, %41 : vector<8x128xi1>, vector<8x128xf32>
    %43 = arith.truncf %42 : vector<8x128xf32> to vector<8x128xbf16>
    %c0_15 = arith.constant 0 : index
    %c0_16 = arith.constant 0 : index
    %44 = vector.load %arg8[%c0_15, %c0_16] : memref<128x64xbf16, #tpu.memory_space<vmem>>, vector<128x64xbf16>
    %cst_17 = arith.constant dense<0.000000e+00> : vector<8x64xf32>
    %45 = tpu.matmul %43, %44, %cst_17 {dimension_numbers = #tpu.dot_dimension_numbers<[1], [0], [0], [1], [0, 0, 1, 1], [], []>} : vector<8x128xbf16>, vector<128x64xbf16>, vector<8x64xf32> -> vector<8x64xf32>
    %c0_18 = arith.constant 0 : index
    %c0_19 = arith.constant 0 : index
    %46 = vector.load %arg9[%c0_18, %c0_19] : memref<1x64xf32, #tpu.memory_space<vmem>>, vector<1x64xf32>
    %47 = vector.broadcast %46 : vector<1x64xf32> to vector<8x64xf32>
    %48 = arith.addf %45, %47 : vector<8x64xf32>
    %cst_20 = arith.constant 0.999994993 : f32
    %49 = vector.broadcast %cst_20 : f32 to vector<8x64xf32>
    %50 = arith.mulf %48, %49 : vector<8x64xf32>
    %51 = vector.extract_strided_slice %50 {offsets = [0, 0], sizes = [8, 32], strides = [1, 1]} : vector<8x64xf32> to vector<8x32xf32>
    %52 = vector.extract_strided_slice %50 {offsets = [0, 32], sizes = [8, 32], strides = [1, 1]} : vector<8x64xf32> to vector<8x32xf32>
    %cst_21 = arith.constant dense<0xFF800000> : vector<8xf32>
    %53 = vector.multi_reduction <maximumf>, %51, %cst_21 [1] : vector<8x32xf32> to vector<8xf32>
    %54 = vector.shape_cast %53 : vector<8xf32> to vector<8x1xf32>
    %55 = vector.broadcast %54 : vector<8x1xf32> to vector<8x32xf32>
    %56 = arith.subf %51, %55 : vector<8x32xf32>
    %57 = math.exp %56 : vector<8x32xf32>
    %cst_22 = arith.constant dense<0.000000e+00> : vector<8xf32>
    %58 = vector.multi_reduction <add>, %57, %cst_22 [1] : vector<8x32xf32> to vector<8xf32>
    %59 = vector.shape_cast %58 : vector<8xf32> to vector<8x1xf32>
    %60 = tpu.reciprocal %59 {approx = true} : vector<8x1xf32> -> vector<8x1xf32>
    %61 = vector.broadcast %60 : vector<8x1xf32> to vector<8x32xf32>
    %62 = arith.mulf %57, %61 : vector<8x32xf32>
    %63 = arith.truncf %62 : vector<8x32xf32> to vector<8x32xbf16>
    %64 = math.exp %52 : vector<8x32xf32>
    %c0_23 = arith.constant 0 : index
    %c0_24 = arith.constant 0 : index
    %65 = vector.load %arg10[%c0_23, %c0_24] : memref<1x32xf32, #tpu.memory_space<vmem>>, vector<1x32xf32>
    %66 = vector.broadcast %65 : vector<1x32xf32> to vector<8x32xf32>
    %67 = arith.subf %51, %66 : vector<8x32xf32>
    %68 = arith.mulf %67, %67 : vector<8x32xf32>
    %69 = arith.addf %64, %68 : vector<8x32xf32>
    %c0_25 = arith.constant 0 : index
    %c0_26 = arith.constant 0 : index
    %70 = vector.load %arg11[%c0_25, %c0_26] : memref<1x32xf32, #tpu.memory_space<vmem>>, vector<1x32xf32>
    %71 = vector.broadcast %70 : vector<1x32xf32> to vector<8x32xf32>
    %72 = arith.mulf %69, %71 : vector<8x32xf32>
    %c0_27 = arith.constant 0 : index
    %c0_28 = arith.constant 0 : index
    %73 = vector.load %arg12[%c0_27, %c0_28] : memref<1x32xf32, #tpu.memory_space<vmem>>, vector<1x32xf32>
    %74 = vector.broadcast %73 : vector<1x32xf32> to vector<8x32xf32>
    %75 = arith.addf %72, %74 : vector<8x32xf32>
    %76 = arith.subf %75, %52 : vector<8x32xf32>
    %cst_29 = arith.constant dense<0.000000e+00> : vector<8xf32>
    %77 = vector.multi_reduction <add>, %76, %cst_29 [1] : vector<8x32xf32> to vector<8xf32>
    %78 = vector.shape_cast %77 : vector<8xf32> to vector<8x1xf32>
    %cst_30 = arith.constant 3.200000e+01 : f32
    %79 = vector.broadcast %cst_30 : f32 to vector<8x1xf32>
    %80 = arith.subf %78, %79 : vector<8x1xf32>
    %cst_31 = arith.constant 5.000000e-01 : f32
    %81 = vector.broadcast %cst_31 : f32 to vector<8x1xf32>
    %82 = arith.mulf %81, %80 : vector<8x1xf32>
    %c0_32 = arith.constant 0 : index
    %c0_33 = arith.constant 0 : index
    %83 = vector.load %arg19[%c0_32, %c0_33] : memref<1x1xf32, #tpu.memory_space<vmem>>, vector<1x1xf32>
    %cst_34 = arith.constant dense<0.000000e+00> : vector<1xf32>
    %84 = vector.multi_reduction <add>, %82, %cst_34 [0] : vector<8x1xf32> to vector<1xf32>
    %85 = vector.shape_cast %84 : vector<1xf32> to vector<1x1xf32>
    %86 = arith.addf %83, %85 : vector<1x1xf32>
    %c0_35 = arith.constant 0 : index
    %c0_36 = arith.constant 0 : index
    %87 = vector.load %arg19[%c0_35, %c0_36] : memref<1x1xf32, #tpu.memory_space<vmem>>, vector<1x1xf32>
    tpu.vector_store %arg19[%c0_35, %c0_36], %86 {strides = array<i32>} : memref<1x1xf32, #tpu.memory_space<vmem>>, vector<1x1xf32>,
    %c0_37 = arith.constant 0 : index
    %c0_38 = arith.constant 0 : index
    %88 = vector.load %arg18[%c0_37, %c0_38] : memref<32x256xbf16, #tpu.memory_space<vmem>>, vector<32x256xbf16>
    %cst_39 = arith.constant dense<0.000000e+00> : vector<8x256xf32>
    %89 = tpu.matmul %63, %88, %cst_39 {dimension_numbers = #tpu.dot_dimension_numbers<[1], [0], [0], [1], [0, 0, 1, 1], [], []>} : vector<8x32xbf16>, vector<32x256xbf16>, vector<8x256xf32> -> vector<8x256xf32>
    %cst_40 = arith.constant 0.999994993 : f32
    %90 = vector.broadcast %cst_40 : f32 to vector<8x256xf32>
    %91 = arith.mulf %89, %90 : vector<8x256xf32>
    %cst_41 = arith.constant dense<0xFF800000> : vector<8xf32>
    %92 = vector.multi_reduction <maximumf>, %91, %cst_41 [1] : vector<8x256xf32> to vector<8xf32>
    %93 = vector.shape_cast %92 : vector<8xf32> to vector<8x1xf32>
    %94 = vector.broadcast %93 : vector<8x1xf32> to vector<8x256xf32>
    %95 = arith.subf %91, %94 : vector<8x256xf32>
    %96 = arith.truncf %95 : vector<8x256xf32> to vector<8x256xbf16>
    %97 = math.exp %96 : vector<8x256xbf16>
    %98 = arith.extf %97 : vector<8x256xbf16> to vector<8x256xf32>
    %cst_42 = arith.constant dense<0.000000e+00> : vector<8xf32>
    %99 = vector.multi_reduction <add>, %98, %cst_42 [1] : vector<8x256xf32> to vector<8xf32>
    %100 = vector.shape_cast %99 : vector<8xf32> to vector<8x1xf32>
    %101 = math.log %100 : vector<8x1xf32>
    %102 = arith.addf %93, %101 : vector<8x1xf32>
    %103 = arith.extf %3 : vector<8x256xbf16> to vector<8x256xf32>
    %cst_43 = arith.constant dense<0.000000e+00> : vector<8xf32>
    %104 = vector.multi_reduction <add>, %103, %cst_43 [1] : vector<8x256xf32> to vector<8xf32>
    %105 = vector.shape_cast %104 : vector<8xf32> to vector<8x1xf32>
    %106 = arith.mulf %103, %91 : vector<8x256xf32>
    %cst_44 = arith.constant dense<0.000000e+00> : vector<8xf32>
    %107 = vector.multi_reduction <add>, %106, %cst_44 [1] : vector<8x256xf32> to vector<8xf32>
    %108 = vector.shape_cast %107 : vector<8xf32> to vector<8x1xf32>
    %c0_45 = arith.constant 0 : index
    %c0_46 = arith.constant 0 : index
    %109 = vector.load %arg20[%c0_45, %c0_46] : memref<1x1xf32, #tpu.memory_space<vmem>>, vector<1x1xf32>
    %110 = arith.mulf %105, %102 : vector<8x1xf32>
    %111 = arith.subf %110, %108 : vector<8x1xf32>
    %cst_47 = arith.constant dense<0.000000e+00> : vector<1xf32>
    %112 = vector.multi_reduction <add>, %111, %cst_47 [0] : vector<8x1xf32> to vector<1xf32>
    %113 = vector.shape_cast %112 : vector<1xf32> to vector<1x1xf32>
    %114 = arith.addf %109, %113 : vector<1x1xf32>
    %c0_48 = arith.constant 0 : index
    %c0_49 = arith.constant 0 : index
    %115 = vector.load %arg20[%c0_48, %c0_49] : memref<1x1xf32, #tpu.memory_space<vmem>>, vector<1x1xf32>
    tpu.vector_store %arg20[%c0_48, %c0_49], %114 {strides = array<i32>} : memref<1x1xf32, #tpu.memory_space<vmem>>, vector<1x1xf32>,
    %c0_50 = arith.constant 0 : index
    %c0_51 = arith.constant 0 : index
    %116 = vector.load %arg15[%c0_50, %c0_51] : memref<32x384xbf16, #tpu.memory_space<vmem>>, vector<32x384xbf16>
    %cst_52 = arith.constant dense<0.000000e+00> : vector<8x384xf32>
    %117 = tpu.matmul %63, %116, %cst_52 {dimension_numbers = #tpu.dot_dimension_numbers<[1], [0], [0], [1], [0, 0, 1, 1], [], []>} : vector<8x32xbf16>, vector<32x384xbf16>, vector<8x384xf32> -> vector<8x384xf32>
    %c0_53 = arith.constant 0 : index
    %c0_54 = arith.constant 0 : index
    %118 = vector.load %arg16[%c0_53, %c0_54] : memref<1x384xf32, #tpu.memory_space<vmem>>, vector<1x384xf32>
    %119 = vector.broadcast %118 : vector<1x384xf32> to vector<8x384xf32>
    %120 = arith.addf %117, %119 : vector<8x384xf32>
    %121 = arith.mulf %120, %120 : vector<8x384xf32>
    %cst_55 = arith.constant dense<0.000000e+00> : vector<8xf32>
    %122 = vector.multi_reduction <add>, %121, %cst_55 [1] : vector<8x384xf32> to vector<8xf32>
    %123 = vector.shape_cast %122 : vector<8xf32> to vector<8x1xf32>
    %124 = math.rsqrt %123 : vector<8x1xf32>
    %125 = vector.broadcast %124 : vector<8x1xf32> to vector<8x384xf32>
    %126 = arith.mulf %120, %125 : vector<8x384xf32>
    %127 = arith.truncf %126 : vector<8x384xf32> to vector<8x384xbf16>
    %c0_56 = arith.constant 0 : index
    %c0_57 = arith.constant 0 : index
    %128 = vector.load %arg3[%c0_56, %c0_57] : memref<384x32xbf16, #tpu.memory_space<vmem>>, vector<384x32xbf16>
    %cst_58 = arith.constant dense<0.000000e+00> : vector<8x32xf32>
    %129 = tpu.matmul %127, %128, %cst_58 {dimension_numbers = #tpu.dot_dimension_numbers<[1], [0], [0], [1], [0, 0, 1, 1], [], []>} : vector<8x384xbf16>, vector<384x32xbf16>, vector<8x32xf32> -> vector<8x32xf32>
    %130 = tpu.iota {dimensions = array<i32: 0>} : vector<8x32xi32>
    %131 = tpu.iota {dimensions = array<i32: 1>} : vector<8x32xi32>
    %c2_i32 = arith.constant 2 : i32
    %132 = arith.muli %arg0, %c2_i32 : i32
    %133 = arith.addi %132, %arg1 : i32
    %c8_i32 = arith.constant 8 : i32
    %134 = arith.muli %133, %c8_i32 : i32
    %135 = vector.broadcast %134 : i32 to vector<8x32xi32>
    %136 = arith.addi %135, %130 : vector<8x32xi32>
    %137 = arith.cmpi eq, %131, %136 : vector<8x32xi32>
    %cst_59 = arith.constant 0.000000e+00 : f32
    %138 = vector.broadcast %cst_59 : f32 to vector<8x32xf32>
    %139 = arith.select %137, %129, %138 : vector<8x32xi1>, vector<8x32xf32>
    %cst_60 = arith.constant dense<0.000000e+00> : vector<8xf32>
    %140 = vector.multi_reduction <add>, %139, %cst_60 [1] : vector<8x32xf32> to vector<8xf32>
    %141 = vector.shape_cast %140 : vector<8xf32> to vector<8x1xf32>
    %cst_61 = arith.constant dense<0xFF800000> : vector<8xf32>
    %142 = vector.multi_reduction <maximumf>, %129, %cst_61 [1] : vector<8x32xf32> to vector<8xf32>
    %143 = vector.shape_cast %142 : vector<8xf32> to vector<8x1xf32>
    %144 = vector.broadcast %143 : vector<8x1xf32> to vector<8x32xf32>
    %145 = arith.subf %129, %144 : vector<8x32xf32>
    %146 = arith.truncf %145 : vector<8x32xf32> to vector<8x32xbf16>
    %147 = math.exp %146 : vector<8x32xbf16>
    %148 = arith.extf %147 : vector<8x32xbf16> to vector<8x32xf32>
    %cst_62 = arith.constant dense<0.000000e+00> : vector<8xf32>
    %149 = vector.multi_reduction <add>, %148, %cst_62 [1] : vector<8x32xf32> to vector<8xf32>
    %150 = vector.shape_cast %149 : vector<8xf32> to vector<8x1xf32>
    %151 = math.log %150 : vector<8x1xf32>
    %152 = arith.addf %143, %151 : vector<8x1xf32>
    %c0_63 = arith.constant 0 : index
    %c0_64 = arith.constant 0 : index
    %153 = vector.load %arg21[%c0_63, %c0_64] : memref<1x1xf32, #tpu.memory_space<vmem>>, vector<1x1xf32>
    %154 = arith.subf %152, %141 : vector<8x1xf32>
    %cst_65 = arith.constant dense<0.000000e+00> : vector<1xf32>
    %155 = vector.multi_reduction <add>, %154, %cst_65 [0] : vector<8x1xf32> to vector<1xf32>
    %156 = vector.shape_cast %155 : vector<1xf32> to vector<1x1xf32>
    %157 = arith.addf %153, %156 : vector<1x1xf32>
    %c0_66 = arith.constant 0 : index
    %c0_67 = arith.constant 0 : index
    %158 = vector.load %arg21[%c0_66, %c0_67] : memref<1x1xf32, #tpu.memory_space<vmem>>, vector<1x1xf32>
    tpu.vector_store %arg21[%c0_66, %c0_67], %157 {strides = array<i32>} : memref<1x1xf32, #tpu.memory_space<vmem>>, vector<1x1xf32>,
    %c1_i32 = arith.constant 1 : i32
    %159 = arith.cmpi eq, %arg1, %c1_i32 : i32
    %160 = arith.extui %159 : i1 to i32
    %c0_i32_68 = arith.constant 0 : i32
    %161 = arith.cmpi ne, %160, %c0_i32_68 : i32
    scf.if %161 {
      %c0_69 = arith.constant 0 : index
      %c0_70 = arith.constant 0 : index
      %162 = vector.load %arg19[%c0_69, %c0_70] : memref<1x1xf32, #tpu.memory_space<vmem>>, vector<1x1xf32>
      %cst_71 = arith.constant 3.125000e-02 : f32
      %163 = vector.broadcast %cst_71 : f32 to vector<1x1xf32>
      %164 = arith.mulf %162, %163 : vector<1x1xf32>
      %c0_72 = arith.constant 0 : index
      %c0_73 = arith.constant 0 : index
      %165 = vector.load %arg20[%c0_72, %c0_73] : memref<1x1xf32, #tpu.memory_space<vmem>>, vector<1x1xf32>
      %cst_74 = arith.constant 3.125000e-02 : f32
      %166 = vector.broadcast %cst_74 : f32 to vector<1x1xf32>
      %167 = arith.mulf %165, %166 : vector<1x1xf32>
      %c0_75 = arith.constant 0 : index
      %c0_76 = arith.constant 0 : index
      %168 = vector.load %arg21[%c0_75, %c0_76] : memref<1x1xf32, #tpu.memory_space<vmem>>, vector<1x1xf32>
      %cst_77 = arith.constant 3.125000e-01 : f32
      %169 = vector.broadcast %cst_77 : f32 to vector<1x1xf32>
      %170 = arith.mulf %168, %169 : vector<1x1xf32>
      %171 = arith.addf %167, %164 : vector<1x1xf32>
      %172 = arith.addf %171, %170 : vector<1x1xf32>
      %173 = tpu.iota {dimensions = array<i32: 2>} : vector<1x8x128xi32>
      %c0_i32_78 = arith.constant 0 : i32
      %174 = vector.broadcast %c0_i32_78 : i32 to vector<1x8x128xi32>
      %175 = arith.cmpi eq, %173, %174 : vector<1x8x128xi32>
      %cst_79 = arith.constant 0.000000e+00 : f32
      %176 = vector.shape_cast %172 : vector<1x1xf32> to vector<1x1x1xf32>
      %177 = vector.broadcast %176 : vector<1x1x1xf32> to vector<1x8x128xf32>
      %178 = vector.broadcast %cst_79 : f32 to vector<1x8x128xf32>
      %179 = arith.select %175, %177, %178 : vector<1x8x128xi1>, vector<1x8x128xf32>
      %c1_i32_80 = arith.constant 1 : i32
      %180 = vector.broadcast %c1_i32_80 : i32 to vector<1x8x128xi32>
      %181 = arith.cmpi eq, %173, %180 : vector<1x8x128xi32>
      %cst_81 = arith.constant 0.000000e+00 : f32
      %182 = vector.shape_cast %171 : vector<1x1xf32> to vector<1x1x1xf32>
      %183 = vector.broadcast %182 : vector<1x1x1xf32> to vector<1x8x128xf32>
      %184 = vector.broadcast %cst_81 : f32 to vector<1x8x128xf32>
      %185 = arith.select %181, %183, %184 : vector<1x8x128xi1>, vector<1x8x128xf32>
      %186 = arith.addf %179, %185 : vector<1x8x128xf32>
      %c2_i32_82 = arith.constant 2 : i32
      %187 = vector.broadcast %c2_i32_82 : i32 to vector<1x8x128xi32>
      %188 = arith.cmpi eq, %173, %187 : vector<1x8x128xi32>
      %cst_83 = arith.constant 0.000000e+00 : f32
      %189 = vector.shape_cast %164 : vector<1x1xf32> to vector<1x1x1xf32>
      %190 = vector.broadcast %189 : vector<1x1x1xf32> to vector<1x8x128xf32>
      %191 = vector.broadcast %cst_83 : f32 to vector<1x8x128xf32>
      %192 = arith.select %188, %190, %191 : vector<1x8x128xi1>, vector<1x8x128xf32>
      %193 = arith.addf %186, %192 : vector<1x8x128xf32>
      %c3_i32 = arith.constant 3 : i32
      %194 = vector.broadcast %c3_i32 : i32 to vector<1x8x128xi32>
      %195 = arith.cmpi eq, %173, %194 : vector<1x8x128xi32>
      %cst_84 = arith.constant 0.000000e+00 : f32
      %196 = vector.shape_cast %167 : vector<1x1xf32> to vector<1x1x1xf32>
      %197 = vector.broadcast %196 : vector<1x1x1xf32> to vector<1x8x128xf32>
      %198 = vector.broadcast %cst_84 : f32 to vector<1x8x128xf32>
      %199 = arith.select %195, %197, %198 : vector<1x8x128xi1>, vector<1x8x128xf32>
      %200 = arith.addf %193, %199 : vector<1x8x128xf32>
      %c4_i32 = arith.constant 4 : i32
      %201 = vector.broadcast %c4_i32 : i32 to vector<1x8x128xi32>
      %202 = arith.cmpi eq, %173, %201 : vector<1x8x128xi32>
      %cst_85 = arith.constant 0.000000e+00 : f32
      %203 = vector.shape_cast %170 : vector<1x1xf32> to vector<1x1x1xf32>
      %204 = vector.broadcast %203 : vector<1x1x1xf32> to vector<1x8x128xf32>
      %205 = vector.broadcast %cst_85 : f32 to vector<1x8x128xf32>
      %206 = arith.select %202, %204, %205 : vector<1x8x128xi1>, vector<1x8x128xf32>
      %207 = arith.addf %200, %206 : vector<1x8x128xf32>
      %c0_86 = arith.constant 0 : index
      %c0_87 = arith.constant 0 : index
      %c0_88 = arith.constant 0 : index
      %208 = vector.load %arg17[%c0_86, %c0_87, %c0_88] : memref<1x8x128xf32, #tpu.memory_space<vmem>>, vector<1x8x128xf32>
      tpu.vector_store %arg17[%c0_86, %c0_87, %c0_88], %207 {strides = array<i32>} : memref<1x8x128xf32, #tpu.memory_space<vmem>>, vector<1x8x128xf32>,
    } else {
    }
    return
  }
  func.func @transform_0(%arg0: i32, %arg1: i32) -> (i32, i32) {
    %c2_i32 = arith.constant 2 : i32
    %0 = arith.muli %arg0, %c2_i32 : i32
    %1 = arith.addi %0, %arg1 : i32
    %c0_i32 = arith.constant 0 : i32
    %c0_i32_0 = arith.constant 0 : i32
    return %1, %c0_i32 : i32, i32
  }
  func.func @transform_1(%arg0: i32, %arg1: i32) -> (i32, i32) {
    %c0_i32 = arith.constant 0 : i32
    %c0_i32_0 = arith.constant 0 : i32
    %c0_i32_1 = arith.constant 0 : i32
    return %c0_i32, %c0_i32_0 : i32, i32
  }
  func.func @transform_2(%arg0: i32, %arg1: i32) -> (i32, i32) {
    %c0_i32 = arith.constant 0 : i32
    %c0_i32_0 = arith.constant 0 : i32
    %c0_i32_1 = arith.constant 0 : i32
    return %c0_i32, %c0_i32_0 : i32, i32
  }
  func.func @transform_3(%arg0: i32, %arg1: i32) -> (i32, i32) {
    %c0_i32 = arith.constant 0 : i32
    %c0_i32_0 = arith.constant 0 : i32
    %c0_i32_1 = arith.constant 0 : i32
    return %c0_i32, %c0_i32_0 : i32, i32
  }
  func.func @transform_4(%arg0: i32, %arg1: i32) -> (i32, i32) {
    %c0_i32 = arith.constant 0 : i32
    %c0_i32_0 = arith.constant 0 : i32
    %c0_i32_1 = arith.constant 0 : i32
    return %c0_i32, %c0_i32_0 : i32, i32
  }
  func.func @transform_5(%arg0: i32, %arg1: i32) -> (i32, i32) {
    %c0_i32 = arith.constant 0 : i32
    %c0_i32_0 = arith.constant 0 : i32
    %c0_i32_1 = arith.constant 0 : i32
    return %c0_i32, %c0_i32_0 : i32, i32
  }
  func.func @transform_6(%arg0: i32, %arg1: i32) -> (i32, i32) {
    %c0_i32 = arith.constant 0 : i32
    %c0_i32_0 = arith.constant 0 : i32
    %c0_i32_1 = arith.constant 0 : i32
    return %c0_i32, %c0_i32_0 : i32, i32
  }
  func.func @transform_7(%arg0: i32, %arg1: i32) -> (i32, i32) {
    %c0_i32 = arith.constant 0 : i32
    %c0_i32_0 = arith.constant 0 : i32
    %c0_i32_1 = arith.constant 0 : i32
    return %c0_i32, %c0_i32_0 : i32, i32
  }
  func.func @transform_8(%arg0: i32, %arg1: i32) -> (i32, i32) {
    %c0_i32 = arith.constant 0 : i32
    %c0_i32_0 = arith.constant 0 : i32
    %c0_i32_1 = arith.constant 0 : i32
    return %c0_i32, %c0_i32_0 : i32, i32
  }
  func.func @transform_9(%arg0: i32, %arg1: i32) -> (i32, i32) {
    %c0_i32 = arith.constant 0 : i32
    %c0_i32_0 = arith.constant 0 : i32
    %c0_i32_1 = arith.constant 0 : i32
    return %c0_i32, %c0_i32_0 : i32, i32
  }
  func.func @transform_10(%arg0: i32, %arg1: i32) -> (i32, i32) {
    %c0_i32 = arith.constant 0 : i32
    %c0_i32_0 = arith.constant 0 : i32
    %c0_i32_1 = arith.constant 0 : i32
    return %c0_i32, %c0_i32_0 : i32, i32
  }
  func.func @transform_11(%arg0: i32, %arg1: i32) -> (i32, i32) {
    %c0_i32 = arith.constant 0 : i32
    %c0_i32_0 = arith.constant 0 : i32
    %c0_i32_1 = arith.constant 0 : i32
    return %c0_i32, %c0_i32_0 : i32, i32
  }
  func.func @transform_12(%arg0: i32, %arg1: i32) -> (i32, i32) {
    %c0_i32 = arith.constant 0 : i32
    %c0_i32_0 = arith.constant 0 : i32
    %c0_i32_1 = arith.constant 0 : i32
    return %c0_i32, %c0_i32_0 : i32, i32
  }
  func.func @transform_13(%arg0: i32, %arg1: i32) -> (i32, i32) {
    %c0_i32 = arith.constant 0 : i32
    %c0_i32_0 = arith.constant 0 : i32
    %c0_i32_1 = arith.constant 0 : i32
    return %c0_i32, %c0_i32_0 : i32, i32
  }
  func.func @transform_14(%arg0: i32, %arg1: i32) -> (i32, i32) {
    %c0_i32 = arith.constant 0 : i32
    %c0_i32_0 = arith.constant 0 : i32
    %c0_i32_1 = arith.constant 0 : i32
    return %c0_i32, %c0_i32_0 : i32, i32
  }
  func.func @transform_15(%arg0: i32, %arg1: i32) -> (i32, i32, i32) {
    %c0_i32 = arith.constant 0 : i32
    %c0_i32_0 = arith.constant 0 : i32
    %c0_i32_1 = arith.constant 0 : i32
    return %arg0, %c0_i32, %c0_i32_0 : i32, i32, i32
  }
}

</mosaic_0001>

<bundles_post_ra>
// kernel: tpu_custom_call.1
= control target key start
LH: loop header
LB: loop body
LE: loop exit
PB: predicated region body
PF: predicated region fallthrough
CT: control target
= control target key end

     0   :  { %s3149_s0 = inlined_call_operand.vmem [shape: bf16[32,256], index: 0, kind: input, shape index: {}]   ;;  %s3150_s1 = inlined_call_operand.vmem [shape: bf16[384,32], index: 1, kind: input, shape index: {}]   ;;  %s3151_s2 = inlined_call_operand.vmem [shape: bf16[256,128], index: 2, kind: input, shape index: {}]   ;;  %s3152_s3 = inlined_call_operand.vmem [shape: f32[1,128], index: 3, kind: input, shape index: {}]   ;;  %s3153_s4 = inlined_call_operand.vmem [shape: bf16[128,128], index: 4, kind: input, shape index: {}]   ;;  %s3154_s5 = inlined_call_operand.vmem [shape: f32[1,128], index: 5, kind: input, shape index: {}]   ;;  %s3155_s6 = inlined_call_operand.vmem [shape: bf16[128,64], index: 6, kind: input, shape index: {}]   ;;  %s3156_s7 = inlined_call_operand.vmem [shape: f32[1,64], index: 7, kind: input, shape index: {}]   ;;  %s3157_s8 = inlined_call_operand.vmem [shape: f32[1,32], index: 8, kind: input, shape index: {}]   ;;  %s3158_s9 = inlined_call_operand.vmem [shape: f32[1,32], index: 9, kind: input, shape index: {}]   ;;  %s3159_s10 = inlined_call_operand.vmem [shape: f32[1,32], index: 10, kind: input, shape index: {}]   ;;  %s3160_s11 = inlined_call_operand.vmem [shape: bf16[32,64], index: 11, kind: input, shape index: {}]   ;;  %s3161_s12 = inlined_call_operand.vmem [shape: bf16[64,256], index: 12, kind: input, shape index: {}]   ;;  %s3162_s13 = inlined_call_operand.vmem [shape: bf16[32,384], index: 13, kind: input, shape index: {}]   ;;  %s3163_s14 = inlined_call_operand.vmem [shape: f32[1,384], index: 14, kind: input, shape index: {}]   ;;  %s3164_s15 = inlined_call_operand.hbm [shape: f32[2,8,128], index: 15, kind: output, shape index: {}]  }
   0x1   :  { %3174 = sst [smem:[#allocation18_spill]] %s3149_s0 }
   0x2   :  { %3175 = sst [smem:[#allocation19_spill]] %s3160_s11 }
   0x3   :  { %20 = vsyncpa [#allocation7], 0 }
   0x4   :  { %22 = vsyncpa [#allocation7 + $0x1], 0  ;;  %s2646_s18 = smov 0   ;;  %s2648_s19 = smov 0  }
   0x5   :  { %s2650_s20 = smov 0   ;;  %s2652_s21 = smov 0  }
   0x6   :  { %s2654_s22 = smov 0   ;;  %s2656_s23 = smov 0  }
   0x7   :  { %s2658_s24 = smov 0   ;;  %s2660_s25 = smov 0  }
   0x8 LB: > { %3176 = sst [smem:[#allocation9_spill]] %s2527_s18  ;;  %s1996_s26 = sadd.s32 4294967295, %s2555_s25   ;;  %s2555_s25 = sphi %s2660_s25, %s28_s25   ;;  %s2551_s24 = sphi %s2658_s24, %s3200_s24   ;;  %s2547_s23 = sphi %s2656_s23, %s3199_s23   ;;  %s2543_s22 = sphi %s2654_s22, %s3198_s22   ;;  %s2539_s21 = sphi %s2652_s21, %s3197_s21   ;;  %s2535_s20 = sphi %s2650_s20, %s3196_s20   ;;  %s2531_s19 = sphi %s2648_s19, %s3202_s19   ;;  %s2527_s18 = sphi %s2646_s18, %s3201_s18  }
   0x9   : > { %3177 = sst [smem:[#allocation10_spill]] %s2535_s20  ;;  %s1997_s27 = sadd.s32 4294967294, %s2555_s25  }
   0xa   : > { %3178 = sst [smem:[#allocation11_spill]] %s2547_s23  ;;  %s37_s28 = sadd.s32 1, %s2547_s23 }
   0xb   : > { %3179 = sst [smem:[#allocation12_spill]] %s2551_s24  ;;  %p38_p0 = scmp.ge.s32.totalorder %s37_s28, 2 }
   0xc   : > { %3180 = sst [smem:[#allocation13_spill]] %s2555_s25  ;;  %s40_s29 = sadd.s32 1, %s2551_s24 }
   0xd   : > { %p381_p1 = scmp.ne.s32.totalorder %s2535_s20, %s2531_s19  ;;  %p382_p2 = scmp.eq.s32.totalorder %s1996_s26, 3 }
   0xe   : > { %s3204_s28 = smov (%p38_p0, %s37_s28), 0  ;;  %s3206_s29 = smov (!%p38_p0, %s40_s29), %s2551_s24 }
   0xf   : > { %3181 = sst [smem:[#allocation14_spill]] %s3204_s28  ;;  %p2695_p3 = por %p382_p2, %p381_p1 }
  0x10   : > { %p387_p4 = scmp.ne.s32.totalorder %s2531_s19, %s2527_s18  ;;  %p42_p5 = scmp.ge.s32.totalorder %s3206_s29, 2 }
  0x11   : > { %p388_p6 = scmp.eq.s32.totalorder %s1997_s27, 3  ;;  %p2002_p7 = scmp.ge.s32.totalorder %s2555_s25, 1 }
  0x12   : > { %p460_p8 = scmp.lt.s32.totalorder %s2555_s25, 5  ;;  %s3208_s29 = smov (%p42_p5, %s3206_s29), 0 }
  0x13   : > { %3183 = sst [smem:[#allocation15_spill]] %s3208_s29  ;;  %p2705_p9 = por %p388_p6, %p387_p4 }
  0x14   : > { %p461_p10 = pnand %p2002_p7, %p460_p8  ;;  %s368_s17 = ssub.s32 %s2551_s24, %s3208_s29 }
  0x15   : > { %s3184_s16 = scalar_select %p2705_p9, 1, 0 }
  0x16   : > { %s371_s26 = sadd.s32 1, %s2535_s20  ;;  %p369_p11 = scmp.eq.s32.totalorder %s368_s17, 0 }
  0x17   : > { %3185 = sst [smem:[#allocation16_spill]] %s3184_s16  ;;  %464 = sbr.rel (%p461_p10) target bundleno = 2538 (0x9ea), region = 80 }
  0x18   : > { %s2713_s28 = scalar_select %p369_p11, %s2535_s20, %s371_s26  }
  0x19   : > { %s3172_s27 = sand.u32 (!%p461_p10), 1, %s2531_s19   ;;  %s2004_s23 = sshll.u32 (!%p461_p10), %s2543_s22, 1 }
  0x1a   : > { %3186 = sst [smem:[#allocation17_spill]] %s2713_s28  ;;  %s2719_s18 = sshll.u32 (!%p461_p10), %s3172_s27, 3 }
  0x1b   : > { %s2722_s25 = sadd.s32 (!%p461_p10), %s2539_s21, %s2004_s23  ;;  %s3187_s0 = sld [smem:[#allocation18_spill]] (!%p461_p10) }
  0x1c   : > { %p512_p12 = scmp.lt.s32.totalorder (!%p461_p10), %s2722_s25, 3  ;;  %p2007_p13 = scmp.ne.s32.totalorder (!%p461_p10), %s2539_s21, 0 }
  0x1e   : > { %s513_s29 = scalar_select %p512_p12, %s2722_s25, 3 }
  0x1f   : > { %523 = sbr.rel (%p2007_p13) target bundleno = 337 (0x151), region = 84  ;;  %vm524_vm0 = vcmask (!%p2007_p13), 0   ;;  %v2331_v0 = vld [vmem:[%s3161_s12 + $0x4] ss:$8 sps:$4 sm:$0xff] (!%p2007_p13)   ;;  %v2557_v1 = vmov (!%p2007_p13), 0.0   ;;  %v2558_v6 = vmov (!%p2007_p13), 0  }
  0x20   : > { %s2101_s17 = sshll.u32 %s513_s29, 3  ;;  %525 = vst.msk [vmem:[#allocation3] sm:$0x1] (!%p2007_p13), %vm524_vm0, %v2557_v1  ;;  %526 = vst.msk [vmem:[#allocation4] sm:$0x1] (!%p2007_p13), %vm524_vm0, %v2557_v1  ;;  %617 = vmatprep.subr.bf16.mxu0 (!%p2007_p13), %v2331_v0  ;;  %2244 = vmatprep.subr.bf16.mxu1 (!%p2007_p13), %v2331_v0  ;;  %s3188_s11 = sld [smem:[#allocation19_spill]] (!%p2007_p13) }
  0x21   : > { %s2729_s28 = scalar_lea.vmem %s3187_s0, %s2101_s17  ;;  %527 = vst.msk [vmem:[#allocation5] sm:$0x1] (!%p2007_p13), %vm524_vm0, %v2557_v1  ;;  %v2333_v2 = vld [vmem:[%s3161_s12] ss:$8 sps:$4 sm:$0xff] (!%p2007_p13)   ;;  %v2334_v3 = vld [vmem:[%s3161_s12 + $0x14] ss:$8 sps:$4 sm:$0xff] (!%p2007_p13)   ;;  %649 = vmatprep.mubr.bf16.mxu0 (!%p2007_p13), %v2558_v6  ;;  %659 = vmatprep.mubr.bf16.mxu1 (!%p2007_p13), %v2558_v6 }
  0x22   : > { %618 = vmatpush1.bf16.msra.mxu0 (!%p2007_p13), %v2333_v2  ;;  %2248 = vmatpush1.bf16.msra.mxu1 (!%p2007_p13), %v2333_v2  ;;  %v2336_v4 = vld [vmem:[%s3161_s12 + $0x10] ss:$8 sps:$4 sm:$0xff] (!%p2007_p13)   ;;  %v2337_v5 = vld [vmem:[%s3161_s12 + $0x24] ss:$8 sps:$4 sm:$0xff] (!%p2007_p13)   ;;  %v2339_v11 = vld [vmem:[%s3161_s12 + $0x20] ss:$8 sps:$4 sm:$0xff] (!%p2007_p13)  }
  0x23   : > { %619 = vmatprep.subr.bf16.mxu0 (!%p2007_p13), %v2334_v3  ;;  %2245 = vmatprep.subr.bf16.mxu1 (!%p2007_p13), %v2334_v3  ;;  %v2340_v14 = vld [vmem:[%s3161_s12 + $0x34] ss:$8 sps:$4 sm:$0xff] (!%p2007_p13)   ;;  %vm540_vm1 = vcmask (!%p2007_p13), 523264   ;;  %v2342_v21 = vld [vmem:[%s3161_s12 + $0x30] ss:$8 sps:$4 sm:$0xff] (!%p2007_p13)  }
  0x26   : > { %v528_v7 = vld [vmem:[%s3188_s11] sm:$0xff]   ;;  %v530_v8 = vld [vmem:[%s3188_s11 + $0x8] sm:$0xff]   ;;  %620 = vmatpush1.bf16.msra.mxu0 %v2336_v4  ;;  %2249 = vmatpush1.bf16.msra.mxu1 %v2336_v4 }
  0x27   : > { %v534_v9 = vunpack.c.l.bf16 %v530_v8  ;;  %v532_v10 = vunpack.c.l.bf16 %v528_v7  ;;  %v535_v12 = vunpack.c.h.bf16 %v530_v8  ;;  %v533_v13 = vunpack.c.h.bf16 %v528_v7  ;;  %621 = vmatprep.subr.bf16.mxu0 %v2337_v5  ;;  %2246 = vmatprep.subr.bf16.mxu1 %v2337_v5 }
  0x29   : > { %v538_v15 = vmul.f32 %v534_v9, %v534_v9  ;;  %v536_v16 = vmul.f32 %v532_v10, %v532_v10  ;;  %v539_v19 = vmul.f32 %v535_v12, %v535_v12  ;;  %v537_v20 = vmul.f32 %v533_v13, %v533_v13 }
  0x2a   : > { %622 = vmatpush1.bf16.msra.mxu0 %v2339_v11  ;;  %2250 = vmatpush1.bf16.msra.mxu1 %v2339_v11 }
  0x2b   : > { %v547_v17 = vsel %vm540_vm1, %v538_v15, 0.0  ;;  %v541_v18 = vsel %vm540_vm1, %v536_v16, 0.0  ;;  %623 = vmatprep.subr.bf16.mxu0 %v2340_v14  ;;  %2247 = vmatprep.subr.bf16.mxu1 %v2340_v14  ;;  %v550_v22 = vsel %vm540_vm1, %v539_v19, 0.0  ;;  %v544_v23 = vsel %vm540_vm1, %v537_v20, 0.0 }
  0x2c   : > { %548 = vadd.xlane.f32.xlu1 %v547_v17  ;;  %542 = vadd.xlane.f32.xlu0 %v541_v18 }
  0x2e   : > { %624 = vmatpush1.bf16.msra.mxu0 %v2342_v21  ;;  %2251 = vmatpush1.bf16.msra.mxu1 %v2342_v21 }
  0x30   : > { %551 = vadd.xlane.f32.xlu1 %v550_v22  ;;  %545 = vadd.xlane.f32.xlu0 %v544_v23 }
  0x31   : > { %2018 = vmatmul.mubr.msk.bf16.vlgmr.msra.gmra.mrb[0].mxu0 %vm540_vm1, %v528_v7  ;;  %2019 = vmatmul.mubr.msk.bf16.vlgmr.msra.gmra.mrb[0].mxu1 %vm540_vm1, %v530_v8 }
  0xb9   : > { %v549_v24 = vpop.xlane.xlu1 %548  ;;  %v543_v25 = vpop.xlane.xlu0 %542 }
  0xbd   : > { %v552_v26 = vpop.xlane.xlu1 %551  ;;  %v546_v27 = vpop.xlane.xlu0 %545 }
 0x104   : > { %v661_v28 = vpop.f32.mrb[0].mxu1  ;;  %v651_v29 = vpop.f32.mrb[0].mxu0 }
 0x105   : > { %v674_v30 = vmul.f32 2.0, %v661_v28  ;;  %v670_v31 = vmul.f32 2.0, %v651_v29  ;;  %v653_v32 = vpop.f32.mrb[1].mxu0  ;;  %v663_v33 = vpop.f32.mrb[1].mxu1 }
 0x106   : > { %v671_v34 = vmul.f32 2.0, %v653_v32  ;;  %v675_v35 = vmul.f32 2.0, %v663_v33  ;;  %v655_v36 = vpop.f32.mrb[2].mxu0  ;;  %v665_v37 = vpop.f32.mrb[2].mxu1 }
 0x107   : > { %v682_v38 = vsub.f32 %v674_v30, %v549_v24  ;;  %v678_v39 = vsub.f32 %v670_v31, %v543_v25  ;;  %v672_v40 = vmul.f32 2.0, %v655_v36  ;;  %v676_v41 = vmul.f32 2.0, %v665_v37  ;;  %v657_v42 = vpop.f32.mrb[3].mxu0  ;;  %v667_v43 = vpop.f32.mrb[3].mxu1 }
 0x108   : > { %v679_v44 = vsub.f32 %v671_v34, %v543_v25  ;;  %v683_v45 = vsub.f32 %v675_v35, %v549_v24  ;;  %v673_v46 = vmul.f32 2.0, %v657_v42  ;;  %v677_v47 = vmul.f32 2.0, %v667_v43 }
 0x109   : > { %v690_v48 = vmul.f32 5.0, %v682_v38  ;;  %v686_v49 = vmul.f32 5.0, %v678_v39  ;;  %v684_v50 = vsub.f32 %v676_v41, %v552_v26  ;;  %v680_v51 = vsub.f32 %v672_v40, %v546_v27 }
 0x10a   : > { %v687_v52 = vmul.f32 5.0, %v679_v44  ;;  %v691_v53 = vmul.f32 5.0, %v683_v45  ;;  %v685_v54 = vsub.f32 %v677_v47, %v552_v26  ;;  %v681_v55 = vsub.f32 %v673_v46, %v546_v27 }
 0x10b   : > { %v694_v56 = vmax.f32 %v686_v49, %v690_v48  ;;  %v692_v57 = vmul.f32 5.0, %v684_v50  ;;  %v688_v58 = vmul.f32 5.0, %v680_v51 }
 0x10c   : > { %v703_v59 = vmax.f32 %v687_v52, %v691_v53  ;;  %v693_v60 = vmul.f32 5.0, %v685_v54  ;;  %v689_v61 = vmul.f32 5.0, %v681_v55 }
 0x10d   : > { %v695_v62 = vmax.f32 %v688_v58, %v692_v57 }
 0x10e   : > { %v704_v63 = vmax.f32 %v689_v61, %v693_v60 }
 0x10f   : > { %v696_v0 = vmax.f32 %v694_v56, %v695_v62 }
 0x110   : > { %v705_v1 = vmax.f32 %v703_v59, %v704_v63 }
 0x111   : > { %v697_v2 = vrot.slane %v696_v0, 4 }
 0x112   : > { %v706_v3 = vrot.slane %v705_v1, 4 }
 0x113   : > { %v698_v4 = vmax.f32 %v696_v0, %v697_v2 }
 0x114   : > { %v707_v5 = vmax.f32 %v705_v1, %v706_v3 }
 0x115   : > { %v699_v6 = vrot.slane %v698_v4, 2 }
 0x116   : > { %v708_v7 = vrot.slane %v707_v5, 2 }
 0x117   : > { %v700_v8 = vmax.f32 %v698_v4, %v699_v6 }
 0x118   : > { %v709_v9 = vmax.f32 %v707_v5, %v708_v7 }
 0x119   : > { %v701_v10 = vrot.slane %v700_v8, 1 }
 0x11a   : > { %v710_v11 = vrot.slane %v709_v9, 1 }
 0x11b   : > { %v702_v12 = vmax.f32 %v700_v8, %v701_v10 }
 0x11c   : > { %v711_v13 = vmax.f32 %v709_v9, %v710_v11 }
 0x11d   : > { %v712_v14 = vsub.f32 %v686_v49, %v702_v12  ;;  %v714_v15 = vsub.f32 %v688_v58, %v702_v12  ;;  %v716_v16 = vsub.f32 %v690_v48, %v702_v12  ;;  %v718_v17 = vsub.f32 %v692_v57, %v702_v12 }
 0x11e   : > { %v713_v18 = vsub.f32 %v687_v52, %v711_v13  ;;  %v715_v19 = vsub.f32 %v689_v61, %v711_v13  ;;  %v717_v20 = vsub.f32 %v691_v53, %v711_v13  ;;  %v719_v21 = vsub.f32 %v693_v60, %v711_v13 }
 0x11f   : > { %v720_v22 = vmul.f32 1.442695, %v712_v14  ;;  %v724_v23 = vmul.f32 1.442695, %v714_v15  ;;  %v728_v26 = vmul.f32 1.442695, %v716_v16 }
 0x120   : > { %v722_v24 = vmul.f32 1.442695, %v713_v18  ;;  %v726_v25 = vmul.f32 1.442695, %v715_v19  ;;  %v730_v27 = vmul.f32 1.442695, %v717_v20 }
 0x121   : > { %2347 = vpow2.f32 %v720_v22  ;;  %v732_v28 = vmul.f32 1.442695, %v718_v17  ;;  %v734_v29 = vmul.f32 1.442695, %v719_v21 }
 0x122   : > { %2349 = vpow2.f32 %v722_v24 }
 0x123   : > { %2351 = vpow2.f32 %v724_v23 }
 0x124   : > { %2353 = vpow2.f32 %v726_v25 }
 0x125   : > { %2355 = vpow2.f32 %v728_v26 }
 0x126   : > { %2357 = vpow2.f32 %v730_v27 }
 0x127   : > { %2359 = vpow2.f32 %v732_v28 }
 0x128   : > { %2361 = vpow2.f32 %v734_v29 }
 0x12b   : > { %v2348_v30 = vpop.eup %2347 }
 0x12c   : > { %v2350_v31 = vpop.eup %2349 }
 0x12d   : > { %v2352_v32 = vpop.eup %2351 }
 0x12e   : > { %v2354_v33 = vpop.eup %2353  ;;  %v736_v34 = vadd.f32 %v2352_v32, %v2348_v30 }
 0x12f   : > { %v2356_v35 = vpop.eup %2355  ;;  %v745_v36 = vadd.f32 %v2354_v33, %v2350_v31 }
 0x130   : > { %v2358_v37 = vpop.eup %2357  ;;  %v737_v38 = vadd.f32 %v2356_v35, %v736_v34 }
 0x131   : > { %v2360_v39 = vpop.eup %2359  ;;  %v746_v40 = vadd.f32 %v2358_v37, %v745_v36 }
 0x132   : > { %v2362_v41 = vpop.eup %2361  ;;  %v738_v42 = vadd.f32 %v2360_v39, %v737_v38 }
 0x133   : > { %v747_v43 = vadd.f32 %v2362_v41, %v746_v40 }
 0x134   : > { %v739_v44 = vrot.slane %v738_v42, 4 }
 0x135   : > { %v748_v45 = vrot.slane %v747_v43, 4 }
 0x136   : > { %v740_v46 = vadd.f32 %v739_v44, %v738_v42 }
 0x137   : > { %v749_v47 = vadd.f32 %v748_v45, %v747_v43 }
 0x138   : > { %v741_v48 = vrot.slane %v740_v46, 2 }
 0x139   : > { %v750_v49 = vrot.slane %v749_v47, 2 }
 0x13a   : > { %v742_v50 = vadd.f32 %v741_v48, %v740_v46 }
 0x13b   : > { %v751_v51 = vadd.f32 %v750_v49, %v749_v47 }
 0x13c   : > { %v743_v52 = vrot.slane %v742_v50, 1 }
 0x13d   : > { %v752_v53 = vrot.slane %v751_v51, 1 }
 0x13e   : > { %v744_v54 = vadd.f32 %v743_v52, %v742_v50 }
 0x13f   : > { %v753_v55 = vadd.f32 %v752_v53, %v751_v51 }
 0x140   : > { %2363 = vrcp.f32 %v744_v54 }
 0x141   : > { %2365 = vrcp.f32 %v753_v55 }
 0x14a   : > { %v2364_v56 = vpop.eup %2363 }
 0x14b   : > { %v2366_v57 = vpop.eup %2365  ;;  %v755_v58 = vmul.f32 %v2364_v56, %v2348_v30  ;;  %v758_v59 = vmul.f32 %v2364_v56, %v2352_v32  ;;  %v760_v60 = vmul.f32 %v2364_v56, %v2356_v35  ;;  %v762_v61 = vmul.f32 %v2364_v56, %v2360_v39 }
 0x14c   : > { %v757_v62 = vmul.f32 %v2366_v57, %v2350_v31  ;;  %v759_v63 = vmul.f32 %v2366_v57, %v2354_v33  ;;  %v761_v0 = vmul.f32 %v2366_v57, %v2358_v37  ;;  %v763_v1 = vmul.f32 %v2366_v57, %v2362_v41 }
 0x14d   : > { %v764_v2 = vpack.c.bf16 %v758_v59, %v755_v58  ;;  %v766_v3 = vpack.c.bf16 %v762_v61, %v760_v60 }
 0x14e   : > { %v765_v4 = vpack.c.bf16 %v759_v63, %v757_v62  ;;  %v767_v5 = vpack.c.bf16 %v763_v1, %v761_v0 }
 0x14f   : > { %768 = vst [vmem:[#allocation2] sm:$0xff] %v764_v2  ;;  %770 = vst [vmem:[#allocation2 + $0x10] sm:$0xff] %v766_v3 }
 0x150   : > { %769 = vst [vmem:[#allocation2 + $0x8] sm:$0xff] %v765_v4  ;;  %771 = vst [vmem:[#allocation2 + $0x18] sm:$0xff] %v767_v5 }
 0x151 PF: > { %v2367_v6 = vld [vmem:[%s3151_s2 + $0x40] sm:$0xff]   ;;  %v2369_v8 = vld [vmem:[%s3151_s2 + $0x48] sm:$0xff]   ;;  %v2371_v10 = vld [vmem:[%s3151_s2 + $0x50] sm:$0xff]   ;;  %v2559_v26 = vmov 0.0   ;;  %vm2560_vm2 = vmmov 0   ;;  %vm1216_vm7 = vcmask 261120  }
 0x152   : > { %v2368_v7 = vld [vmem:[%s3151_s2] sm:$0xff]   ;;  %2102 = vmatprep.subr.bf16.mxu0 %v2367_v6  ;;  %v2370_v9 = vld [vmem:[%s3151_s2 + $0x8] sm:$0xff]   ;;  %v2372_v11 = vld [vmem:[%s3151_s2 + $0x10] sm:$0xff]   ;;  %2176 = vmatprep.subr.bf16.mxu1 %v2559_v26  ;;  %s2562_s0 = smov 32   ;;  %s2095_s26 = sshll.u32 %s2722_s25, 3  ;;  %vm1283_vm9 = vcmask 0  }
 0x153   : > { %2103 = vmatpush3.bf16.msra.mxu0 %v2368_v7  ;;  %v2373_v12 = vld [vmem:[%s3151_s2 + $0x58] sm:$0xff]   ;;  %v2375_v14 = vld [vmem:[%s3151_s2 + $0x60] sm:$0xff]   ;;  %v2377_v16 = vld [vmem:[%s3151_s2 + $0x68] sm:$0xff]   ;;  %2192 = vmatprep.mubr.msk.bf16.mxu1 %vm2560_vm2, %v2559_v26  ;;  %p2096_p0 = scmp.ne.s32.totalorder %s2539_s21, 1 }
 0x154   : > { %2104 = vmatprep.subr.bf16.mxu0 %v2369_v8  ;;  %v2374_v13 = vld [vmem:[%s3151_s2 + $0x18] sm:$0xff]   ;;  %v2376_v15 = vld [vmem:[%s3151_s2 + $0x20] sm:$0xff]   ;;  %v2378_v18 = vld [vmem:[%s3151_s2 + $0x28] sm:$0xff]   ;;  %s3189_s21 = scalar_lea.vmem (!%p2096_p0), [#allocation6], %s2719_s18 }
 0x155   : > { %v2803_v17 = vld [vmem:[%s2729_s28] sm:$0xff]  ;;  %v2379_v20 = vld [vmem:[%s3151_s2 + $0x70] sm:$0xff]   ;;  %v2381_v22 = vld [vmem:[%s3151_s2 + $0x78] sm:$0xff]  }
 0x156   : > { %v2022_v19 = vcombine.high %v2803_v17, %v2803_v17  ;;  %v2380_v21 = vld [vmem:[%s3151_s2 + $0x30] sm:$0xff]   ;;  %v2382_v23 = vld [vmem:[%s3151_s2 + $0x38] sm:$0xff]   ;;  %v2021_v24 = vcombine.low %v2803_v17, %v2803_v17  ;;  %v2385_v25 = vld [vmem:[%s3153_s4] sm:$0xff]  }
 0x157   : > { %2105 = vmatpush3.bf16.msra.mxu0 %v2370_v9  ;;  %2177 = vmatpush3.bf16.msra.mxu1 %v2385_v25  ;;  %v2386_v27 = vld [vmem:[%s3153_s4 + $0x8] sm:$0xff]   ;;  %v2387_v28 = vld [vmem:[%s3153_s4 + $0x10] sm:$0xff]   ;;  %v2388_v29 = vld [vmem:[%s3153_s4 + $0x18] sm:$0xff]  }
 0x158   : > { %2106 = vmatprep.subr.bf16.mxu0 %v2371_v10  ;;  %947 = vmatprep.mubr.bf16.mxu0 %v2022_v19  ;;  %v2389_v30 = vld [vmem:[%s3153_s4 + $0x20] sm:$0xff]   ;;  %v2390_v31 = vld [vmem:[%s3153_s4 + $0x28] sm:$0xff]   ;;  %v2391_v32 = vld [vmem:[%s3153_s4 + $0x30] sm:$0xff]  }
 0x159   : > { %2178 = vmatprep.subr.bf16.mxu1 %v2559_v26  ;;  %v2392_v33 = vld [vmem:[%s3153_s4 + $0x38] sm:$0xff]   ;;  %v2020_v35 = vld [vmem:[%s3152_s3] ss:$0 sm:$0xff]  ;;  %v2394_v58 = vld [vmem:[%s3155_s6 + $0x8] sm:$0xff]  }
 0x15a   : > { %v2393_v57 = vld [vmem:[%s3155_s6] sm:$0xff]   ;;  %v2395_v59 = vld [vmem:[%s3155_s6 + $0x10] sm:$0xff]   ;;  %v2396_v60 = vld [vmem:[%s3155_s6 + $0x18] sm:$0xff]  }
 0x15b   : > { %2107 = vmatpush3.bf16.msra.mxu0 %v2372_v11  ;;  %2179 = vmatpush3.bf16.msra.mxu1 %v2386_v27  ;;  %v2397_v61 = vld [vmem:[%s3155_s6 + $0x20] sm:$0xff]   ;;  %v2398_v62 = vld [vmem:[%s3155_s6 + $0x28] sm:$0xff]   ;;  %v2399_v63 = vld [vmem:[%s3155_s6 + $0x30] sm:$0xff]  }
 0x15c   : > { %2108 = vmatprep.subr.bf16.mxu0 %v2373_v12  ;;  %2180 = vmatprep.subr.bf16.mxu1 %v2559_v26  ;;  %v2400_v0 = vld [vmem:[%s3155_s6 + $0x38] sm:$0xff]   ;;  %v2039_v1 = vld [vmem:[%s3154_s5] ss:$0 sm:$0xff] }
 0x15f   : > { %2109 = vmatpush3.bf16.msra.mxu0 %v2374_v13  ;;  %2181 = vmatpush3.bf16.msra.mxu1 %v2387_v28 }
 0x160   : > { %2110 = vmatprep.subr.bf16.mxu0 %v2375_v14  ;;  %2182 = vmatprep.subr.bf16.mxu1 %v2559_v26 }
 0x163   : > { %2111 = vmatpush3.bf16.msra.mxu0 %v2376_v15  ;;  %2183 = vmatpush3.bf16.msra.mxu1 %v2388_v29 }
 0x164   : > { %2112 = vmatprep.subr.bf16.mxu0 %v2377_v16  ;;  %2184 = vmatprep.subr.bf16.mxu1 %v2559_v26 }
 0x167   : > { %2113 = vmatpush3.bf16.msra.mxu0 %v2378_v18  ;;  %2185 = vmatpush3.bf16.msra.mxu1 %v2389_v30 }
 0x168   : > { %2114 = vmatprep.subr.bf16.mxu0 %v2379_v20  ;;  %2186 = vmatprep.subr.bf16.mxu1 %v2559_v26 }
 0x16b   : > { %2115 = vmatpush3.bf16.msra.mxu0 %v2380_v21  ;;  %2187 = vmatpush3.bf16.msra.mxu1 %v2390_v31 }
 0x16c   : > { %2116 = vmatprep.subr.bf16.mxu0 %v2381_v22  ;;  %2188 = vmatprep.subr.bf16.mxu1 %v2559_v26 }
 0x16f   : > { %2117 = vmatpush3.bf16.msra.mxu0 %v2382_v23  ;;  %2189 = vmatpush3.bf16.msra.mxu1 %v2391_v32 }
 0x170   : > { %2196 = vmatprep.subr.bf16.mxu0 %v2559_v26  ;;  %2190 = vmatprep.subr.bf16.mxu1 %v2559_v26 }
 0x172   : > { %948 = vmatmul.mubr.bf16.vlgmr.msra.gmra.mrb[0].mxu0 %v2021_v24  ;;  %v2048_v24 = vld [vmem:[%s3156_s7] ss:$0 sm:$0xff] }
 0x173   : > { %2212 = vmatprep.mubr.msk.bf16.mxu0 %vm2560_vm2, %v2559_v26  ;;  %2191 = vmatpush3.bf16.msra.mxu1 %v2392_v33 }
 0x174   : > { %2197 = vmatpush3.bf16.msra.mxu0 %v2393_v57  ;;  %v2412_v57 = vld [vmem:[%s3150_s1 + $0x48] sm:$0xff]  }
 0x175   : > { %2198 = vmatprep.subr.bf16.mxu0 %v2559_v26 }
 0x178   : > { %2199 = vmatpush3.bf16.msra.mxu0 %v2394_v58  ;;  %v2413_v58 = vld [vmem:[%s3150_s1 + $0x88] sm:$0xff]  }
 0x179   : > { %2200 = vmatprep.subr.bf16.mxu0 %v2559_v26 }
 0x17c   : > { %2201 = vmatpush3.bf16.msra.mxu0 %v2395_v59  ;;  %v2414_v59 = vld [vmem:[%s3150_s1 + $0x8] sm:$0xff]  }
 0x17d   : > { %2202 = vmatprep.subr.bf16.mxu0 %v2559_v26 }
 0x180   : > { %2203 = vmatpush3.bf16.msra.mxu0 %v2396_v60  ;;  %v2415_v60 = vld [vmem:[%s3150_s1 + $0x50] sm:$0xff]  }
 0x181   : > { %2204 = vmatprep.subr.bf16.mxu0 %v2559_v26 }
 0x184   : > { %2205 = vmatpush3.bf16.msra.mxu0 %v2397_v61  ;;  %v2416_v61 = vld [vmem:[%s3150_s1 + $0x90] sm:$0xff]  }
 0x185   : > { %2206 = vmatprep.subr.bf16.mxu0 %v2559_v26 }
 0x188   : > { %2207 = vmatpush3.bf16.msra.mxu0 %v2398_v62  ;;  %v2417_v62 = vld [vmem:[%s3150_s1 + $0x10] sm:$0xff]  }
 0x189   : > { %2208 = vmatprep.subr.bf16.mxu0 %v2559_v26 }
 0x18c   : > { %2209 = vmatpush3.bf16.msra.mxu0 %v2399_v63  ;;  %v2418_v63 = vld [vmem:[%s3150_s1 + $0x58] sm:$0xff]  }
 0x18d   : > { %2210 = vmatprep.subr.bf16.mxu0 %v2559_v26 }
 0x190   : > { %2211 = vmatpush3.bf16.msra.mxu0 %v2400_v0  ;;  %v2419_v0 = vld [vmem:[%s3150_s1 + $0x98] sm:$0xff]  }
 0x191   : > { %2224 = vmatprep.subr.bf16.mxu0 %v2559_v26 }
 0x245   : > { %v2118_v34 = vpop.f32.mrb[0].mxu0 }
 0x246   : > { %v2119_v36 = vpop.f32.mrb[1].mxu0 }
 0x247   : > { %v2120_v37 = vadd.f32 %v2119_v36, %v2118_v34  ;;  %v2121_v38 = vpop.f32.mrb[2].mxu0 }
 0x248   : > { %v2122_v39 = vpop.f32.mrb[3].mxu0  ;;  %v1286_v38 = vld [vmem:[#allocation2 + $0x8] sm:$0xff] }
 0x249   : > { %v950_v40 = vadd.f32 %v2120_v37, %v2020_v35  ;;  %1292 = vmatprep.subr.bf16.mxu1 %v1286_v38  ;;  %v1285_v39 = vld [vmem:[#allocation2] sm:$0xff] }
 0x24a   : > { %v2423_v38 = vld [vmem:[%s3150_s1 + $0x20] sm:$0xff]  }
 0x24b   : > { %v958_v41 = vand.u32 2147483647, %v950_v40  ;;  %v955_v52 = vmax.f32 %v950_v40, 0.0  ;;  %vm956_vm4 = vcmp.ne.f32.partialorder %v950_v40, %v950_v40 }
 0x24d   : > { %v959_v42 = vsub.f32 0.0, %v958_v41  ;;  %v1287_v41 = vld [vmem:[#allocation2 + $0x10] sm:$0xff] }
 0x24f   : > { %v960_v43 = vmul.f32 1.442695, %v959_v42  ;;  %v2403_v42 = vld [vmem:[%s3162_s13 + $0x4] ss:$12 sps:$4 sm:$0xff]  }
 0x251   : > { %2433 = vpow2.f32 %v960_v43  ;;  %v2561_v43 = vmov 0  }
 0x25b   : > { %v2434_v44 = vpop.eup %2433 }
 0x25c   : > { %v962_v45 = vadd.f32 1.0, %v2434_v44  ;;  %v965_v46 = vmul.f32 -0.5, %v2434_v44  ;;  %v968_v48 = vand.u32 2147483647, %v2434_v44 }
 0x25e   : > { %2435 = vlog2.f32 %v962_v45  ;;  %v966_v47 = vadd.f32 1.0, %v965_v46  ;;  %vm969_vm3 = vcmp.lt.f32.partialorder %v968_v48, 0.0004427343 }
 0x260   : > { %v967_v51 = vmul.f32 %v2434_v44, %v966_v47  ;;  %v2401_v47 = vld [vmem:[%s3162_s13] ss:$12 sps:$4 sm:$0xff]  }
 0x268   : > { %v2436_v49 = vpop.eup %2435 }
 0x269   : > { %v964_v50 = vmul.f32 0.6931472, %v2436_v49  ;;  %v2406_v49 = vld [vmem:[%s3162_s13 + $0x1c] ss:$12 sps:$4 sm:$0xff]  }
 0x26b   : > { %v970_v53 = vsel %vm969_vm3, %v967_v51, %v964_v50  ;;  %v2404_v50 = vld [vmem:[%s3162_s13 + $0x18] ss:$12 sps:$4 sm:$0xff]   ;;  %v2407_v51 = vld [vmem:[%s3162_s13 + $0x8] ss:$12 sps:$4 sm:$0xff]  }
 0x26c   : > { %v971_v54 = vadd.f32 %v970_v53, %v955_v52  ;;  %v2408_v52 = vld [vmem:[%s3162_s13 + $0x20] ss:$12 sps:$4 sm:$0xff]  }
 0x26d   : > { %v2058_v53 = vld [vmem:[%s3158_s9] ss:$0 sm:$0xff] }
 0x26e   : > { %v972_v55 = vsel %vm956_vm4, %v950_v40, %v971_v54  ;;  %v1288_v40 = vld [vmem:[#allocation2 + $0x18] sm:$0xff]  ;;  %v2409_v54 = vld [vmem:[%s3150_s1 + $0x40] sm:$0xff]  }
 0x26f   : > { %v973_v56 = vpack.c.bf16 %v972_v55, %v972_v55  ;;  %v2410_v55 = vld [vmem:[%s3150_s1 + $0x80] sm:$0xff]  }
 0x271   : > { %2193 = vmatmul.mubr.bf16.vlgmr.msra.gmra.mrb[0].mxu1 %v973_v56  ;;  %v2411_v56 = vld [vmem:[%s3150_s1] sm:$0xff]  }
 0x272   : > { %1293 = vmatpush1.bf16.msra.mxu1 %v1285_v39  ;;  %1324 = vmatprep.mubr.bf16.mxu1 %v2561_v43 }
 0x273   : > { %1294 = vmatprep.subr.bf16.mxu1 %v1288_v40  ;;  %v2424_v40 = vld [vmem:[%s3150_s1 + $0x68] sm:$0xff]  }
 0x276   : > { %1295 = vmatpush1.bf16.msra.mxu1 %v1287_v41  ;;  %v2425_v41 = vld [vmem:[%s3150_s1 + $0xa8] sm:$0xff]  }
 0x277   : > { %1434 = vmatprep.subr.bf16.mxu1 %v2403_v42  ;;  %v2426_v42 = vld [vmem:[%s3150_s1 + $0x28] sm:$0xff]  }
 0x344   : > { %v1079_v2 = vpop.f32.mrb[0].mxu1 }
 0x345   : > { %v1080_v3 = vadd.f32 %v2039_v1, %v1079_v2  ;;  %v2194_v4 = vpop.f32.mrb[1].mxu1  ;;  %v2420_v1 = vld [vmem:[%s3150_s1 + $0x18] sm:$0xff]   ;;  %v1387_v2 = vlaneseq }
 0x346   : > { %v1082_v5 = vpop.f32.mrb[2].mxu1 }
 0x347   : > { %v1088_v6 = vand.u32 2147483647, %v1080_v3  ;;  %v2195_v7 = vpop.f32.mrb[3].mxu1  ;;  %v1085_v19 = vmax.f32 %v1080_v3, 0.0  ;;  %vm1086_vm6 = vcmp.ne.f32.partialorder %v1080_v3, %v1080_v3 }
 0x349   : > { %v1089_v8 = vsub.f32 0.0, %v1088_v6 }
 0x34b   : > { %v1090_v9 = vmul.f32 1.442695, %v1089_v8 }
 0x34d   : > { %2437 = vpow2.f32 %v1090_v9 }
 0x357   : > { %v2438_v10 = vpop.eup %2437 }
 0x358   : > { %v1092_v11 = vadd.f32 1.0, %v2438_v10  ;;  %v1095_v12 = vmul.f32 -0.5, %v2438_v10  ;;  %v1098_v14 = vand.u32 2147483647, %v2438_v10 }
 0x35a   : > { %2439 = vlog2.f32 %v1092_v11  ;;  %v1096_v13 = vadd.f32 1.0, %v1095_v12  ;;  %vm1099_vm5 = vcmp.lt.f32.partialorder %v1098_v14, 0.0004427343 }
 0x35c   : > { %v1097_v18 = vmul.f32 %v2438_v10, %v1096_v13  ;;  %v1385_v10 = vld [vmem:[%s3163_s14] sm:$0x7] }
 0x364   : > { %v2440_v15 = vpop.eup %2439 }
 0x365   : > { %v1094_v16 = vmul.f32 0.6931472, %v2440_v15 }
 0x367   : > { %v1100_v20 = vsel %vm1099_vm5, %v1097_v18, %v1094_v16 }
 0x368   : > { %v1101_v21 = vadd.f32 %v1100_v20, %v1085_v19 }
 0x36a   : > { %v1102_v22 = vsel %vm1086_vm6, %v1080_v3, %v1101_v21  ;;  %v2980_v3 = vshrl.u32 %v1387_v2, 7 }
 0x36b   : > { %v1103_v23 = vpack.c.bf16 %v1102_v22, %v1102_v22 }
 0x36c   : > { %v2983_v8 = vsub.s32 0, %v2980_v3  ;;  %v1393_v9 = vsub.s32 1, %v2980_v3  ;;  %v1397_v15 = vsub.s32 2, %v2980_v3 }
 0x36d   : > { %2213 = vmatmul.mubr.bf16.vlgmr.msra.gmra.mrb[4].mxu0 %v1103_v23 }
 0x36e   : > { %2240 = vmatprep.mubr.msk.bf16.mxu0 %vm2560_vm2, %v2559_v26  ;;  %2225 = vmatpush3.bf16.msra.mxu0 %v2410_v55  ;;  %v1390_v11 = vrot.slane %v1385_v10, %v2983_v8  ;;  %v1394_v12 = vrot.slane %v1385_v10, %v1393_v9  ;;  %v1398_v21 = vrot.slane %v1385_v10, %v1397_v15 }
 0x36f   : > { %2226 = vmatprep.subr.bf16.mxu0 %v2559_v26 }
 0x372   : > { %2227 = vmatpush3.bf16.msra.mxu0 %v2413_v58 }
 0x373   : > { %2228 = vmatprep.subr.bf16.mxu0 %v2559_v26 }
 0x376   : > { %2229 = vmatpush3.bf16.msra.mxu0 %v2416_v61 }
 0x377   : > { %2230 = vmatprep.subr.bf16.mxu0 %v2559_v26 }
 0x37a   : > { %2231 = vmatpush3.bf16.msra.mxu0 %v2419_v0 }
 0x37b   : > { %2232 = vmatprep.subr.bf16.mxu0 %v2559_v26 }
 0x440   : > { %v1209_v25 = vpop.f32.mrb[4].mxu0 }
 0x441   : > { %v1210_v27 = vadd.f32 %v2048_v24, %v1209_v25  ;;  %v2214_v28 = vpop.f32.mrb[5].mxu0 }
 0x442   : > { %v1212_v29 = vpop.f32.mrb[6].mxu0 }
 0x443   : > { %v2904_v30 = vmul.f32 0.999995, %v1210_v27  ;;  %v2215_v31 = vpop.f32.mrb[7].mxu0 }
 0x445   : > { %v1217_v32 = vsel %vm1216_vm7, %v2904_v30, -inf }
 0x446   : > { %1218 = vmax.xlane.f32.xlu0 %v1217_v32 }
 0x4d3   : > { %v1219_v33 = vpop.xlane.xlu0 %1218 }
 0x4d4   : > { %v1220_v34 = vsub.f32 %v2904_v30, %v1219_v33 }
 0x4d6   : > { %v1221_v35 = vmul.f32 1.442695, %v1220_v34  ;;  %v2057_v34 = vld [vmem:[%s3157_s8] ss:$0 sm:$0xff] }
 0x4d8   : > { %2441 = vpow2.f32 %v1221_v35  ;;  %v1238_v35 = vsub.f32 %v2904_v30, %v2057_v34 }
 0x4da   : > { %v1239_v39 = vmul.f32 %v1238_v35, %v1238_v35 }
 0x4e2   : > { %v2442_v36 = vpop.eup %2441 }
 0x4e3   : > { %v1223_v37 = vsel %vm1216_vm7, %v2442_v36, 0.0 }
 0x4e4   : > { %1224 = vadd.xlane.f32.xlu0 %v1223_v37  ;;  %v2422_v37 = vld [vmem:[%s3150_s1 + $0xa0] sm:$0xff]  }
 0x4e5   : > { %2233 = vmatpush3.bf16.msra.mxu0 %v2422_v37 }
 0x4e6   : > { %2234 = vmatprep.subr.bf16.mxu0 %v2559_v26 }
 0x4e9   : > { %2235 = vmatpush3.bf16.msra.mxu0 %v2425_v41 }
 0x4ea   : > { %2236 = vmatprep.subr.bf16.mxu0 %v2559_v26 }
 0x4fa   : > { %1251 = vrot.lane.b32.xlu0 %v2058_v53, %s2562_s0 }
 0x571   : > { %v1225_v44 = vpop.xlane.xlu0 %1224 }
 0x572   : > { %2443 = vrcp.f32 %v1225_v44  ;;  %v2427_v44 = vld [vmem:[%s3150_s1 + $0x70] sm:$0xff]  }
 0x57c   : > { %v2444_v45 = vpop.eup %2443 }
 0x57d   : > { %v1227_v46 = vmul.f32 %v2444_v45, %v2442_v36  ;;  %v2421_v36 = vld [vmem:[%s3150_s1 + $0x60] sm:$0xff]   ;;  %v2428_v45 = vld [vmem:[%s3150_s1 + $0xb0] sm:$0xff]  }
 0x57e   : > { %2237 = vmatpush3.bf16.msra.mxu0 %v2428_v45 }
 0x57f   : > { %v1228_v48 = vpack.c.bf16 %v1227_v46, %v1227_v46  ;;  %v2429_v46 = vld [vmem:[%s3150_s1 + $0x30] sm:$0xff]   ;;  %2238 = vmatprep.subr.bf16.mxu0 %v2559_v26 }
 0x581   : > { %2061 = vmatmul.mubr.msk.bf16.vlgmr.msra.gmra.mrb[4].mxu1 %vm1216_vm7, %v1228_v48 }
 0x582   : > { %1435 = vmatpush1.bf16.msra.mxu1 %v2401_v47  ;;  %1466 = vmatprep.mubr.bf16.mxu1 %v2561_v43  ;;  %v2059_v43 = vld [vmem:[%s3159_s10] ss:$0 sm:$0xff]  ;;  %v2430_v47 = vld [vmem:[%s3150_s1 + $0x78] sm:$0xff]  }
 0x583   : > { %1436 = vmatprep.subr.bf16.mxu1 %v2406_v49  ;;  %v2432_v49 = vld [vmem:[%s3150_s1 + $0x38] sm:$0xff]  }
 0x586   : > { %1437 = vmatpush1.bf16.msra.mxu1 %v2404_v50 }
 0x587   : > { %2216 = vmatprep.subr.bf16.mxu1 %v2559_v26 }
 0x589   : > { %2068 = vmatmul.mubr.msk.bf16.vlgmr.msra.gmra.mrb[8].mxu1 %vm1216_vm7, %v1228_v48 }
 0x58a   : > { %2217 = vmatpush3.bf16.msra.mxu1 %v2407_v51  ;;  %2220 = vmatprep.mubr.msk.bf16.mxu1 %vm2560_vm2, %v2559_v26 }
 0x58b   : > { %2218 = vmatprep.subr.bf16.mxu1 %v2559_v26 }
 0x58e   : > { %2219 = vmatpush3.bf16.msra.mxu1 %v2408_v52  ;;  %v1229_v52 = vmul.f32 1.442695, %v2904_v30 }
 0x58f   : > { %2145 = vmatprep.subr.bf16.mxu1 %v2409_v54 }
 0x590   : > { %2445 = vpow2.f32 %v1229_v52 }
 0x591   : > { %2221 = vmatmul.mubr.msk.bf16.vlgmr.msra.gmra.mrb[12].mxu1 %vm1216_vm7, %v1228_v48  ;;  %v2431_v48 = vld [vmem:[%s3150_s1 + $0xb8] sm:$0xff]  }
 0x592   : > { %2146 = vmatpush3.bf16.msra.mxu1 %v2411_v56  ;;  %2239 = vmatpush3.bf16.msra.mxu0 %v2431_v48  ;;  %v1252_v56 = vpop.permute.xlu0 %1251 }
 0x593   : > { %2147 = vmatprep.subr.bf16.mxu1 %v2412_v57 }
 0x596   : > { %2148 = vmatpush3.bf16.msra.mxu1 %v2414_v59 }
 0x597   : > { %2149 = vmatprep.subr.bf16.mxu1 %v2415_v60 }
 0x59a   : > { %2150 = vmatpush3.bf16.msra.mxu1 %v2417_v62  ;;  %v2446_v54 = vpop.eup %2445 }
 0x59b   : > { %2151 = vmatprep.subr.bf16.mxu1 %v2418_v63 }
 0x59e   : > { %2152 = vmatpush3.bf16.msra.mxu1 %v2420_v1 }
 0x59f   : > { %2153 = vmatprep.subr.bf16.mxu1 %v2421_v36 }
 0x5a2   : > { %2154 = vmatpush3.bf16.msra.mxu1 %v2423_v38 }
 0x5a3   : > { %2155 = vmatprep.subr.bf16.mxu1 %v2424_v40 }
 0x5a6   : > { %2156 = vmatpush3.bf16.msra.mxu1 %v2426_v42  ;;  %v1356_v42 = vunpack.c.l.bf16 %v2803_v17 }
 0x5a7   : > { %2157 = vmatprep.subr.bf16.mxu1 %v2427_v44  ;;  %v1808_v44 = vstv %s2095_s26 }
 0x5aa   : > { %2158 = vmatpush3.bf16.msra.mxu1 %v2429_v46  ;;  %v3070_v46 = vand.u32 127, %v1387_v2 }
 0x5ab   : > { %2159 = vmatprep.subr.bf16.mxu1 %v2430_v47  ;;  %v1809_v47 = vadd.s32 %v1808_v44, %v2980_v3 }
 0x5ac   : > { %vm1852_vm10 = vcmp.eq.s32.totalorder (!%p2096_p0), %v3070_v46, 0  ;;  %vm1863_vm11 = vcmp.eq.s32.totalorder (!%p2096_p0), %v3070_v46, 1  ;;  %vm1875_vm12 = vcmp.eq.s32.totalorder (!%p2096_p0), %v3070_v46, 2  ;;  %vm1887_vm13 = vcmp.eq.s32.totalorder (!%p2096_p0), %v3070_v46, 3 }
 0x5ad   : > { %vm1810_vm8 = vcmp.eq.s32.totalorder %v3070_v46, %v1809_v47  ;;  %vm1899_vm14 = vcmp.eq.s32.totalorder (!%p2096_p0), %v3070_v46, 4 }
 0x5ae   : > { %2160 = vmatpush3.bf16.msra.mxu1 %v2432_v49 }
 0x654   : > { %v1326_v4 = vpop.f32.mrb[4].mxu1 }
 0x655   : > { %v1328_v5 = vpop.f32.mrb[5].mxu1  ;;  %v3047_v50 = vmul.f32 0.999995, %v1326_v4 }
 0x656   : > { %v1330_v6 = vpop.f32.mrb[6].mxu1  ;;  %v3049_v51 = vmul.f32 0.999995, %v1328_v5 }
 0x657   : > { %v1331_v7 = vpop.f32.mrb[7].mxu1  ;;  %v1361_v48 = vmul.f32 %v1356_v42, %v3047_v50 }
 0x658   : > { %v1335_v26 = vmax.f32 %v3047_v50, %v3049_v51 }
 0x65c   : > { %v1468_v13 = vpop.f32.mrb[8].mxu1 }
 0x65d   : > { %v1470_v14 = vpop.f32.mrb[9].mxu1  ;;  %v2991_v18 = vadd.f32 %v1468_v13, %v1390_v11 }
 0x65e   : > { %v1472_v16 = vpop.f32.mrb[10].mxu1  ;;  %v2993_v19 = vadd.f32 %v1470_v14, %v1394_v12 }
 0x65f   : > { %v1473_v20 = vpop.f32.mrb[11].mxu1  ;;  %v1515_v22 = vmul.f32 %v2991_v18, %v2991_v18 }
 0x660   : > { %v1516_v23 = vmul.f32 %v2993_v19, %v2993_v19 }
 0x662   : > { %v1518_v32 = vadd.f32 %v1516_v23, %v1515_v22 }
 0x664   : > { %v1509_v24 = vpop.f32.mrb[12].mxu1 }
 0x665   : > { %v1510_v25 = vadd.f32 %v1509_v24, %v1398_v21  ;;  %v2222_v27 = vpop.f32.mrb[13].mxu1 }
 0x666   : > { %v1512_v28 = vpop.f32.mrb[14].mxu1 }
 0x667   : > { %v2223_v29 = vpop.f32.mrb[15].mxu1  ;;  %v1517_v31 = vmul.f32 %v1510_v25, %v1510_v25 }
 0x669   : > { %v1519_v33 = vadd.f32 %v1518_v32, %v1517_v31 }
 0x66b   : > { %1520 = vadd.xlane.f32.xlu1 %v1519_v33 }
 0x67c   : > { %1241 = vrot.lane.b32.xlu1 %v1239_v39, %s2562_s0 }
 0x680   : > { %1261 = vrot.lane.b32.xlu1 %v2059_v43, %s2562_s0  ;;  %s2563_s0 = smov 96   ;;  %v1357_v43 = vunpack.c.h.bf16 %v2803_v17 }
 0x682   : > { %v1358_v45 = vadd.f32 %v1357_v43, %v1356_v42  ;;  %v1362_v49 = vmul.f32 %v1357_v43, %v3049_v51 }
 0x6a4   : > { %1336 = vmax.xlane.f32.xlu1 %v1335_v26  ;;  %v1363_v26 = vadd.f32 %v1362_v49, %v1361_v48 }
 0x6f8   : > { %v1521_v53 = vpop.xlane.xlu1 %1520 }
 0x6f9   : > { %2447 = vrsqrt.f32 %v1521_v53 }
 0x6fc   : > { %v1242_v55 = vpop.permute.xlu1 %1241 }
 0x6fd   : > { %v1244_v57 = vadd.f32 %v2446_v54, %v1242_v55 }
 0x6ff   : > { %v1254_v58 = vmul.f32 %v1252_v56, %v1244_v57 }
 0x700   : > { %v1262_v59 = vpop.permute.xlu1 %1261 }
 0x701   : > { %v1264_v60 = vadd.f32 %v1262_v59, %v1254_v58 }
 0x703   : > { %v2448_v61 = vpop.eup %2447  ;;  %v1265_v33 = vsub.f32 %v1264_v60, %v2904_v30 }
 0x704   : > { %v1524_v62 = vmul.f32 %v2448_v61, %v2993_v19  ;;  %v1525_v63 = vmul.f32 %v2448_v61, %v1510_v25  ;;  %v1523_v0 = vmul.f32 %v2448_v61, %v2991_v18 }
 0x706   : > { %v1527_v1 = vpack.c.bf16 %v1524_v62, %v1524_v62  ;;  %v1528_v4 = vpack.c.bf16 %v1525_v63, %v1525_v63  ;;  %v1526_v5 = vpack.c.bf16 %v1523_v0, %v1523_v0 }
 0x708   : > { %1753 = vmatprep.mubr.bf16.mxu1 %v1527_v1  ;;  %2241 = vmatmul.mubr.bf16.vlgmr.msra.gmra.mrb[8].mxu0 %v1528_v4 }
 0x709   : > { %1754 = vmatmul.mubr.bf16.vlgmr.msra.gmra.mrb[16].mxu1 %v1526_v5 }
 0x731   : > { %v3056_v6 = vpop.xlane.xlu1 %1336 }
 0x732   : > { %v1338_v7 = vsub.f32 %v3047_v50, %v3056_v6  ;;  %v1339_v9 = vsub.f32 %v3049_v51, %v3056_v6 }
 0x734   : > { %v1340_v10 = vpack.c.bf16 %v1338_v7, %v1338_v7  ;;  %v1341_v11 = vpack.c.bf16 %v1339_v9, %v1339_v9 }
 0x736   : > { %v1343_v12 = vmul.bf16 1069105081, %v1340_v10  ;;  %v1346_v13 = vmul.bf16 1069105081, %v1341_v11 }
 0x738   : > { %2449 = vpow.bf16 %v1343_v12 }
 0x739   : > { %2451 = vpow.bf16 %v1346_v13  ;;  %v1275_v13 = vld [vmem:[#allocation3] sm:$0x1] }
 0x743   : > { %v2450_v14 = vpop.eup %2449 }
 0x744   : > { %v2452_v15 = vpop.eup %2451  ;;  %v1348_v16 = vunpack.c.l.bf16 %v2450_v14 }
 0x745   : > { %v1349_v18 = vunpack.c.l.bf16 %v2452_v15 }
 0x747   : > { %v1350_v19 = vadd.f32 %v1349_v18, %v1348_v16 }
 0x749   : > { %1351 = vadd.xlane.f32.xlu1 %v1350_v19 }
 0x7d6   : > { %v1352_v53 = vpop.xlane.xlu1 %1351 }
 0x7db   : > { %v1795_v20 = vpop.f32.mrb[8].mxu0 }
 0x7dc   : > { %v2161_v21 = vpop.f32.mrb[16].mxu1  ;;  %v2242_v22 = vpop.f32.mrb[9].mxu0 }
 0x7dd   : > { %v2162_v23 = vpop.f32.mrb[17].mxu1  ;;  %v1798_v24 = vpop.f32.mrb[10].mxu0  ;;  %v1366_v22 = vld [vmem:[#allocation4] sm:$0x1] }
 0x7de   : > { %v2163_v25 = vadd.f32 %v2162_v23, %v2161_v21  ;;  %v2164_v27 = vpop.f32.mrb[18].mxu1  ;;  %v2243_v28 = vpop.f32.mrb[11].mxu0 }
 0x7df   : > { %v2165_v29 = vpop.f32.mrb[19].mxu1  ;;  %v1830_v28 = vld [vmem:[#allocation5] sm:$0x1] }
 0x7e0   : > { %v1796_v31 = vadd.f32 %v2163_v25, %v1795_v20 }
 0x7e2   : > { %v1815_v32 = vsel %vm1216_vm7, %v1796_v31, -inf  ;;  %v1811_v17 = vsel %vm1810_vm8, %v1796_v31, 0.0 }
 0x7e3   : > { %1816 = vmax.xlane.f32.xlu0 %v1815_v32  ;;  %v1812_v52 = vsel %vm1216_vm7, %v1811_v17, 0.0 }
 0x7f9   : > { %1267 = vrot.lane.b32.xlu0 %v1265_v33, %s2563_s0 }
 0x870   : > { %v1817_v34 = vpop.xlane.xlu0 %1816 }
 0x871   : > { %v1818_v35 = vsub.f32 %v1796_v31, %v1817_v34 }
 0x873   : > { %v1819_v36 = vpack.c.bf16 %v1818_v35, %v1818_v35 }
 0x874   : > { %v1268_v41 = vpop.permute.xlu0 %1267 }
 0x875   : > { %v1821_v37 = vmul.bf16 1069105081, %v1819_v36  ;;  %v1270_v30 = vsel %vm1216_vm7, %v1268_v41, 0.0 }
 0x877   : > { %2453 = vpow.bf16 %v1821_v37 }
 0x878   : > { %2455 = vlog2.f32 %v1352_v53 }
 0x882   : > { %v2454_v38 = vpop.eup %2453 }
 0x883   : > { %v1823_v39 = vunpack.c.l.bf16 %v2454_v38  ;;  %v2456_v2 = vpop.eup %2455 }
 0x884   : > { %v1354_v3 = vmul.f32 0.6931472, %v2456_v2 }
 0x885   : > { %v1824_v40 = vsel %vm1216_vm7, %v1823_v39, 0.0 }
 0x886   : > { %1825 = vadd.xlane.f32.xlu1 %v1824_v40  ;;  %v1355_v58 = vadd.f32 %v1354_v3, %v3056_v6 }
 0x88a   : > { %1271 = vadd.xlane.f32.xlu1 %v1270_v30 }
 0x88e   : > { %1359 = vadd.xlane.f32.xlu1 %v1358_v45 }
 0x892   : > { %1364 = vadd.xlane.f32.xlu1 %v1363_v26 }
 0x896   : > { %1813 = vadd.xlane.f32.xlu1 %v1812_v52 }
 0x913   : > { %v1826_v54 = vpop.xlane.xlu1 %1825 }
 0x914   : > { %2457 = vlog2.f32 %v1826_v54 }
 0x917   : > { %v1272_v55 = vpop.xlane.xlu1 %1271 }
 0x918   : > { %v2060_v56 = vadd.f32 -32.0, %v1272_v55 }
 0x91a   : > { %v1274_v50 = vmul.f32 0.5, %v2060_v56 }
 0x91b   : > { %v1360_v57 = vpop.xlane.xlu1 %1359 }
 0x91c   : > { %v1276_v51 = vrot.slane %v1274_v50, 4  ;;  %v1367_v61 = vmul.f32 %v1360_v57, %v1355_v58 }
 0x91e   : > { %v2458_v59 = vpop.eup %2457  ;;  %v1277_v60 = vadd.f32 %v1276_v51, %v1274_v50 }
 0x91f   : > { %v1828_v62 = vmul.f32 0.6931472, %v2458_v59  ;;  %v1365_v63 = vpop.xlane.xlu1 %1364 }
 0x920   : > { %v1278_v0 = vrot.slane %v1277_v60, 2  ;;  %v1368_v1 = vsub.f32 %v1367_v61, %v1365_v63 }
 0x921   : > { %v1829_v4 = vadd.f32 %v1828_v62, %v1817_v34  ;;  %v2564_v34 = vmov (!%p2096_p0), 0  }
 0x922   : > { %v1279_v5 = vadd.f32 %v1278_v0, %v1277_v60  ;;  %v1369_v7 = vrot.slane %v1368_v1, 4  ;;  %2460 = vset.pattern.permute.xlu1 (!%p2096_p0), %v2564_v34  ;;  %2459 = vset.pattern.permute.xlu0 (!%p2096_p0), %v2564_v34 }
 0x923   : > { %v1814_v9 = vpop.xlane.xlu1 %1813 }
 0x924   : > { %v1280_v10 = vrot.slane %v1279_v5, 1  ;;  %v1370_v11 = vadd.f32 %v1369_v7, %v1368_v1  ;;  %v1831_v12 = vsub.f32 %v1829_v4, %v1814_v9 }
 0x926   : > { %v1281_v14 = vadd.f32 %v1280_v10, %v1279_v5  ;;  %v1371_v15 = vrot.slane %v1370_v11, 2  ;;  %v1832_v16 = vrot.slane %v1831_v12, 4 }
 0x928   : > { %v1282_v6 = vadd.f32 %v1281_v14, %v1275_v13  ;;  %v1372_v18 = vadd.f32 %v1371_v15, %v1370_v11  ;;  %v1833_v19 = vadd.f32 %v1832_v16, %v1831_v12 }
 0x92a   : > { %1284 = vst.msk [vmem:[#allocation3] sm:$0x1] %vm1283_vm9, %v1282_v6  ;;  %v1373_v20 = vrot.slane %v1372_v18, 1  ;;  %v1834_v21 = vrot.slane %v1833_v19, 2 }
 0x92c   : > { %v1374_v23 = vadd.f32 %v1373_v20, %v1372_v18  ;;  %v1835_v24 = vadd.f32 %v1834_v21, %v1833_v19 }
 0x92e   : > { %v1375_v25 = vadd.f32 %v1374_v23, %v1366_v22  ;;  %v1836_v27 = vrot.slane %v1835_v24, 1  ;;  %1843 = sbr.rel (%p2096_p0) target bundleno = 2512 (0x9d0), region = 88 }
 0x930   : > { %1376 = vst.msk [vmem:[#allocation4] sm:$0x1] %vm1283_vm9, %v1375_v25  ;;  %v1837_v29 = vadd.f32 %v1836_v27, %v1835_v24 }
 0x931   : > { %v1844_v32 = vld [vmem:[#allocation3] sm:$0x1] (!%p2096_p0) }
 0x932   : > { %v1838_v31 = vadd.f32 %v1837_v29, %v1830_v28  ;;  %v1845_v35 = vmul.f32 (!%p2096_p0), 0.03125, %v1844_v32 }
 0x934   : > { %1839 = vst.msk [vmem:[#allocation5] sm:$0x1] %vm1283_vm9, %v1838_v31  ;;  %v1880_v39 = vrot.slane (!%p2096_p0), %v1845_v35, %v2983_v8 }
 0x936   : > { %1882 = vperm.xlu1 %2460, %v1880_v39  }
 0x937   : > { %v1846_v33 = vld [vmem:[#allocation4] sm:$0x1] }
 0x938   : > { %v1847_v36 = vmul.f32 0.03125, %v1846_v33 }
 0x93a   : > { %v1850_v40 = vadd.f32 %v1847_v36, %v1845_v35  ;;  %v1892_v42 = vrot.slane %v1847_v36, %v2983_v8 }
 0x93b   : > { %v1848_v37 = vld [vmem:[#allocation5] sm:$0x1] }
 0x93c   : > { %v1849_v38 = vmul.f32 0.3125, %v1848_v37  ;;  %1894 = vperm.xlu1 %2460, %v1892_v42   ;;  %v1868_v44 = vrot.slane %v1850_v40, %v2983_v8 }
 0x93e   : > { %v1851_v41 = vadd.f32 %v1850_v40, %v1849_v38  ;;  %v1904_v30 = vrot.slane %v1849_v38, %v2983_v8 }
 0x940   : > { %v1857_v43 = vrot.slane %v1851_v41, %v2983_v8 }
 0x942   : > { %1859 = vperm.xlu0 %2459, %v1857_v43  }
 0x946   : > { %1870 = vperm.xlu0 %2459, %v1868_v44  }
 0x94a   : > { %1906 = vperm.xlu0 %2459, %v1904_v30  }
 0x9b5   : > { %v1883_v45 = vpop.permute.xlu1 %1882 }
 0x9b6   : > { %v1885_v53 = vsel %vm1875_vm12, %v1883_v45, 0.0 }
 0x9bb   : > { %v1895_v17 = vpop.permute.xlu1 %1894 }
 0x9bc   : > { %v1897_v2 = vsel %vm1887_vm13, %v1895_v17, 0.0 }
 0x9c1   : > { %v1860_v47 = vpop.permute.xlu0 %1859 }
 0x9c2   : > { %v1862_v49 = vsel %vm1852_vm10, %v1860_v47, 0.0 }
 0x9c5   : > { %v1871_v48 = vpop.permute.xlu0 %1870 }
 0x9c6   : > { %v1873_v26 = vsel %vm1863_vm11, %v1871_v48, 0.0 }
 0x9c7   : > { %v1874_v52 = vadd.f32 %v1873_v26, %v1862_v49 }
 0x9c9   : > { %v1886_v54 = vadd.f32 %v1885_v53, %v1874_v52  ;;  %v1907_v8 = vpop.permute.xlu0 %1906 }
 0x9ca   : > { %v1909_v3 = vsel %vm1899_vm14, %v1907_v8, 0.0 }
 0x9cb   : > { %v1898_v55 = vadd.f32 %v1897_v2, %v1886_v54 }
 0x9cd   : > { %v1910_v56 = vadd.f32 %v1909_v3, %v1898_v55 }
 0x9cf   : > { %1911 = vst [vmem:[%s3189_s21] sm:$0xff] %v1910_v56 }
 0x9d0 PF: > { %s2098_s25 = sshll.u32 %s2543_s22, 7  ;;  %s3190_s29 = scalar_lea.vmem [#allocation6], %s2719_s18 }
 0x9d1   : > { %s3098_s23 = scalar_lea.hbm %s3164_s15, %s2098_s25  ;;  %s1926_s28 = sshll.u32 %s3190_s29, 4  ;;  %s1927_s28 = int_to_ptr.vmem [resolvable:$true] %s1926_s28 }
 0x9d2   : > { %s3191_s11 = sand.u32 1, %s2531_s19   ;;  %s2461_s17 = scalar_lea.vmem %s1927_s28, 128 }
 0x9d3   : > { %s1913_s24 = scalar_lea.sflag [#allocation7], %s3191_s11  ;;  %p2462_p1 = scmp.ne.s32.totalorder %s1927_s28, %s2461_s17 }
 0x9d4   : > { %s2565_s20 = smov [#allocation6]  }
 0x9d5   : > { %p2463_p2 = pnand %p2462_p1, %p2695_p3  ;;  %s2465_s0 = sshll.u32 %s2565_s20, 4  ;;  %s2466_s0 = int_to_ptr.vmem [resolvable:$false] %s2465_s0 }
 0x9d6   : > { %s2467_s26 = scalar_lea.vmem %s2466_s0, 256  ;;  %p2468_p5 = scmp.lt.s32.totalorder %s1927_s28, %s2466_s0 }
 0x9d7   : > { %p2464_p4 = pneg %p2463_p2  ;;  %p2469_p6 = scmp.lt.s32.totalorder %s2467_s26, %s2461_s17 }
 0x9d9   : > { %p2470_p7 = por %p2469_p6, %p2468_p5 }
 0x9db   : > { %p2471_p8 = pnand %p2470_p7, %p2464_p4 }
 0x9dd   : > { %2474 = shalt.err (!%p2471_p8)
}
 0x9de   : > { %s2475_s18 = scalar_lea.hbm %s3098_s23, 128  ;;  %s2479_s25 = scalar_lea.hbm %s3164_s15, 256 }
 0x9df   : > { %p2476_p10 = scmp.ne.s32.totalorder %s3098_s23, %s2475_s18  ;;  %p2480_p13 = scmp.lt.u32.totalorder %s3098_s23, %s3164_s15 }
 0x9e0   : > { %p2481_p0 = scmp.lt.u32.totalorder %s2479_s25, %s2475_s18  ;;  %p2483_p2 = scmp.lt.u32.totalorder %s2475_s18, %s3098_s23 }
 0x9e1   : > { %p2477_p11 = pnand %p2476_p10, %p2695_p3 }
 0x9e2   : > { %p2482_p1 = por %p2481_p0, %p2480_p13 }
 0x9e3   : > { %p2478_p12 = pneg %p2477_p11 }
 0x9e4   : > { %p2484_p4 = por %p2483_p2, %p2482_p1 }
 0x9e6   : > { %p2485_p5 = pnand %p2484_p4, %p2478_p12 }
 0x9e8   : > { %2488 = shalt.err (!%p2485_p5)
}
 0x9e9   : > { %2252 = dma.vmem_to_hbm [thread:$0]  (%p2695_p3), %s1927_s28, 128, %s3098_s23, %s1913_s24  }
 0x9ea PF: > { %s3192_s29 = sld [smem:[#allocation13_spill]]  ;;  %s3193_s11 = sld [smem:[#allocation9_spill]] }
 0x9f0   : > { %p2258_p6 = scmp.ge.s32.totalorder %s3192_s29, 2  ;;  %s1938_s20 = sand.u32 1, %s3193_s11  }
 0x9f1   : > { %s1939_s0 = scalar_lea.sflag [#allocation7], %s1938_s20 }
 0x9f2   : > { %p2255_p7 = pnand %p2258_p6, %p2705_p9 }
 0x9f4   : > { %2522 = dma.done.wait (!%p2255_p7), %s1939_s0, 128  }
 0x9f5   : > { %2524 = vsyncadd (!%p2255_p7), %s1939_s0, 4294967168  ;;  %s28_s25 = sadd.s32 1, %s3192_s29   ;;  %s3195_s26 = sld [smem:[#allocation10_spill]] }
 0x9f6   : > { %p25_p8 = scmp.ge.s32.totalorder %s28_s25, 6   ;;  %s3196_s20 = sld [smem:[#allocation17_spill]] }
 0x9f7   : > { %s3197_s21 = sld [smem:[#allocation11_spill]]  ;;  %s3198_s22 = sld [smem:[#allocation12_spill]] }
 0x9f8   : > { %s3199_s23 = sld [smem:[#allocation14_spill]]  ;;  %s3200_s24 = sld [smem:[#allocation15_spill]] }
 0x9f9   : > { %s3201_s18 = smov %s2531_s19  ;;  %27 = sbr.rel (!%p25_p8) target bundleno = 8 (0x8), region = 123 }
 0x9fb   : > { %s3202_s19 = smov %s3195_s26 }
 0xa00   :  { %1944 = vsyncpa [#allocation7], 1 }
 0xa01   :  { %1946 = vsyncpa [#allocation7 + $0x1], 1 }

// kernel: tpu_custom_call.1
= control target key start
LH: loop header
LB: loop body
LE: loop exit
PB: predicated region body
PF: predicated region fallthrough
CT: control target
= control target key end

     0   :  { %s3149_s0 = inlined_call_operand.vmem [shape: bf16[32,256], index: 0, kind: input, shape index: {}]   ;;  %s3150_s1 = inlined_call_operand.vmem [shape: bf16[384,32], index: 1, kind: input, shape index: {}]   ;;  %s3151_s2 = inlined_call_operand.vmem [shape: bf16[256,128], index: 2, kind: input, shape index: {}]   ;;  %s3152_s3 = inlined_call_operand.vmem [shape: f32[1,128], index: 3, kind: input, shape index: {}]   ;;  %s3153_s4 = inlined_call_operand.vmem [shape: bf16[128,128], index: 4, kind: input, shape index: {}]   ;;  %s3154_s5 = inlined_call_operand.vmem [shape: f32[1,128], index: 5, kind: input, shape index: {}]   ;;  %s3155_s6 = inlined_call_operand.vmem [shape: bf16[128,64], index: 6, kind: input, shape index: {}]   ;;  %s3156_s7 = inlined_call_operand.vmem [shape: f32[1,64], index: 7, kind: input, shape index: {}]   ;;  %s3157_s8 = inlined_call_operand.vmem [shape: f32[1,32], index: 8, kind: input, shape index: {}]   ;;  %s3158_s9 = inlined_call_operand.vmem [shape: f32[1,32], index: 9, kind: input, shape index: {}]   ;;  %s3159_s10 = inlined_call_operand.vmem [shape: f32[1,32], index: 10, kind: input, shape index: {}]   ;;  %s3160_s11 = inlined_call_operand.vmem [shape: bf16[32,64], index: 11, kind: input, shape index: {}]   ;;  %s3161_s12 = inlined_call_operand.vmem [shape: bf16[64,256], index: 12, kind: input, shape index: {}]   ;;  %s3162_s13 = inlined_call_operand.vmem [shape: bf16[32,384], index: 13, kind: input, shape index: {}]   ;;  %s3163_s14 = inlined_call_operand.vmem [shape: f32[1,384], index: 14, kind: input, shape index: {}]   ;;  %s3164_s15 = inlined_call_operand.hbm [shape: f32[2,8,128], index: 15, kind: output, shape index: {}]  }
   0x1   :  { %3174 = sst [smem:[#allocation18_spill]] %s3149_s0 }
   0x2   :  { %3175 = sst [smem:[#allocation19_spill]] %s3160_s11 }
   0x3   :  { %20 = vsyncpa [#allocation7], 0 }
   0x4   :  { %22 = vsyncpa [#allocation7 + $0x1], 0  ;;  %s2646_s18 = smov 0   ;;  %s2648_s19 = smov 0  }
   0x5   :  { %s2650_s20 = smov 0   ;;  %s2652_s21 = smov 0  }
   0x6   :  { %s2654_s22 = smov 0   ;;  %s2656_s23 = smov 0  }
   0x7   :  { %s2658_s24 = smov 0   ;;  %s2660_s25 = smov 0  }
   0x8 LB: > { %3176 = sst [smem:[#allocation9_spill]] %s2527_s18  ;;  %s1996_s26 = sadd.s32 4294967295, %s2555_s25   ;;  %s2555_s25 = sphi %s2660_s25, %s28_s25   ;;  %s2551_s24 = sphi %s2658_s24, %s3200_s24   ;;  %s2547_s23 = sphi %s2656_s23, %s3199_s23   ;;  %s2543_s22 = sphi %s2654_s22, %s3198_s22   ;;  %s2539_s21 = sphi %s2652_s21, %s3197_s21   ;;  %s2535_s20 = sphi %s2650_s20, %s3196_s20   ;;  %s2531_s19 = sphi %s2648_s19, %s3202_s19   ;;  %s2527_s18 = sphi %s2646_s18, %s3201_s18  }
   0x9   : > { %3177 = sst [smem:[#allocation10_spill]] %s2535_s20  ;;  %s1997_s27 = sadd.s32 4294967294, %s2555_s25  }
   0xa   : > { %3178 = sst [smem:[#allocation11_spill]] %s2547_s23  ;;  %s37_s28 = sadd.s32 1, %s2547_s23 }
   0xb   : > { %3179 = sst [smem:[#allocation12_spill]] %s2551_s24  ;;  %p38_p0 = scmp.ge.s32.totalorder %s37_s28, 2 }
   0xc   : > { %3180 = sst [smem:[#allocation13_spill]] %s2555_s25  ;;  %s40_s29 = sadd.s32 1, %s2551_s24 }
   0xd   : > { %p381_p1 = scmp.ne.s32.totalorder %s2535_s20, %s2531_s19  ;;  %p382_p2 = scmp.eq.s32.totalorder %s1996_s26, 3 }
   0xe   : > { %s3204_s28 = smov (%p38_p0, %s37_s28), 0  ;;  %s3206_s29 = smov (!%p38_p0, %s40_s29), %s2551_s24 }
   0xf   : > { %3181 = sst [smem:[#allocation14_spill]] %s3204_s28  ;;  %p2695_p3 = por %p382_p2, %p381_p1 }
  0x10   : > { %p387_p4 = scmp.ne.s32.totalorder %s2531_s19, %s2527_s18  ;;  %p42_p5 = scmp.ge.s32.totalorder %s3206_s29, 2 }
  0x11   : > { %p388_p6 = scmp.eq.s32.totalorder %s1997_s27, 3  ;;  %p2002_p7 = scmp.ge.s32.totalorder %s2555_s25, 1 }
  0x12   : > { %p460_p8 = scmp.lt.s32.totalorder %s2555_s25, 5  ;;  %s3208_s29 = smov (%p42_p5, %s3206_s29), 0 }
  0x13   : > { %3183 = sst [smem:[#allocation15_spill]] %s3208_s29  ;;  %p2705_p9 = por %p388_p6, %p387_p4 }
  0x14   : > { %p461_p10 = pnand %p2002_p7, %p460_p8  ;;  %s368_s17 = ssub.s32 %s2551_s24, %s3208_s29 }
  0x15   : > { %s3184_s16 = scalar_select %p2705_p9, 1, 0 }
  0x16   : > { %s371_s26 = sadd.s32 1, %s2535_s20  ;;  %p369_p11 = scmp.eq.s32.totalorder %s368_s17, 0 }
  0x17   : > { %3185 = sst [smem:[#allocation16_spill]] %s3184_s16  ;;  %464 = sbr.rel (%p461_p10) target bundleno = 2538 (0x9ea), region = 80 }
  0x18   : > { %s2713_s28 = scalar_select %p369_p11, %s2535_s20, %s371_s26  }
  0x19   : > { %s3172_s27 = sand.u32 (!%p461_p10), 1, %s2531_s19   ;;  %s2004_s23 = sshll.u32 (!%p461_p10), %s2543_s22, 1 }
  0x1a   : > { %3186 = sst [smem:[#allocation17_spill]] %s2713_s28  ;;  %s2719_s18 = sshll.u32 (!%p461_p10), %s3172_s27, 3 }
  0x1b   : > { %s2722_s25 = sadd.s32 (!%p461_p10), %s2539_s21, %s2004_s23  ;;  %s3187_s0 = sld [smem:[#allocation18_spill]] (!%p461_p10) }
  0x1c   : > { %p512_p12 = scmp.lt.s32.totalorder (!%p461_p10), %s2722_s25, 3  ;;  %p2007_p13 = scmp.ne.s32.totalorder (!%p461_p10), %s2539_s21, 0 }
  0x1e   : > { %s513_s29 = scalar_select %p512_p12, %s2722_s25, 3 }
  0x1f   : > { %523 = sbr.rel (%p2007_p13) target bundleno = 337 (0x151), region = 84  ;;  %vm524_vm0 = vcmask (!%p2007_p13), 0   ;;  %v2331_v0 = vld [vmem:[%s3161_s12 + $0x4] ss:$8 sps:$4 sm:$0xff] (!%p2007_p13)   ;;  %v2557_v1 = vmov (!%p2007_p13), 0.0   ;;  %v2558_v6 = vmov (!%p2007_p13), 0  }
  0x20   : > { %s2101_s17 = sshll.u32 %s513_s29, 3  ;;  %525 = vst.msk [vmem:[#allocation3] sm:$0x1] (!%p2007_p13), %vm524_vm0, %v2557_v1  ;;  %526 = vst.msk [vmem:[#allocation4] sm:$0x1] (!%p2007_p13), %vm524_vm0, %v2557_v1  ;;  %617 = vmatprep.subr.bf16.mxu0 (!%p2007_p13), %v2331_v0  ;;  %2244 = vmatprep.subr.bf16.mxu1 (!%p2007_p13), %v2331_v0  ;;  %s3188_s11 = sld [smem:[#allocation19_spill]] (!%p2007_p13) }
  0x21   : > { %s2729_s28 = scalar_lea.vmem %s3187_s0, %s2101_s17  ;;  %527 = vst.msk [vmem:[#allocation5] sm:$0x1] (!%p2007_p13), %vm524_vm0, %v2557_v1  ;;  %v2333_v2 = vld [vmem:[%s3161_s12] ss:$8 sps:$4 sm:$0xff] (!%p2007_p13)   ;;  %v2334_v3 = vld [vmem:[%s3161_s12 + $0x14] ss:$8 sps:$4 sm:$0xff] (!%p2007_p13)   ;;  %649 = vmatprep.mubr.bf16.mxu0 (!%p2007_p13), %v2558_v6  ;;  %659 = vmatprep.mubr.bf16.mxu1 (!%p2007_p13), %v2558_v6 }
  0x22   : > { %618 = vmatpush1.bf16.msra.mxu0 (!%p2007_p13), %v2333_v2  ;;  %2248 = vmatpush1.bf16.msra.mxu1 (!%p2007_p13), %v2333_v2  ;;  %v2336_v4 = vld [vmem:[%s3161_s12 + $0x10] ss:$8 sps:$4 sm:$0xff] (!%p2007_p13)   ;;  %v2337_v5 = vld [vmem:[%s3161_s12 + $0x24] ss:$8 sps:$4 sm:$0xff] (!%p2007_p13)   ;;  %v2339_v11 = vld [vmem:[%s3161_s12 + $0x20] ss:$8 sps:$4 sm:$0xff] (!%p2007_p13)  }
  0x23   : > { %619 = vmatprep.subr.bf16.mxu0 (!%p2007_p13), %v2334_v3  ;;  %2245 = vmatprep.subr.bf16.mxu1 (!%p2007_p13), %v2334_v3  ;;  %v2340_v14 = vld [vmem:[%s3161_s12 + $0x34] ss:$8 sps:$4 sm:$0xff] (!%p2007_p13)   ;;  %vm540_vm1 = vcmask (!%p2007_p13), 523264   ;;  %v2342_v21 = vld [vmem:[%s3161_s12 + $0x30] ss:$8 sps:$4 sm:$0xff] (!%p2007_p13)  }
  0x26   : > { %v528_v7 = vld [vmem:[%s3188_s11] sm:$0xff]   ;;  %v530_v8 = vld [vmem:[%s3188_s11 + $0x8] sm:$0xff]   ;;  %620 = vmatpush1.bf16.msra.mxu0 %v2336_v4  ;;  %2249 = vmatpush1.bf16.msra.mxu1 %v2336_v4 }
  0x27   : > { %v534_v9 = vunpack.c.l.bf16 %v530_v8  ;;  %v532_v10 = vunpack.c.l.bf16 %v528_v7  ;;  %v535_v12 = vunpack.c.h.bf16 %v530_v8  ;;  %v533_v13 = vunpack.c.h.bf16 %v528_v7  ;;  %621 = vmatprep.subr.bf16.mxu0 %v2337_v5  ;;  %2246 = vmatprep.subr.bf16.mxu1 %v2337_v5 }
  0x29   : > { %v538_v15 = vmul.f32 %v534_v9, %v534_v9  ;;  %v536_v16 = vmul.f32 %v532_v10, %v532_v10  ;;  %v539_v19 = vmul.f32 %v535_v12, %v535_v12  ;;  %v537_v20 = vmul.f32 %v533_v13, %v533_v13 }
  0x2a   : > { %622 = vmatpush1.bf16.msra.mxu0 %v2339_v11  ;;  %2250 = vmatpush1.bf16.msra.mxu1 %v2339_v11 }
  0x2b   : > { %v547_v17 = vsel %vm540_vm1, %v538_v15, 0.0  ;;  %v541_v18 = vsel %vm540_vm1, %v536_v16, 0.0  ;;  %623 = vmatprep.subr.bf16.mxu0 %v2340_v14  ;;  %2247 = vmatprep.subr.bf16.mxu1 %v2340_v14  ;;  %v550_v22 = vsel %vm540_vm1, %v539_v19, 0.0  ;;  %v544_v23 = vsel %vm540_vm1, %v537_v20, 0.0 }
  0x2c   : > { %548 = vadd.xlane.f32.xlu1 %v547_v17  ;;  %542 = vadd.xlane.f32.xlu0 %v541_v18 }
  0x2e   : > { %624 = vmatpush1.bf16.msra.mxu0 %v2342_v21  ;;  %2251 = vmatpush1.bf16.msra.mxu1 %v2342_v21 }
  0x30   : > { %551 = vadd.xlane.f32.xlu1 %v550_v22  ;;  %545 = vadd.xlane.f32.xlu0 %v544_v23 }
  0x31   : > { %2018 = vmatmul.mubr.msk.bf16.vlgmr.msra.gmra.mrb[0].mxu0 %vm540_vm1, %v528_v7  ;;  %2019 = vmatmul.mubr.msk.bf16.vlgmr.msra.gmra.mrb[0].mxu1 %vm540_vm1, %v530_v8 }
  0xb9   : > { %v549_v24 = vpop.xlane.xlu1 %548  ;;  %v543_v25 = vpop.xlane.xlu0 %542 }
  0xbd   : > { %v552_v26 = vpop.xlane.xlu1 %551  ;;  %v546_v27 = vpop.xlane.xlu0 %545 }
 0x104   : > { %v661_v28 = vpop.f32.mrb[0].mxu1  ;;  %v651_v29 = vpop.f32.mrb[0].mxu0 }
 0x105   : > { %v674_v30 = vmul.f32 2.0, %v661_v28  ;;  %v670_v31 = vmul.f32 2.0, %v651_v29  ;;  %v653_v32 = vpop.f32.mrb[1].mxu0  ;;  %v663_v33 = vpop.f32.mrb[1].mxu1 }
 0x106   : > { %v671_v34 = vmul.f32 2.0, %v653_v32  ;;  %v675_v35 = vmul.f32 2.0, %v663_v33  ;;  %v655_v36 = vpop.f32.mrb[2].mxu0  ;;  %v665_v37 = vpop.f32.mrb[2].mxu1 }
 0x107   : > { %v682_v38 = vsub.f32 %v674_v30, %v549_v24  ;;  %v678_v39 = vsub.f32 %v670_v31, %v543_v25  ;;  %v672_v40 = vmul.f32 2.0, %v655_v36  ;;  %v676_v41 = vmul.f32 2.0, %v665_v37  ;;  %v657_v42 = vpop.f32.mrb[3].mxu0  ;;  %v667_v43 = vpop.f32.mrb[3].mxu1 }
 0x108   : > { %v679_v44 = vsub.f32 %v671_v34, %v543_v25  ;;  %v683_v45 = vsub.f32 %v675_v35, %v549_v24  ;;  %v673_v46 = vmul.f32 2.0, %v657_v42  ;;  %v677_v47 = vmul.f32 2.0, %v667_v43 }
 0x109   : > { %v690_v48 = vmul.f32 5.0, %v682_v38  ;;  %v686_v49 = vmul.f32 5.0, %v678_v39  ;;  %v684_v50 = vsub.f32 %v676_v41, %v552_v26  ;;  %v680_v51 = vsub.f32 %v672_v40, %v546_v27 }
 0x10a   : > { %v687_v52 = vmul.f32 5.0, %v679_v44  ;;  %v691_v53 = vmul.f32 5.0, %v683_v45  ;;  %v685_v54 = vsub.f32 %v677_v47, %v552_v26  ;;  %v681_v55 = vsub.f32 %v673_v46, %v546_v27 }
 0x10b   : > { %v694_v56 = vmax.f32 %v686_v49, %v690_v48  ;;  %v692_v57 = vmul.f32 5.0, %v684_v50  ;;  %v688_v58 = vmul.f32 5.0, %v680_v51 }
 0x10c   : > { %v703_v59 = vmax.f32 %v687_v52, %v691_v53  ;;  %v693_v60 = vmul.f32 5.0, %v685_v54  ;;  %v689_v61 = vmul.f32 5.0, %v681_v55 }
 0x10d   : > { %v695_v62 = vmax.f32 %v688_v58, %v692_v57 }
 0x10e   : > { %v704_v63 = vmax.f32 %v689_v61, %v693_v60 }
 0x10f   : > { %v696_v0 = vmax.f32 %v694_v56, %v695_v62 }
 0x110   : > { %v705_v1 = vmax.f32 %v703_v59, %v704_v63 }
 0x111   : > { %v697_v2 = vrot.slane %v696_v0, 4 }
 0x112   : > { %v706_v3 = vrot.slane %v705_v1, 4 }
 0x113   : > { %v698_v4 = vmax.f32 %v696_v0, %v697_v2 }
 0x114   : > { %v707_v5 = vmax.f32 %v705_v1, %v706_v3 }
 0x115   : > { %v699_v6 = vrot.slane %v698_v4, 2 }
 0x116   : > { %v708_v7 = vrot.slane %v707_v5, 2 }
 0x117   : > { %v700_v8 = vmax.f32 %v698_v4, %v699_v6 }
 0x118   : > { %v709_v9 = vmax.f32 %v707_v5, %v708_v7 }
 0x119   : > { %v701_v10 = vrot.slane %v700_v8, 1 }
 0x11a   : > { %v710_v11 = vrot.slane %v709_v9, 1 }
 0x11b   : > { %v702_v12 = vmax.f32 %v700_v8, %v701_v10 }
 0x11c   : > { %v711_v13 = vmax.f32 %v709_v9, %v710_v11 }
 0x11d   : > { %v712_v14 = vsub.f32 %v686_v49, %v702_v12  ;;  %v714_v15 = vsub.f32 %v688_v58, %v702_v12  ;;  %v716_v16 = vsub.f32 %v690_v48, %v702_v12  ;;  %v718_v17 = vsub.f32 %v692_v57, %v702_v12 }
 0x11e   : > { %v713_v18 = vsub.f32 %v687_v52, %v711_v13  ;;  %v715_v19 = vsub.f32 %v689_v61, %v711_v13  ;;  %v717_v20 = vsub.f32 %v691_v53, %v711_v13  ;;  %v719_v21 = vsub.f32 %v693_v60, %v711_v13 }
 0x11f   : > { %v720_v22 = vmul.f32 1.442695, %v712_v14  ;;  %v724_v23 = vmul.f32 1.442695, %v714_v15  ;;  %v728_v26 = vmul.f32 1.442695, %v716_v16 }
 0x120   : > { %v722_v24 = vmul.f32 1.442695, %v713_v18  ;;  %v726_v25 = vmul.f32 1.442695, %v715_v19  ;;  %v730_v27 = vmul.f32 1.442695, %v717_v20 }
 0x121   : > { %2347 = vpow2.f32 %v720_v22  ;;  %v732_v28 = vmul.f32 1.442695, %v718_v17  ;;  %v734_v29 = vmul.f32 1.442695, %v719_v21 }
 0x122   : > { %2349 = vpow2.f32 %v722_v24 }
 0x123   : > { %2351 = vpow2.f32 %v724_v23 }
 0x124   : > { %2353 = vpow2.f32 %v726_v25 }
 0x125   : > { %2355 = vpow2.f32 %v728_v26 }
 0x126   : > { %2357 = vpow2.f32 %v730_v27 }
 0x127   : > { %2359 = vpow2.f32 %v732_v28 }
 0x128   : > { %2361 = vpow2.f32 %v734_v29 }
 0x12b   : > { %v2348_v30 = vpop.eup %2347 }
 0x12c   : > { %v2350_v31 = vpop.eup %2349 }
 0x12d   : > { %v2352_v32 = vpop.eup %2351 }
 0x12e   : > { %v2354_v33 = vpop.eup %2353  ;;  %v736_v34 = vadd.f32 %v2352_v32, %v2348_v30 }
 0x12f   : > { %v2356_v35 = vpop.eup %2355  ;;  %v745_v36 = vadd.f32 %v2354_v33, %v2350_v31 }
 0x130   : > { %v2358_v37 = vpop.eup %2357  ;;  %v737_v38 = vadd.f32 %v2356_v35, %v736_v34 }
 0x131   : > { %v2360_v39 = vpop.eup %2359  ;;  %v746_v40 = vadd.f32 %v2358_v37, %v745_v36 }
 0x132   : > { %v2362_v41 = vpop.eup %2361  ;;  %v738_v42 = vadd.f32 %v2360_v39, %v737_v38 }
 0x133   : > { %v747_v43 = vadd.f32 %v2362_v41, %v746_v40 }
 0x134   : > { %v739_v44 = vrot.slane %v738_v42, 4 }
 0x135   : > { %v748_v45 = vrot.slane %v747_v43, 4 }
 0x136   : > { %v740_v46 = vadd.f32 %v739_v44, %v738_v42 }
 0x137   : > { %v749_v47 = vadd.f32 %v748_v45, %v747_v43 }
 0x138   : > { %v741_v48 = vrot.slane %v740_v46, 2 }
 0x139   : > { %v750_v49 = vrot.slane %v749_v47, 2 }
 0x13a   : > { %v742_v50 = vadd.f32 %v741_v48, %v740_v46 }
 0x13b   : > { %v751_v51 = vadd.f32 %v750_v49, %v749_v47 }
 0x13c   : > { %v743_v52 = vrot.slane %v742_v50, 1 }
 0x13d   : > { %v752_v53 = vrot.slane %v751_v51, 1 }
 0x13e   : > { %v744_v54 = vadd.f32 %v743_v52, %v742_v50 }
 0x13f   : > { %v753_v55 = vadd.f32 %v752_v53, %v751_v51 }
 0x140   : > { %2363 = vrcp.f32 %v744_v54 }
 0x141   : > { %2365 = vrcp.f32 %v753_v55 }
 0x14a   : > { %v2364_v56 = vpop.eup %2363 }
 0x14b   : > { %v2366_v57 = vpop.eup %2365  ;;  %v755_v58 = vmul.f32 %v2364_v56, %v2348_v30  ;;  %v758_v59 = vmul.f32 %v2364_v56, %v2352_v32  ;;  %v760_v60 = vmul.f32 %v2364_v56, %v2356_v35  ;;  %v762_v61 = vmul.f32 %v2364_v56, %v2360_v39 }
 0x14c   : > { %v757_v62 = vmul.f32 %v2366_v57, %v2350_v31  ;;  %v759_v63 = vmul.f32 %v2366_v57, %v2354_v33  ;;  %v761_v0 = vmul.f32 %v2366_v57, %v2358_v37  ;;  %v763_v1 = vmul.f32 %v2366_v57, %v2362_v41 }
 0x14d   : > { %v764_v2 = vpack.c.bf16 %v758_v59, %v755_v58  ;;  %v766_v3 = vpack.c.bf16 %v762_v61, %v760_v60 }
 0x14e   : > { %v765_v4 = vpack.c.bf16 %v759_v63, %v757_v62  ;;  %v767_v5 = vpack.c.bf16 %v763_v1, %v761_v0 }
 0x14f   : > { %768 = vst [vmem:[#allocation2] sm:$0xff] %v764_v2  ;;  %770 = vst [vmem:[#allocation2 + $0x10] sm:$0xff] %v766_v3 }
 0x150   : > { %769 = vst [vmem:[#allocation2 + $0x8] sm:$0xff] %v765_v4  ;;  %771 = vst [vmem:[#allocation2 + $0x18] sm:$0xff] %v767_v5 }
 0x151 PF: > { %v2367_v6 = vld [vmem:[%s3151_s2 + $0x40] sm:$0xff]   ;;  %v2369_v8 = vld [vmem:[%s3151_s2 + $0x48] sm:$0xff]   ;;  %v2371_v10 = vld [vmem:[%s3151_s2 + $0x50] sm:$0xff]   ;;  %v2559_v26 = vmov 0.0   ;;  %vm2560_vm2 = vmmov 0   ;;  %vm1216_vm7 = vcmask 261120  }
 0x152   : > { %v2368_v7 = vld [vmem:[%s3151_s2] sm:$0xff]   ;;  %2102 = vmatprep.subr.bf16.mxu0 %v2367_v6  ;;  %v2370_v9 = vld [vmem:[%s3151_s2 + $0x8] sm:$0xff]   ;;  %v2372_v11 = vld [vmem:[%s3151_s2 + $0x10] sm:$0xff]   ;;  %2176 = vmatprep.subr.bf16.mxu1 %v2559_v26  ;;  %s2562_s0 = smov 32   ;;  %s2095_s26 = sshll.u32 %s2722_s25, 3  ;;  %vm1283_vm9 = vcmask 0  }
 0x153   : > { %2103 = vmatpush3.bf16.msra.mxu0 %v2368_v7  ;;  %v2373_v12 = vld [vmem:[%s3151_s2 + $0x58] sm:$0xff]   ;;  %v2375_v14 = vld [vmem:[%s3151_s2 + $0x60] sm:$0xff]   ;;  %v2377_v16 = vld [vmem:[%s3151_s2 + $0x68] sm:$0xff]   ;;  %2192 = vmatprep.mubr.msk.bf16.mxu1 %vm2560_vm2, %v2559_v26  ;;  %p2096_p0 = scmp.ne.s32.totalorder %s2539_s21, 1 }
 0x154   : > { %2104 = vmatprep.subr.bf16.mxu0 %v2369_v8  ;;  %v2374_v13 = vld [vmem:[%s3151_s2 + $0x18] sm:$0xff]   ;;  %v2376_v15 = vld [vmem:[%s3151_s2 + $0x20] sm:$0xff]   ;;  %v2378_v18 = vld [vmem:[%s3151_s2 + $0x28] sm:$0xff]   ;;  %s3189_s21 = scalar_lea.vmem (!%p2096_p0), [#allocation6], %s2719_s18 }
 0x155   : > { %v2803_v17 = vld [vmem:[%s2729_s28] sm:$0xff]  ;;  %v2379_v20 = vld [vmem:[%s3151_s2 + $0x70] sm:$0xff]   ;;  %v2381_v22 = vld [vmem:[%s3151_s2 + $0x78] sm:$0xff]  }
 0x156   : > { %v2022_v19 = vcombine.high %v2803_v17, %v2803_v17  ;;  %v2380_v21 = vld [vmem:[%s3151_s2 + $0x30] sm:$0xff]   ;;  %v2382_v23 = vld [vmem:[%s3151_s2 + $0x38] sm:$0xff]   ;;  %v2021_v24 = vcombine.low %v2803_v17, %v2803_v17  ;;  %v2385_v25 = vld [vmem:[%s3153_s4] sm:$0xff]  }
 0x157   : > { %2105 = vmatpush3.bf16.msra.mxu0 %v2370_v9  ;;  %2177 = vmatpush3.bf16.msra.mxu1 %v2385_v25  ;;  %v2386_v27 = vld [vmem:[%s3153_s4 + $0x8] sm:$0xff]   ;;  %v2387_v28 = vld [vmem:[%s3153_s4 + $0x10] sm:$0xff]   ;;  %v2388_v29 = vld [vmem:[%s3153_s4 + $0x18] sm:$0xff]  }
 0x158   : > { %2106 = vmatprep.subr.bf16.mxu0 %v2371_v10  ;;  %947 = vmatprep.mubr.bf16.mxu0 %v2022_v19  ;;  %v2389_v30 = vld [vmem:[%s3153_s4 + $0x20] sm:$0xff]   ;;  %v2390_v31 = vld [vmem:[%s3153_s4 + $0x28] sm:$0xff]   ;;  %v2391_v32 = vld [vmem:[%s3153_s4 + $0x30] sm:$0xff]  }
 0x159   : > { %2178 = vmatprep.subr.bf16.mxu1 %v2559_v26  ;;  %v2392_v33 = vld [vmem:[%s3153_s4 + $0x38] sm:$0xff]   ;;  %v2020_v35 = vld [vmem:[%s3152_s3] ss:$0 sm:$0xff]  ;;  %v2394_v58 = vld [vmem:[%s3155_s6 + $0x8] sm:$0xff]  }
 0x15a   : > { %v2393_v57 = vld [vmem:[%s3155_s6] sm:$0xff]   ;;  %v2395_v59 = vld [vmem:[%s3155_s6 + $0x10] sm:$0xff]   ;;  %v2396_v60 = vld [vmem:[%s3155_s6 + $0x18] sm:$0xff]  }
 0x15b   : > { %2107 = vmatpush3.bf16.msra.mxu0 %v2372_v11  ;;  %2179 = vmatpush3.bf16.msra.mxu1 %v2386_v27  ;;  %v2397_v61 = vld [vmem:[%s3155_s6 + $0x20] sm:$0xff]   ;;  %v2398_v62 = vld [vmem:[%s3155_s6 + $0x28] sm:$0xff]   ;;  %v2399_v63 = vld [vmem:[%s3155_s6 + $0x30] sm:$0xff]  }
 0x15c   : > { %2108 = vmatprep.subr.bf16.mxu0 %v2373_v12  ;;  %2180 = vmatprep.subr.bf16.mxu1 %v2559_v26  ;;  %v2400_v0 = vld [vmem:[%s3155_s6 + $0x38] sm:$0xff]   ;;  %v2039_v1 = vld [vmem:[%s3154_s5] ss:$0 sm:$0xff] }
 0x15f   : > { %2109 = vmatpush3.bf16.msra.mxu0 %v2374_v13  ;;  %2181 = vmatpush3.bf16.msra.mxu1 %v2387_v28 }
 0x160   : > { %2110 = vmatprep.subr.bf16.mxu0 %v2375_v14  ;;  %2182 = vmatprep.subr.bf16.mxu1 %v2559_v26 }
 0x163   : > { %2111 = vmatpush3.bf16.msra.mxu0 %v2376_v15  ;;  %2183 = vmatpush3.bf16.msra.mxu1 %v2388_v29 }
 0x164   : > { %2112 = vmatprep.subr.bf16.mxu0 %v2377_v16  ;;  %2184 = vmatprep.subr.bf16.mxu1 %v2559_v26 }
 0x167   : > { %2113 = vmatpush3.bf16.msra.mxu0 %v2378_v18  ;;  %2185 = vmatpush3.bf16.msra.mxu1 %v2389_v30 }
 0x168   : > { %2114 = vmatprep.subr.bf16.mxu0 %v2379_v20  ;;  %2186 = vmatprep.subr.bf16.mxu1 %v2559_v26 }
 0x16b   : > { %2115 = vmatpush3.bf16.msra.mxu0 %v2380_v21  ;;  %2187 = vmatpush3.bf16.msra.mxu1 %v2390_v31 }
 0x16c   : > { %2116 = vmatprep.subr.bf16.mxu0 %v2381_v22  ;;  %2188 = vmatprep.subr.bf16.mxu1 %v2559_v26 }
 0x16f   : > { %2117 = vmatpush3.bf16.msra.mxu0 %v2382_v23  ;;  %2189 = vmatpush3.bf16.msra.mxu1 %v2391_v32 }
 0x170   : > { %2196 = vmatprep.subr.bf16.mxu0 %v2559_v26  ;;  %2190 = vmatprep.subr.bf16.mxu1 %v2559_v26 }
 0x172   : > { %948 = vmatmul.mubr.bf16.vlgmr.msra.gmra.mrb[0].mxu0 %v2021_v24  ;;  %v2048_v24 = vld [vmem:[%s3156_s7] ss:$0 sm:$0xff] }
 0x173   : > { %2212 = vmatprep.mubr.msk.bf16.mxu0 %vm2560_vm2, %v2559_v26  ;;  %2191 = vmatpush3.bf16.msra.mxu1 %v2392_v33 }
 0x174   : > { %2197 = vmatpush3.bf16.msra.mxu0 %v2393_v57  ;;  %v2412_v57 = vld [vmem:[%s3150_s1 + $0x48] sm:$0xff]  }
 0x175   : > { %2198 = vmatprep.subr.bf16.mxu0 %v2559_v26 }
 0x178   : > { %2199 = vmatpush3.bf16.msra.mxu0 %v2394_v58  ;;  %v2413_v58 = vld [vmem:[%s3150_s1 + $0x88] sm:$0xff]  }
 0x179   : > { %2200 = vmatprep.subr.bf16.mxu0 %v2559_v26 }
 0x17c   : > { %2201 = vmatpush3.bf16.msra.mxu0 %v2395_v59  ;;  %v2414_v59 = vld [vmem:[%s3150_s1 + $0x8] sm:$0xff]  }
 0x17d   : > { %2202 = vmatprep.subr.bf16.mxu0 %v2559_v26 }
 0x180   : > { %2203 = vmatpush3.bf16.msra.mxu0 %v2396_v60  ;;  %v2415_v60 = vld [vmem:[%s3150_s1 + $0x50] sm:$0xff]  }
 0x181   : > { %2204 = vmatprep.subr.bf16.mxu0 %v2559_v26 }
 0x184   : > { %2205 = vmatpush3.bf16.msra.mxu0 %v2397_v61  ;;  %v2416_v61 = vld [vmem:[%s3150_s1 + $0x90] sm:$0xff]  }
 0x185   : > { %2206 = vmatprep.subr.bf16.mxu0 %v2559_v26 }
 0x188   : > { %2207 = vmatpush3.bf16.msra.mxu0 %v2398_v62  ;;  %v2417_v62 = vld [vmem:[%s3150_s1 + $0x10] sm:$0xff]  }
 0x189   : > { %2208 = vmatprep.subr.bf16.mxu0 %v2559_v26 }
 0x18c   : > { %2209 = vmatpush3.bf16.msra.mxu0 %v2399_v63  ;;  %v2418_v63 = vld [vmem:[%s3150_s1 + $0x58] sm:$0xff]  }
 0x18d   : > { %2210 = vmatprep.subr.bf16.mxu0 %v2559_v26 }
 0x190   : > { %2211 = vmatpush3.bf16.msra.mxu0 %v2400_v0  ;;  %v2419_v0 = vld [vmem:[%s3150_s1 + $0x98] sm:$0xff]  }
 0x191   : > { %2224 = vmatprep.subr.bf16.mxu0 %v2559_v26 }
 0x245   : > { %v2118_v34 = vpop.f32.mrb[0].mxu0 }
 0x246   : > { %v2119_v36 = vpop.f32.mrb[1].mxu0 }
 0x247   : > { %v2120_v37 = vadd.f32 %v2119_v36, %v2118_v34  ;;  %v2121_v38 = vpop.f32.mrb[2].mxu0 }
 0x248   : > { %v2122_v39 = vpop.f32.mrb[3].mxu0  ;;  %v1286_v38 = vld [vmem:[#allocation2 + $0x8] sm:$0xff] }
 0x249   : > { %v950_v40 = vadd.f32 %v2120_v37, %v2020_v35  ;;  %1292 = vmatprep.subr.bf16.mxu1 %v1286_v38  ;;  %v1285_v39 = vld [vmem:[#allocation2] sm:$0xff] }
 0x24a   : > { %v2423_v38 = vld [vmem:[%s3150_s1 + $0x20] sm:$0xff]  }
 0x24b   : > { %v958_v41 = vand.u32 2147483647, %v950_v40  ;;  %v955_v52 = vmax.f32 %v950_v40, 0.0  ;;  %vm956_vm4 = vcmp.ne.f32.partialorder %v950_v40, %v950_v40 }
 0x24d   : > { %v959_v42 = vsub.f32 0.0, %v958_v41  ;;  %v1287_v41 = vld [vmem:[#allocation2 + $0x10] sm:$0xff] }
 0x24f   : > { %v960_v43 = vmul.f32 1.442695, %v959_v42  ;;  %v2403_v42 = vld [vmem:[%s3162_s13 + $0x4] ss:$12 sps:$4 sm:$0xff]  }
 0x251   : > { %2433 = vpow2.f32 %v960_v43  ;;  %v2561_v43 = vmov 0  }
 0x25b   : > { %v2434_v44 = vpop.eup %2433 }
 0x25c   : > { %v962_v45 = vadd.f32 1.0, %v2434_v44  ;;  %v965_v46 = vmul.f32 -0.5, %v2434_v44  ;;  %v968_v48 = vand.u32 2147483647, %v2434_v44 }
 0x25e   : > { %2435 = vlog2.f32 %v962_v45  ;;  %v966_v47 = vadd.f32 1.0, %v965_v46  ;;  %vm969_vm3 = vcmp.lt.f32.partialorder %v968_v48, 0.0004427343 }
 0x260   : > { %v967_v51 = vmul.f32 %v2434_v44, %v966_v47  ;;  %v2401_v47 = vld [vmem:[%s3162_s13] ss:$12 sps:$4 sm:$0xff]  }
 0x268   : > { %v2436_v49 = vpop.eup %2435 }
 0x269   : > { %v964_v50 = vmul.f32 0.6931472, %v2436_v49  ;;  %v2406_v49 = vld [vmem:[%s3162_s13 + $0x1c] ss:$12 sps:$4 sm:$0xff]  }
 0x26b   : > { %v970_v53 = vsel %vm969_vm3, %v967_v51, %v964_v50  ;;  %v2404_v50 = vld [vmem:[%s3162_s13 + $0x18] ss:$12 sps:$4 sm:$0xff]   ;;  %v2407_v51 = vld [vmem:[%s3162_s13 + $0x8] ss:$12 sps:$4 sm:$0xff]  }
 0x26c   : > { %v971_v54 = vadd.f32 %v970_v53, %v955_v52  ;;  %v2408_v52 = vld [vmem:[%s3162_s13 + $0x20] ss:$12 sps:$4 sm:$0xff]  }
 0x26d   : > { %v2058_v53 = vld [vmem:[%s3158_s9] ss:$0 sm:$0xff] }
 0x26e   : > { %v972_v55 = vsel %vm956_vm4, %v950_v40, %v971_v54  ;;  %v1288_v40 = vld [vmem:[#allocation2 + $0x18] sm:$0xff]  ;;  %v2409_v54 = vld [vmem:[%s3150_s1 + $0x40] sm:$0xff]  }
 0x26f   : > { %v973_v56 = vpack.c.bf16 %v972_v55, %v972_v55  ;;  %v2410_v55 = vld [vmem:[%s3150_s1 + $0x80] sm:$0xff]  }
 0x271   : > { %2193 = vmatmul.mubr.bf16.vlgmr.msra.gmra.mrb[0].mxu1 %v973_v56  ;;  %v2411_v56 = vld [vmem:[%s3150_s1] sm:$0xff]  }
 0x272   : > { %1293 = vmatpush1.bf16.msra.mxu1 %v1285_v39  ;;  %1324 = vmatprep.mubr.bf16.mxu1 %v2561_v43 }
 0x273   : > { %1294 = vmatprep.subr.bf16.mxu1 %v1288_v40  ;;  %v2424_v40 = vld [vmem:[%s3150_s1 + $0x68] sm:$0xff]  }
 0x276   : > { %1295 = vmatpush1.bf16.msra.mxu1 %v1287_v41  ;;  %v2425_v41 = vld [vmem:[%s3150_s1 + $0xa8] sm:$0xff]  }
 0x277   : > { %1434 = vmatprep.subr.bf16.mxu1 %v2403_v42  ;;  %v2426_v42 = vld [vmem:[%s3150_s1 + $0x28] sm:$0xff]  }
 0x344   : > { %v1079_v2 = vpop.f32.mrb[0].mxu1 }
 0x345   : > { %v1080_v3 = vadd.f32 %v2039_v1, %v1079_v2  ;;  %v2194_v4 = vpop.f32.mrb[1].mxu1  ;;  %v2420_v1 = vld [vmem:[%s3150_s1 + $0x18] sm:$0xff]   ;;  %v1387_v2 = vlaneseq }
 0x346   : > { %v1082_v5 = vpop.f32.mrb[2].mxu1 }
 0x347   : > { %v1088_v6 = vand.u32 2147483647, %v1080_v3  ;;  %v2195_v7 = vpop.f32.mrb[3].mxu1  ;;  %v1085_v19 = vmax.f32 %v1080_v3, 0.0  ;;  %vm1086_vm6 = vcmp.ne.f32.partialorder %v1080_v3, %v1080_v3 }
 0x349   : > { %v1089_v8 = vsub.f32 0.0, %v1088_v6 }
 0x34b   : > { %v1090_v9 = vmul.f32 1.442695, %v1089_v8 }
 0x34d   : > { %2437 = vpow2.f32 %v1090_v9 }
 0x357   : > { %v2438_v10 = vpop.eup %2437 }
 0x358   : > { %v1092_v11 = vadd.f32 1.0, %v2438_v10  ;;  %v1095_v12 = vmul.f32 -0.5, %v2438_v10  ;;  %v1098_v14 = vand.u32 2147483647, %v2438_v10 }
 0x35a   : > { %2439 = vlog2.f32 %v1092_v11  ;;  %v1096_v13 = vadd.f32 1.0, %v1095_v12  ;;  %vm1099_vm5 = vcmp.lt.f32.partialorder %v1098_v14, 0.0004427343 }
 0x35c   : > { %v1097_v18 = vmul.f32 %v2438_v10, %v1096_v13  ;;  %v1385_v10 = vld [vmem:[%s3163_s14] sm:$0x7] }
 0x364   : > { %v2440_v15 = vpop.eup %2439 }
 0x365   : > { %v1094_v16 = vmul.f32 0.6931472, %v2440_v15 }
 0x367   : > { %v1100_v20 = vsel %vm1099_vm5, %v1097_v18, %v1094_v16 }
 0x368   : > { %v1101_v21 = vadd.f32 %v1100_v20, %v1085_v19 }
 0x36a   : > { %v1102_v22 = vsel %vm1086_vm6, %v1080_v3, %v1101_v21  ;;  %v2980_v3 = vshrl.u32 %v1387_v2, 7 }
 0x36b   : > { %v1103_v23 = vpack.c.bf16 %v1102_v22, %v1102_v22 }
 0x36c   : > { %v2983_v8 = vsub.s32 0, %v2980_v3  ;;  %v1393_v9 = vsub.s32 1, %v2980_v3  ;;  %v1397_v15 = vsub.s32 2, %v2980_v3 }
 0x36d   : > { %2213 = vmatmul.mubr.bf16.vlgmr.msra.gmra.mrb[4].mxu0 %v1103_v23 }
 0x36e   : > { %2240 = vmatprep.mubr.msk.bf16.mxu0 %vm2560_vm2, %v2559_v26  ;;  %2225 = vmatpush3.bf16.msra.mxu0 %v2410_v55  ;;  %v1390_v11 = vrot.slane %v1385_v10, %v2983_v8  ;;  %v1394_v12 = vrot.slane %v1385_v10, %v1393_v9  ;;  %v1398_v21 = vrot.slane %v1385_v10, %v1397_v15 }
 0x36f   : > { %2226 = vmatprep.subr.bf16.mxu0 %v2559_v26 }
 0x372   : > { %2227 = vmatpush3.bf16.msra.mxu0 %v2413_v58 }
 0x373   : > { %2228 = vmatprep.subr.bf16.mxu0 %v2559_v26 }
 0x376   : > { %2229 = vmatpush3.bf16.msra.mxu0 %v2416_v61 }
 0x377   : > { %2230 = vmatprep.subr.bf16.mxu0 %v2559_v26 }
 0x37a   : > { %2231 = vmatpush3.bf16.msra.mxu0 %v2419_v0 }
 0x37b   : > { %2232 = vmatprep.subr.bf16.mxu0 %v2559_v26 }
 0x440   : > { %v1209_v25 = vpop.f32.mrb[4].mxu0 }
 0x441   : > { %v1210_v27 = vadd.f32 %v2048_v24, %v1209_v25  ;;  %v2214_v28 = vpop.f32.mrb[5].mxu0 }
 0x442   : > { %v1212_v29 = vpop.f32.mrb[6].mxu0 }
 0x443   : > { %v2904_v30 = vmul.f32 0.999995, %v1210_v27  ;;  %v2215_v31 = vpop.f32.mrb[7].mxu0 }
 0x445   : > { %v1217_v32 = vsel %vm1216_vm7, %v2904_v30, -inf }
 0x446   : > { %1218 = vmax.xlane.f32.xlu0 %v1217_v32 }
 0x4d3   : > { %v1219_v33 = vpop.xlane.xlu0 %1218 }
 0x4d4   : > { %v1220_v34 = vsub.f32 %v2904_v30, %v1219_v33 }
 0x4d6   : > { %v1221_v35 = vmul.f32 1.442695, %v1220_v34  ;;  %v2057_v34 = vld [vmem:[%s3157_s8] ss:$0 sm:$0xff] }
 0x4d8   : > { %2441 = vpow2.f32 %v1221_v35  ;;  %v1238_v35 = vsub.f32 %v2904_v30, %v2057_v34 }
 0x4da   : > { %v1239_v39 = vmul.f32 %v1238_v35, %v1238_v35 }
 0x4e2   : > { %v2442_v36 = vpop.eup %2441 }
 0x4e3   : > { %v1223_v37 = vsel %vm1216_vm7, %v2442_v36, 0.0 }
 0x4e4   : > { %1224 = vadd.xlane.f32.xlu0 %v1223_v37  ;;  %v2422_v37 = vld [vmem:[%s3150_s1 + $0xa0] sm:$0xff]  }
 0x4e5   : > { %2233 = vmatpush3.bf16.msra.mxu0 %v2422_v37 }
 0x4e6   : > { %2234 = vmatprep.subr.bf16.mxu0 %v2559_v26 }
 0x4e9   : > { %2235 = vmatpush3.bf16.msra.mxu0 %v2425_v41 }
 0x4ea   : > { %2236 = vmatprep.subr.bf16.mxu0 %v2559_v26 }
 0x4fa   : > { %1251 = vrot.lane.b32.xlu0 %v2058_v53, %s2562_s0 }
 0x571   : > { %v1225_v44 = vpop.xlane.xlu0 %1224 }
 0x572   : > { %2443 = vrcp.f32 %v1225_v44  ;;  %v2427_v44 = vld [vmem:[%s3150_s1 + $0x70] sm:$0xff]  }
 0x57c   : > { %v2444_v45 = vpop.eup %2443 }
 0x57d   : > { %v1227_v46 = vmul.f32 %v2444_v45, %v2442_v36  ;;  %v2421_v36 = vld [vmem:[%s3150_s1 + $0x60] sm:$0xff]   ;;  %v2428_v45 = vld [vmem:[%s3150_s1 + $0xb0] sm:$0xff]  }
 0x57e   : > { %2237 = vmatpush3.bf16.msra.mxu0 %v2428_v45 }
 0x57f   : > { %v1228_v48 = vpack.c.bf16 %v1227_v46, %v1227_v46  ;;  %v2429_v46 = vld [vmem:[%s3150_s1 + $0x30] sm:$0xff]   ;;  %2238 = vmatprep.subr.bf16.mxu0 %v2559_v26 }
 0x581   : > { %2061 = vmatmul.mubr.msk.bf16.vlgmr.msra.gmra.mrb[4].mxu1 %vm1216_vm7, %v1228_v48 }
 0x582   : > { %1435 = vmatpush1.bf16.msra.mxu1 %v2401_v47  ;;  %1466 = vmatprep.mubr.bf16.mxu1 %v2561_v43  ;;  %v2059_v43 = vld [vmem:[%s3159_s10] ss:$0 sm:$0xff]  ;;  %v2430_v47 = vld [vmem:[%s3150_s1 + $0x78] sm:$0xff]  }
 0x583   : > { %1436 = vmatprep.subr.bf16.mxu1 %v2406_v49  ;;  %v2432_v49 = vld [vmem:[%s3150_s1 + $0x38] sm:$0xff]  }
 0x586   : > { %1437 = vmatpush1.bf16.msra.mxu1 %v2404_v50 }
 0x587   : > { %2216 = vmatprep.subr.bf16.mxu1 %v2559_v26 }
 0x589   : > { %2068 = vmatmul.mubr.msk.bf16.vlgmr.msra.gmra.mrb[8].mxu1 %vm1216_vm7, %v1228_v48 }
 0x58a   : > { %2217 = vmatpush3.bf16.msra.mxu1 %v2407_v51  ;;  %2220 = vmatprep.mubr.msk.bf16.mxu1 %vm2560_vm2, %v2559_v26 }
 0x58b   : > { %2218 = vmatprep.subr.bf16.mxu1 %v2559_v26 }
 0x58e   : > { %2219 = vmatpush3.bf16.msra.mxu1 %v2408_v52  ;;  %v1229_v52 = vmul.f32 1.442695, %v2904_v30 }
 0x58f   : > { %2145 = vmatprep.subr.bf16.mxu1 %v2409_v54 }
 0x590   : > { %2445 = vpow2.f32 %v1229_v52 }
 0x591   : > { %2221 = vmatmul.mubr.msk.bf16.vlgmr.msra.gmra.mrb[12].mxu1 %vm1216_vm7, %v1228_v48  ;;  %v2431_v48 = vld [vmem:[%s3150_s1 + $0xb8] sm:$0xff]  }
 0x592   : > { %2146 = vmatpush3.bf16.msra.mxu1 %v2411_v56  ;;  %2239 = vmatpush3.bf16.msra.mxu0 %v2431_v48  ;;  %v1252_v56 = vpop.permute.xlu0 %1251 }
 0x593   : > { %2147 = vmatprep.subr.bf16.mxu1 %v2412_v57 }
 0x596   : > { %2148 = vmatpush3.bf16.msra.mxu1 %v2414_v59 }
 0x597   : > { %2149 = vmatprep.subr.bf16.mxu1 %v2415_v60 }
 0x59a   : > { %2150 = vmatpush3.bf16.msra.mxu1 %v2417_v62  ;;  %v2446_v54 = vpop.eup %2445 }
 0x59b   : > { %2151 = vmatprep.subr.bf16.mxu1 %v2418_v63 }
 0x59e   : > { %2152 = vmatpush3.bf16.msra.mxu1 %v2420_v1 }
 0x59f   : > { %2153 = vmatprep.subr.bf16.mxu1 %v2421_v36 }
 0x5a2   : > { %2154 = vmatpush3.bf16.msra.mxu1 %v2423_v38 }
 0x5a3   : > { %2155 = vmatprep.subr.bf16.mxu1 %v2424_v40 }
 0x5a6   : > { %2156 = vmatpush3.bf16.msra.mxu1 %v2426_v42  ;;  %v1356_v42 = vunpack.c.l.bf16 %v2803_v17 }
 0x5a7   : > { %2157 = vmatprep.subr.bf16.mxu1 %v2427_v44  ;;  %v1808_v44 = vstv %s2095_s26 }
 0x5aa   : > { %2158 = vmatpush3.bf16.msra.mxu1 %v2429_v46  ;;  %v3070_v46 = vand.u32 127, %v1387_v2 }
 0x5ab   : > { %2159 = vmatprep.subr.bf16.mxu1 %v2430_v47  ;;  %v1809_v47 = vadd.s32 %v1808_v44, %v2980_v3 }
 0x5ac   : > { %vm1852_vm10 = vcmp.eq.s32.totalorder (!%p2096_p0), %v3070_v46, 0  ;;  %vm1863_vm11 = vcmp.eq.s32.totalorder (!%p2096_p0), %v3070_v46, 1  ;;  %vm1875_vm12 = vcmp.eq.s32.totalorder (!%p2096_p0), %v3070_v46, 2  ;;  %vm1887_vm13 = vcmp.eq.s32.totalorder (!%p2096_p0), %v3070_v46, 3 }
 0x5ad   : > { %vm1810_vm8 = vcmp.eq.s32.totalorder %v3070_v46, %v1809_v47  ;;  %vm1899_vm14 = vcmp.eq.s32.totalorder (!%p2096_p0), %v3070_v46, 4 }
 0x5ae   : > { %2160 = vmatpush3.bf16.msra.mxu1 %v2432_v49 }
 0x654   : > { %v1326_v4 = vpop.f32.mrb[4].mxu1 }
 0x655   : > { %v1328_v5 = vpop.f32.mrb[5].mxu1  ;;  %v3047_v50 = vmul.f32 0.999995, %v1326_v4 }
 0x656   : > { %v1330_v6 = vpop.f32.mrb[6].mxu1  ;;  %v3049_v51 = vmul.f32 0.999995, %v1328_v5 }
 0x657   : > { %v1331_v7 = vpop.f32.mrb[7].mxu1  ;;  %v1361_v48 = vmul.f32 %v1356_v42, %v3047_v50 }
 0x658   : > { %v1335_v26 = vmax.f32 %v3047_v50, %v3049_v51 }
 0x65c   : > { %v1468_v13 = vpop.f32.mrb[8].mxu1 }
 0x65d   : > { %v1470_v14 = vpop.f32.mrb[9].mxu1  ;;  %v2991_v18 = vadd.f32 %v1468_v13, %v1390_v11 }
 0x65e   : > { %v1472_v16 = vpop.f32.mrb[10].mxu1  ;;  %v2993_v19 = vadd.f32 %v1470_v14, %v1394_v12 }
 0x65f   : > { %v1473_v20 = vpop.f32.mrb[11].mxu1  ;;  %v1515_v22 = vmul.f32 %v2991_v18, %v2991_v18 }
 0x660   : > { %v1516_v23 = vmul.f32 %v2993_v19, %v2993_v19 }
 0x662   : > { %v1518_v32 = vadd.f32 %v1516_v23, %v1515_v22 }
 0x664   : > { %v1509_v24 = vpop.f32.mrb[12].mxu1 }
 0x665   : > { %v1510_v25 = vadd.f32 %v1509_v24, %v1398_v21  ;;  %v2222_v27 = vpop.f32.mrb[13].mxu1 }
 0x666   : > { %v1512_v28 = vpop.f32.mrb[14].mxu1 }
 0x667   : > { %v2223_v29 = vpop.f32.mrb[15].mxu1  ;;  %v1517_v31 = vmul.f32 %v1510_v25, %v1510_v25 }
 0x669   : > { %v1519_v33 = vadd.f32 %v1518_v32, %v1517_v31 }
 0x66b   : > { %1520 = vadd.xlane.f32.xlu1 %v1519_v33 }
 0x67c   : > { %1241 = vrot.lane.b32.xlu1 %v1239_v39, %s2562_s0 }
 0x680   : > { %1261 = vrot.lane.b32.xlu1 %v2059_v43, %s2562_s0  ;;  %s2563_s0 = smov 96   ;;  %v1357_v43 = vunpack.c.h.bf16 %v2803_v17 }
 0x682   : > { %v1358_v45 = vadd.f32 %v1357_v43, %v1356_v42  ;;  %v1362_v49 = vmul.f32 %v1357_v43, %v3049_v51 }
 0x6a4   : > { %1336 = vmax.xlane.f32.xlu1 %v1335_v26  ;;  %v1363_v26 = vadd.f32 %v1362_v49, %v1361_v48 }
 0x6f8   : > { %v1521_v53 = vpop.xlane.xlu1 %1520 }
 0x6f9   : > { %2447 = vrsqrt.f32 %v1521_v53 }
 0x6fc   : > { %v1242_v55 = vpop.permute.xlu1 %1241 }
 0x6fd   : > { %v1244_v57 = vadd.f32 %v2446_v54, %v1242_v55 }
 0x6ff   : > { %v1254_v58 = vmul.f32 %v1252_v56, %v1244_v57 }
 0x700   : > { %v1262_v59 = vpop.permute.xlu1 %1261 }
 0x701   : > { %v1264_v60 = vadd.f32 %v1262_v59, %v1254_v58 }
 0x703   : > { %v2448_v61 = vpop.eup %2447  ;;  %v1265_v33 = vsub.f32 %v1264_v60, %v2904_v30 }
 0x704   : > { %v1524_v62 = vmul.f32 %v2448_v61, %v2993_v19  ;;  %v1525_v63 = vmul.f32 %v2448_v61, %v1510_v25  ;;  %v1523_v0 = vmul.f32 %v2448_v61, %v2991_v18 }
 0x706   : > { %v1527_v1 = vpack.c.bf16 %v1524_v62, %v1524_v62  ;;  %v1528_v4 = vpack.c.bf16 %v1525_v63, %v1525_v63  ;;  %v1526_v5 = vpack.c.bf16 %v1523_v0, %v1523_v0 }
 0x708   : > { %1753 = vmatprep.mubr.bf16.mxu1 %v1527_v1  ;;  %2241 = vmatmul.mubr.bf16.vlgmr.msra.gmra.mrb[8].mxu0 %v1528_v4 }
 0x709   : > { %1754 = vmatmul.mubr.bf16.vlgmr.msra.gmra.mrb[16].mxu1 %v1526_v5 }
 0x731   : > { %v3056_v6 = vpop.xlane.xlu1 %1336 }
 0x732   : > { %v1338_v7 = vsub.f32 %v3047_v50, %v3056_v6  ;;  %v1339_v9 = vsub.f32 %v3049_v51, %v3056_v6 }
 0x734   : > { %v1340_v10 = vpack.c.bf16 %v1338_v7, %v1338_v7  ;;  %v1341_v11 = vpack.c.bf16 %v1339_v9, %v1339_v9 }
 0x736   : > { %v1343_v12 = vmul.bf16 1069105081, %v1340_v10  ;;  %v1346_v13 = vmul.bf16 1069105081, %v1341_v11 }
 0x738   : > { %2449 = vpow.bf16 %v1343_v12 }
 0x739   : > { %2451 = vpow.bf16 %v1346_v13  ;;  %v1275_v13 = vld [vmem:[#allocation3] sm:$0x1] }
 0x743   : > { %v2450_v14 = vpop.eup %2449 }
 0x744   : > { %v2452_v15 = vpop.eup %2451  ;;  %v1348_v16 = vunpack.c.l.bf16 %v2450_v14 }
 0x745   : > { %v1349_v18 = vunpack.c.l.bf16 %v2452_v15 }
 0x747   : > { %v1350_v19 = vadd.f32 %v1349_v18, %v1348_v16 }
 0x749   : > { %1351 = vadd.xlane.f32.xlu1 %v1350_v19 }
 0x7d6   : > { %v1352_v53 = vpop.xlane.xlu1 %1351 }
 0x7db   : > { %v1795_v20 = vpop.f32.mrb[8].mxu0 }
 0x7dc   : > { %v2161_v21 = vpop.f32.mrb[16].mxu1  ;;  %v2242_v22 = vpop.f32.mrb[9].mxu0 }
 0x7dd   : > { %v2162_v23 = vpop.f32.mrb[17].mxu1  ;;  %v1798_v24 = vpop.f32.mrb[10].mxu0  ;;  %v1366_v22 = vld [vmem:[#allocation4] sm:$0x1] }
 0x7de   : > { %v2163_v25 = vadd.f32 %v2162_v23, %v2161_v21  ;;  %v2164_v27 = vpop.f32.mrb[18].mxu1  ;;  %v2243_v28 = vpop.f32.mrb[11].mxu0 }
 0x7df   : > { %v2165_v29 = vpop.f32.mrb[19].mxu1  ;;  %v1830_v28 = vld [vmem:[#allocation5] sm:$0x1] }
 0x7e0   : > { %v1796_v31 = vadd.f32 %v2163_v25, %v1795_v20 }
 0x7e2   : > { %v1815_v32 = vsel %vm1216_vm7, %v1796_v31, -inf  ;;  %v1811_v17 = vsel %vm1810_vm8, %v1796_v31, 0.0 }
 0x7e3   : > { %1816 = vmax.xlane.f32.xlu0 %v1815_v32  ;;  %v1812_v52 = vsel %vm1216_vm7, %v1811_v17, 0.0 }
 0x7f9   : > { %1267 = vrot.lane.b32.xlu0 %v1265_v33, %s2563_s0 }
 0x870   : > { %v1817_v34 = vpop.xlane.xlu0 %1816 }
 0x871   : > { %v1818_v35 = vsub.f32 %v1796_v31, %v1817_v34 }
 0x873   : > { %v1819_v36 = vpack.c.bf16 %v1818_v35, %v1818_v35 }
 0x874   : > { %v1268_v41 = vpop.permute.xlu0 %1267 }
 0x875   : > { %v1821_v37 = vmul.bf16 1069105081, %v1819_v36  ;;  %v1270_v30 = vsel %vm1216_vm7, %v1268_v41, 0.0 }
 0x877   : > { %2453 = vpow.bf16 %v1821_v37 }
 0x878   : > { %2455 = vlog2.f32 %v1352_v53 }
 0x882   : > { %v2454_v38 = vpop.eup %2453 }
 0x883   : > { %v1823_v39 = vunpack.c.l.bf16 %v2454_v38  ;;  %v2456_v2 = vpop.eup %2455 }
 0x884   : > { %v1354_v3 = vmul.f32 0.6931472, %v2456_v2 }
 0x885   : > { %v1824_v40 = vsel %vm1216_vm7, %v1823_v39, 0.0 }
 0x886   : > { %1825 = vadd.xlane.f32.xlu1 %v1824_v40  ;;  %v1355_v58 = vadd.f32 %v1354_v3, %v3056_v6 }
 0x88a   : > { %1271 = vadd.xlane.f32.xlu1 %v1270_v30 }
 0x88e   : > { %1359 = vadd.xlane.f32.xlu1 %v1358_v45 }
 0x892   : > { %1364 = vadd.xlane.f32.xlu1 %v1363_v26 }
 0x896   : > { %1813 = vadd.xlane.f32.xlu1 %v1812_v52 }
 0x913   : > { %v1826_v54 = vpop.xlane.xlu1 %1825 }
 0x914   : > { %2457 = vlog2.f32 %v1826_v54 }
 0x917   : > { %v1272_v55 = vpop.xlane.xlu1 %1271 }
 0x918   : > { %v2060_v56 = vadd.f32 -32.0, %v1272_v55 }
 0x91a   : > { %v1274_v50 = vmul.f32 0.5, %v2060_v56 }
 0x91b   : > { %v1360_v57 = vpop.xlane.xlu1 %1359 }
 0x91c   : > { %v1276_v51 = vrot.slane %v1274_v50, 4  ;;  %v1367_v61 = vmul.f32 %v1360_v57, %v1355_v58 }
 0x91e   : > { %v2458_v59 = vpop.eup %2457  ;;  %v1277_v60 = vadd.f32 %v1276_v51, %v1274_v50 }
 0x91f   : > { %v1828_v62 = vmul.f32 0.6931472, %v2458_v59  ;;  %v1365_v63 = vpop.xlane.xlu1 %1364 }
 0x920   : > { %v1278_v0 = vrot.slane %v1277_v60, 2  ;;  %v1368_v1 = vsub.f32 %v1367_v61, %v1365_v63 }
 0x921   : > { %v1829_v4 = vadd.f32 %v1828_v62, %v1817_v34  ;;  %v2564_v34 = vmov (!%p2096_p0), 0  }
 0x922   : > { %v1279_v5 = vadd.f32 %v1278_v0, %v1277_v60  ;;  %v1369_v7 = vrot.slane %v1368_v1, 4  ;;  %2460 = vset.pattern.permute.xlu1 (!%p2096_p0), %v2564_v34  ;;  %2459 = vset.pattern.permute.xlu0 (!%p2096_p0), %v2564_v34 }
 0x923   : > { %v1814_v9 = vpop.xlane.xlu1 %1813 }
 0x924   : > { %v1280_v10 = vrot.slane %v1279_v5, 1  ;;  %v1370_v11 = vadd.f32 %v1369_v7, %v1368_v1  ;;  %v1831_v12 = vsub.f32 %v1829_v4, %v1814_v9 }
 0x926   : > { %v1281_v14 = vadd.f32 %v1280_v10, %v1279_v5  ;;  %v1371_v15 = vrot.slane %v1370_v11, 2  ;;  %v1832_v16 = vrot.slane %v1831_v12, 4 }
 0x928   : > { %v1282_v6 = vadd.f32 %v1281_v14, %v1275_v13  ;;  %v1372_v18 = vadd.f32 %v1371_v15, %v1370_v11  ;;  %v1833_v19 = vadd.f32 %v1832_v16, %v1831_v12 }
 0x92a   : > { %1284 = vst.msk [vmem:[#allocation3] sm:$0x1] %vm1283_vm9, %v1282_v6  ;;  %v1373_v20 = vrot.slane %v1372_v18, 1  ;;  %v1834_v21 = vrot.slane %v1833_v19, 2 }
 0x92c   : > { %v1374_v23 = vadd.f32 %v1373_v20, %v1372_v18  ;;  %v1835_v24 = vadd.f32 %v1834_v21, %v1833_v19 }
 0x92e   : > { %v1375_v25 = vadd.f32 %v1374_v23, %v1366_v22  ;;  %v1836_v27 = vrot.slane %v1835_v24, 1  ;;  %1843 = sbr.rel (%p2096_p0) target bundleno = 2512 (0x9d0), region = 88 }
 0x930   : > { %1376 = vst.msk [vmem:[#allocation4] sm:$0x1] %vm1283_vm9, %v1375_v25  ;;  %v1837_v29 = vadd.f32 %v1836_v27, %v1835_v24 }
 0x931   : > { %v1844_v32 = vld [vmem:[#allocation3] sm:$0x1] (!%p2096_p0) }
 0x932   : > { %v1838_v31 = vadd.f32 %v1837_v29, %v1830_v28  ;;  %v1845_v35 = vmul.f32 (!%p2096_p0), 0.03125, %v1844_v32 }
 0x934   : > { %1839 = vst.msk [vmem:[#allocation5] sm:$0x1] %vm1283_vm9, %v1838_v31  ;;  %v1880_v39 = vrot.slane (!%p2096_p0), %v1845_v35, %v2983_v8 }
 0x936   : > { %1882 = vperm.xlu1 %2460, %v1880_v39  }
 0x937   : > { %v1846_v33 = vld [vmem:[#allocation4] sm:$0x1] }
 0x938   : > { %v1847_v36 = vmul.f32 0.03125, %v1846_v33 }
 0x93a   : > { %v1850_v40 = vadd.f32 %v1847_v36, %v1845_v35  ;;  %v1892_v42 = vrot.slane %v1847_v36, %v2983_v8 }
 0x93b   : > { %v1848_v37 = vld [vmem:[#allocation5] sm:$0x1] }
 0x93c   : > { %v1849_v38 = vmul.f32 0.3125, %v1848_v37  ;;  %1894 = vperm.xlu1 %2460, %v1892_v42   ;;  %v1868_v44 = vrot.slane %v1850_v40, %v2983_v8 }
 0x93e   : > { %v1851_v41 = vadd.f32 %v1850_v40, %v1849_v38  ;;  %v1904_v30 = vrot.slane %v1849_v38, %v2983_v8 }
 0x940   : > { %v1857_v43 = vrot.slane %v1851_v41, %v2983_v8 }
 0x942   : > { %1859 = vperm.xlu0 %2459, %v1857_v43  }
 0x946   : > { %1870 = vperm.xlu0 %2459, %v1868_v44  }
 0x94a   : > { %1906 = vperm.xlu0 %2459, %v1904_v30  }
 0x9b5   : > { %v1883_v45 = vpop.permute.xlu1 %1882 }
 0x9b6   : > { %v1885_v53 = vsel %vm1875_vm12, %v1883_v45, 0.0 }
 0x9bb   : > { %v1895_v17 = vpop.permute.xlu1 %1894 }
 0x9bc   : > { %v1897_v2 = vsel %vm1887_vm13, %v1895_v17, 0.0 }
 0x9c1   : > { %v1860_v47 = vpop.permute.xlu0 %1859 }
 0x9c2   : > { %v1862_v49 = vsel %vm1852_vm10, %v1860_v47, 0.0 }
 0x9c5   : > { %v1871_v48 = vpop.permute.xlu0 %1870 }
 0x9c6   : > { %v1873_v26 = vsel %vm1863_vm11, %v1871_v48, 0.0 }
 0x9c7   : > { %v1874_v52 = vadd.f32 %v1873_v26, %v1862_v49 }
 0x9c9   : > { %v1886_v54 = vadd.f32 %v1885_v53, %v1874_v52  ;;  %v1907_v8 = vpop.permute.xlu0 %1906 }
 0x9ca   : > { %v1909_v3 = vsel %vm1899_vm14, %v1907_v8, 0.0 }
 0x9cb   : > { %v1898_v55 = vadd.f32 %v1897_v2, %v1886_v54 }
 0x9cd   : > { %v1910_v56 = vadd.f32 %v1909_v3, %v1898_v55 }
 0x9cf   : > { %1911 = vst [vmem:[%s3189_s21] sm:$0xff] %v1910_v56 }
 0x9d0 PF: > { %s2098_s25 = sshll.u32 %s2543_s22, 7  ;;  %s3190_s29 = scalar_lea.vmem [#allocation6], %s2719_s18 }
 0x9d1   : > { %s3098_s23 = scalar_lea.hbm %s3164_s15, %s2098_s25  ;;  %s1926_s28 = sshll.u32 %s3190_s29, 4  ;;  %s1927_s28 = int_to_ptr.vmem [resolvable:$true] %s1926_s28 }
 0x9d2   : > { %s3191_s11 = sand.u32 1, %s2531_s19   ;;  %s2461_s17 = scalar_lea.vmem %s1927_s28, 128 }
 0x9d3   : > { %s1913_s24 = scalar_lea.sflag [#allocation7], %s3191_s11  ;;  %p2462_p1 = scmp.ne.s32.totalorder %s1927_s28, %s2461_s17 }
 0x9d4   : > { %s2565_s20 = smov [#allocation6]  }
 0x9d5   : > { %p2463_p2 = pnand %p2462_p1, %p2695_p3  ;;  %s2465_s0 = sshll.u32 %s2565_s20, 4  ;;  %s2466_s0 = int_to_ptr.vmem [resolvable:$false] %s2465_s0 }
 0x9d6   : > { %s2467_s26 = scalar_lea.vmem %s2466_s0, 256  ;;  %p2468_p5 = scmp.lt.s32.totalorder %s1927_s28, %s2466_s0 }
 0x9d7   : > { %p2464_p4 = pneg %p2463_p2  ;;  %p2469_p6 = scmp.lt.s32.totalorder %s2467_s26, %s2461_s17 }
 0x9d9   : > { %p2470_p7 = por %p2469_p6, %p2468_p5 }
 0x9db   : > { %p2471_p8 = pnand %p2470_p7, %p2464_p4 }
 0x9dd   : > { %2474 = shalt.err (!%p2471_p8)
}
 0x9de   : > { %s2475_s18 = scalar_lea.hbm %s3098_s23, 128  ;;  %s2479_s25 = scalar_lea.hbm %s3164_s15, 256 }
 0x9df   : > { %p2476_p10 = scmp.ne.s32.totalorder %s3098_s23, %s2475_s18  ;;  %p2480_p13 = scmp.lt.u32.totalorder %s3098_s23, %s3164_s15 }
 0x9e0   : > { %p2481_p0 = scmp.lt.u32.totalorder %s2479_s25, %s2475_s18  ;;  %p2483_p2 = scmp.lt.u32.totalorder %s2475_s18, %s3098_s23 }
 0x9e1   : > { %p2477_p11 = pnand %p2476_p10, %p2695_p3 }
 0x9e2   : > { %p2482_p1 = por %p2481_p0, %p2480_p13 }
 0x9e3   : > { %p2478_p12 = pneg %p2477_p11 }
 0x9e4   : > { %p2484_p4 = por %p2483_p2, %p2482_p1 }
 0x9e6   : > { %p2485_p5 = pnand %p2484_p4, %p2478_p12 }
 0x9e8   : > { %2488 = shalt.err (!%p2485_p5)
}
 0x9e9   : > { %2252 = dma.vmem_to_hbm [thread:$0]  (%p2695_p3), %s1927_s28, 128, %s3098_s23, %s1913_s24  }
 0x9ea PF: > { %s3192_s29 = sld [smem:[#allocation13_spill]]  ;;  %s3193_s11 = sld [smem:[#allocation9_spill]] }
 0x9f0   : > { %p2258_p6 = scmp.ge.s32.totalorder %s3192_s29, 2  ;;  %s1938_s20 = sand.u32 1, %s3193_s11  }
 0x9f1   : > { %s1939_s0 = scalar_lea.sflag [#allocation7], %s1938_s20 }
 0x9f2   : > { %p2255_p7 = pnand %p2258_p6, %p2705_p9 }
 0x9f4   : > { %2522 = dma.done.wait (!%p2255_p7), %s1939_s0, 128  }
 0x9f5   : > { %2524 = vsyncadd (!%p2255_p7), %s1939_s0, 4294967168  ;;  %s28_s25 = sadd.s32 1, %s3192_s29   ;;  %s3195_s26 = sld [smem:[#allocation10_spill]] }
 0x9f6   : > { %p25_p8 = scmp.ge.s32.totalorder %s28_s25, 6   ;;  %s3196_s20 = sld [smem:[#allocation17_spill]] }
 0x9f7   : > { %s3197_s21 = sld [smem:[#allocation11_spill]]  ;;  %s3198_s22 = sld [smem:[#allocation12_spill]] }
 0x9f8   : > { %s3199_s23 = sld [smem:[#allocation14_spill]]  ;;  %s3200_s24 = sld [smem:[#allocation15_spill]] }
 0x9f9   : > { %s3201_s18 = smov %s2531_s19  ;;  %27 = sbr.rel (!%p25_p8) target bundleno = 8 (0x8), region = 123 }
 0x9fb   : > { %s3202_s19 = smov %s3195_s26 }
 0xa00   :  { %1944 = vsyncpa [#allocation7], 1 }
 0xa01   :  { %1946 = vsyncpa [#allocation7 + $0x1], 1 }

</bundles_post_ra>
